<compile_context>
chip_gen: v6e
topology: v6e:2x2x1
jax: 0.10.0
libtpu: 0.0.40
codegen_flags: <defaults>
</compile_context>

<pallas_src>
import jax
import jax.numpy as jnp
from jax.experimental import pallas as pl
from jax.experimental.pallas import tpu as pltpu

BN_EPS = 1e-5
# f32 keeps numerical parity with the PyTorch module; switch to bf16 to halve
# HBM/VMEM traffic and fill the 256-wide MXU on v6e/v7x.
COMPUTE_DTYPE = jnp.float32


def _round_up(v, m):
    return (v + m - 1) // m * m


def _pair(v):
    return (v, v) if isinstance(v, int) else tuple(v)


# ---------------------------------------------------------------------------
# Pallas kernels
# ---------------------------------------------------------------------------
def _matmul_bias_relu_kernel(x_ref, w_ref, b_ref, o_ref, acc_ref):
    """One (tm, tn) tile of relu(patches @ w + bias); K reduction on grid axis 2."""
    k = pl.program_id(2)

    @pl.when(k == 0)
    def _():
        acc_ref[...] = jnp.zeros_like(acc_ref)

    acc_ref[...] += jnp.dot(x_ref[...], w_ref[...],
                            preferred_element_type=jnp.float32)

    @pl.when(k == pl.num_programs(2) - 1)
    def _():
        o_ref[...] = jnp.maximum(acc_ref[...] + b_ref[...], 0.0).astype(o_ref.dtype)


def _pool4s2_kernel(x_ref, o_ref):
    """Window-4 / stride-2 max along the (pair-packed) row axis.

    x: (P, 2, A, C) where row r of the original axis lives at (r // 2, r % 2).
    out: (P - 1, A, C) with out[o] = max(x[2o:2o+4]).
    """
    x = x_ref[...]
    y = jnp.maximum(x[:, 0], x[:, 1])          # pairwise max          (P, A, C)
    o_ref[...] = jnp.maximum(y[:-1], y[1:])    # adjacent-pair max     (P-1, A, C)


# ---------------------------------------------------------------------------
# Tiled matmul wrapper (conv-as-GEMM with fused bias + ReLU)
# ---------------------------------------------------------------------------
def _choose_tk(kdim):
    """K padded to a multiple of 128; tk a <=512 multiple of 128 dividing it."""
    kp = _round_up(kdim, 128)
    if kp <= 512:
        return kp, kp
    for tk in (512, 384, 256, 128):
        if kp % tk == 0:
            return kp, tk
    return kp, 128


def _matmul_bias_relu(patches, wmat, bias, tm=128):
    """relu(patches @ wmat + bias) via a tiled, pipelined Pallas matmul.

    patches: (M, K), wmat: (K, Cout) (BN scale already folded), bias: (Cout,).
    Returns (M, Cout) float32.
    """
    M, K = patches.shape
    Cout = wmat.shape[1]

    Kp, tk = _choose_tk(K)
    Np = _round_up(Cout, 128)
    tn = Np if Np <= 256 else 256
    if Np % tn:
        Np = _round_up(Np, tn)
    Mp = _round_up(M, tm)

    x = jnp.pad(patches.astype(COMPUTE_DTYPE), ((0, Mp - M), (0, Kp - K)))
    w = jnp.pad(wmat.astype(COMPUTE_DTYPE), ((0, Kp - K), (0, Np - Cout)))
    b = jnp.pad(bias.astype(jnp.float32), ((0, Np - Cout),)).reshape(1, Np)

    grid = (Mp // tm, Np // tn, Kp // tk)

    out = pl.pallas_call(
        _matmul_bias_relu_kernel,
        out_shape=jax.ShapeDtypeStruct((Mp, Np), jnp.float32),
        grid_spec=pltpu.PrefetchScalarGridSpec(
            num_scalar_prefetch=0,
            grid=grid,
            in_specs=[
                pl.BlockSpec((tm, tk), lambda i, j, k: (i, k)),
                pl.BlockSpec((tk, tn), lambda i, j, k: (k, j)),
                pl.BlockSpec((1, tn), lambda i, j, k: (0, j)),
            ],
            out_specs=pl.BlockSpec((tm, tn), lambda i, j, k: (i, j)),
            scratch_shapes=[pltpu.VMEM((tm, tn), jnp.float32)],
        ),
        compiler_params=pltpu.CompilerParams(
            dimension_semantics=("parallel", "parallel", "arbitrary"),
            vmem_limit_bytes=32 * 1024 * 1024,
        ),
    )(x, w, b)
    return out[:M, :Cout]


# ---------------------------------------------------------------------------
# im2col patch extraction (for k>1 convs) and conv/pool layer wrappers
# ---------------------------------------------------------------------------
def _extract_patches(x, kh, kw, sh, sw, ph, pw, pad_value=0.0):
    """x: (N, H, W, C) -> patches (N, OH, OW, kh*kw, C)."""
    N, H, W, C = x.shape
    xp = jnp.pad(x, ((0, 0), (ph, ph), (pw, pw), (0, 0)), constant_values=pad_value)
    Hp, Wp = H + 2 * ph, W + 2 * pw
    OH = (Hp - kh) // sh + 1
    OW = (Wp - kw) // sw + 1
    slices = []
    for i in range(kh):
        for j in range(kw):
            slices.append(
                xp[:, i:i + sh * (OH - 1) + 1:sh, j:j + sw * (OW - 1) + 1:sw, :]
            )
    patches = jnp.stack(slices, axis=3)  # (N, OH, OW, kh*kw, C)
    return patches, OH, OW


def conv_bn_relu(x, params):
    """Fused Conv2d(bias=False) + BatchNorm2d (inference) + ReLU.  x: NHWC f32."""
    w = params["w"]                                     # (Cout, Cin, kh, kw)
    Cout, Cin, kh, kw = w.shape
    sh, sw = params["stride"]
    ph, pw = params["padding"]
    N, H, W, _ = x.shape

    # Fold eval-mode BN: scale into the weights, bias applied in the kernel.
    scale = params["gamma"] / jnp.sqrt(params["var"] + BN_EPS)      # (Cout,)
    bias = params["beta"] - params["mean"] * scale                   # (Cout,)

    wmat = jnp.transpose(w, (2, 3, 1, 0)).reshape(kh * kw * Cin, Cout)
    wmat = wmat * scale[None, :]

    if kh == 1 and kw == 1 and (sh, sw) == (1, 1) and (ph, pw) == (0, 0):
        # 1x1 conv: pure channel mixing -> no patch extraction / HBM copy.
        OH, OW = H, W
        patches2d = x.reshape(N * H * W, Cin)
    else:
        patches, OH, OW = _extract_patches(x, kh, kw, sh, sw, ph, pw, 0.0)
        patches2d = patches.reshape(N * OH * OW, kh * kw * Cin)

    out = _matmul_bias_relu(patches2d, wmat, bias)
    return out.reshape(N, OH, OW, Cout)


def _pool4s2_axis1(x):
    """Max pool (window=4, stride=2) along axis 1 of (N, L, A, C), L pre-padded."""
    N, L, A, C = x.shape
    OL = (L - 4) // 2 + 1
    P = OL + 1                                  # number of row pairs needed
    xs = x[:, : 2 * P]                          # (N, 2P, A, C)   (2P <= L always)
    x4 = xs.reshape(N * P, 2, A, C)             # pair-pack rows (free reshape)

    out = pl.pallas_call(
        _pool4s2_kernel,
        out_shape=jax.ShapeDtypeStruct((N * OL, A, C), jnp.float32),
        grid=(N,),
        in_specs=[pl.BlockSpec((P, 2, A, C), lambda n: (n, 0, 0, 0))],
        out_specs=pl.BlockSpec((OL, A, C), lambda n: (n, 0, 0)),
        compiler_params=pltpu.CompilerParams(
            dimension_semantics=("parallel",),
        ),
    )(x4.astype(jnp.float32))
    return out.reshape(N, OL, A, C)


def maxpool2d(x, k, stride, padding):
    """MaxPool2d(kernel=4, stride=2, padding=1), PyTorch semantics.  x: NHWC."""
    assert k == 4 and stride == 2, "stem uses MaxPool2d(4, stride=2, padding=1)"
    xpad = jnp.pad(
        x.astype(jnp.float32),
        ((0, 0), (padding, padding), (padding, padding), (0, 0)),
        constant_values=-jnp.inf,
    )
    # Separable max: pool over H, then (via transpose) over W.
    t = _pool4s2_axis1(xpad)                    # (N, OH, Wp, C)
    t = jnp.transpose(t, (0, 2, 1, 3))          # (N, Wp, OH, C)
    t = _pool4s2_axis1(t)                       # (N, OW, OH, C)
    return jnp.transpose(t, (0, 2, 1, 3))       # (N, OH, OW, C)


# ---------------------------------------------------------------------------
# Deterministic parameter initialization (shapes from the PyTorch __init__)
# ---------------------------------------------------------------------------
def make_basic_conv(key, cin, cout, ksize, stride=1, padding=0):
    kh, kw = _pair(ksize)
    fan_in = cin * kh * kw
    w = jax.random.normal(key, (cout, cin, kh, kw), jnp.float32) * (fan_in ** -0.5)
    return {
        "w": w,
        # BatchNorm2d defaults: gamma=1, beta=0, running_mean=0, running_var=1
        "gamma": jnp.ones((cout,), jnp.float32),
        "beta": jnp.zeros((cout,), jnp.float32),
        "mean": jnp.zeros((cout,), jnp.float32),
        "var": jnp.ones((cout,), jnp.float32),
        "stride": _pair(stride),
        "padding": _pair(padding),
    }


def init_stem_params(key):
    ks = jax.random.split(key, 11)
    return {
        "conv1": [
            make_basic_conv(ks[0], 3, 32, 3, stride=2, padding=0),
            make_basic_conv(ks[1], 32, 32, 3, stride=1, padding=0),
            make_basic_conv(ks[2], 32, 64, 3, stride=1, padding=1),
        ],
        "branch3x3_conv": make_basic_conv(ks[3], 64, 96, 3, stride=2, padding=0),
        "branch7x7a": [
            make_basic_conv(ks[4], 160, 64, 1),
            make_basic_conv(ks[5], 64, 96, 3),
        ],
        "branch7x7b": [
            make_basic_conv(ks[6], 160, 64, 1),
            make_basic_conv(ks[7], 64, 64, (7, 1), padding=(3, 0)),
            make_basic_conv(ks[8], 64, 64, (1, 7), padding=(0, 3)),
            make_basic_conv(ks[9], 64, 96, 3),
        ],
        "branchpoola": make_basic_conv(ks[10], 192, 192, 3, stride=2, padding=0),
    }


# ---------------------------------------------------------------------------
# Stem forward (mirrors the PyTorch module; cat(dim=1) in NCHW == last axis
# in NHWC)
# ---------------------------------------------------------------------------
def stem_forward(params, x_nchw):
    x = jnp.transpose(x_nchw, (0, 2, 3, 1)).astype(jnp.float32)  # NCHW -> NHWC

    for layer in params["conv1"]:
        x = conv_bn_relu(x, layer)

    a = conv_bn_relu(x, params["branch3x3_conv"])
    b = maxpool2d(x, 4, 2, 1)
    x = jnp.concatenate([a, b], axis=-1)          # 96 + 64 = 160 channels

    a = x
    for layer in params["branch7x7a"]:
        a = conv_bn_relu(a, layer)
    b = x
    for layer in params["branch7x7b"]:
        b = conv_bn_relu(b, layer)
    x = jnp.concatenate([a, b], axis=-1)          # 96 + 96 = 192 channels

    a = conv_bn_relu(x, params["branchpoola"])
    b = maxpool2d(x, 4, 2, 1)
    x = jnp.concatenate([a, b], axis=-1)          # 192 + 192 = 384 channels

    return jnp.transpose(x, (0, 3, 1, 2))         # NHWC -> NCHW


# TODO(synk): BatchNorm is implemented in inference (eval) mode with default
# running statistics folded into the conv; training-mode batch statistics are
# not computed.

if __name__ == "__main__":
    # Smallest input whose spatial size survives the stem cleanly: 35x35
    # (NCHW, like the PyTorch module expects).
    x = jax.random.normal(jax.random.PRNGKey(0), (2, 3, 35, 35), jnp.float32)
    params = init_stem_params(jax.random.PRNGKey(42))

    fwd = jax.jit(lambda inp: stem_forward(params, inp))
    out = jax.block_until_ready(fwd(x))

    assert out.shape == (2, 384, 2, 2), out.shape
    assert bool(jnp.isfinite(out).all())
    print("KERNEL_OK")
</pallas_src>

<mosaic_0001>
module attributes {stable_mosaic.version = 11 : i64} {
  func.func @_matmul_bias_relu_kernel(%arg0: i32, %arg1: i32, %arg2: i32, %arg3: memref<128x128xf32, #tpu.memory_space<vmem>>, %arg4: memref<128x128xf32, #tpu.memory_space<vmem>>, %arg5: memref<1x128xf32, #tpu.memory_space<vmem>>, %arg6: memref<128x128xf32, #tpu.memory_space<vmem>>, %arg7: memref<128x128xf32, #tpu.memory_space<vmem>>) attributes {dimension_semantics = [#tpu.dimension_semantics<parallel>, #tpu.dimension_semantics<parallel>, #tpu.dimension_semantics<arbitrary>], iteration_bounds = array<i64: 5, 1, 1>, scalar_prefetch = 0 : i64, scratch_operands = 1 : i64, tpu.core_type = #tpu.core_type<tc>, window_params = [{transform_indices = @transform_0, window_bounds = array<i64: 128, 128>}, {transform_indices = @transform_1, window_bounds = array<i64: 128, 128>}, {transform_indices = @transform_2, window_bounds = array<i64: 1, 128>}, {transform_indices = @transform_3, window_bounds = array<i64: 128, 128>}]} {
    %c0_i32 = arith.constant 0 : i32
    %0 = arith.cmpi eq, %arg2, %c0_i32 : i32
    %1 = arith.extui %0 : i1 to i32
    %c0_i32_0 = arith.constant 0 : i32
    %2 = arith.cmpi ne, %1, %c0_i32_0 : i32
    scf.if %2 {
      %cst_10 = arith.constant 0.000000e+00 : f32
      %12 = vector.broadcast %cst_10 : f32 to vector<128x128xf32>
      %c0_11 = arith.constant 0 : index
      %c0_12 = arith.constant 0 : index
      %13 = vector.load %arg7[%c0_11, %c0_12] : memref<128x128xf32, #tpu.memory_space<vmem>>, vector<128x128xf32>
      tpu.vector_store %arg7[%c0_11, %c0_12], %12 {strides = array<i32>} : memref<128x128xf32, #tpu.memory_space<vmem>>, vector<128x128xf32>,
    } else {
    }
    %c0 = arith.constant 0 : index
    %c0_1 = arith.constant 0 : index
    %3 = vector.load %arg7[%c0, %c0_1] : memref<128x128xf32, #tpu.memory_space<vmem>>, vector<128x128xf32>
    %c0_2 = arith.constant 0 : index
    %c0_3 = arith.constant 0 : index
    %4 = vector.load %arg3[%c0_2, %c0_3] : memref<128x128xf32, #tpu.memory_space<vmem>>, vector<128x128xf32>
    %c0_4 = arith.constant 0 : index
    %c0_5 = arith.constant 0 : index
    %5 = vector.load %arg4[%c0_4, %c0_5] : memref<128x128xf32, #tpu.memory_space<vmem>>, vector<128x128xf32>
    %cst = arith.constant dense<0.000000e+00> : vector<128x128xf32>
    %6 = tpu.matmul %4, %5, %cst {dimension_numbers = #tpu.dot_dimension_numbers<[1], [0], [0], [1], [0, 0, 1, 1], [], []>} : vector<128x128xf32>, vector<128x128xf32>, vector<128x128xf32> -> vector<128x128xf32>
    %7 = arith.addf %3, %6 : vector<128x128xf32>
    %c0_6 = arith.constant 0 : index
    %c0_7 = arith.constant 0 : index
    %8 = vector.load %arg7[%c0_6, %c0_7] : memref<128x128xf32, #tpu.memory_space<vmem>>, vector<128x128xf32>
    tpu.vector_store %arg7[%c0_6, %c0_7], %7 {strides = array<i32>} : memref<128x128xf32, #tpu.memory_space<vmem>>, vector<128x128xf32>,
    %c0_i32_8 = arith.constant 0 : i32
    %9 = arith.cmpi eq, %arg2, %c0_i32_8 : i32
    %10 = arith.extui %9 : i1 to i32
    %c0_i32_9 = arith.constant 0 : i32
    %11 = arith.cmpi ne, %10, %c0_i32_9 : i32
    scf.if %11 {
      %c0_10 = arith.constant 0 : index
      %c0_11 = arith.constant 0 : index
      %12 = vector.load %arg7[%c0_10, %c0_11] : memref<128x128xf32, #tpu.memory_space<vmem>>, vector<128x128xf32>
      %c0_12 = arith.constant 0 : index
      %c0_13 = arith.constant 0 : index
      %13 = vector.load %arg5[%c0_12, %c0_13] : memref<1x128xf32, #tpu.memory_space<vmem>>, vector<1x128xf32>
      %14 = vector.broadcast %13 : vector<1x128xf32> to vector<128x128xf32>
      %15 = arith.addf %12, %14 : vector<128x128xf32>
      %cst_14 = arith.constant 0.000000e+00 : f32
      %16 = vector.broadcast %cst_14 : f32 to vector<128x128xf32>
      %17 = arith.maximumf %15, %16 : vector<128x128xf32>
      %c0_15 = arith.constant 0 : index
      %c0_16 = arith.constant 0 : index
      %18 = vector.load %arg6[%c0_15, %c0_16] : memref<128x128xf32, #tpu.memory_space<vmem>>, vector<128x128xf32>
      tpu.vector_store %arg6[%c0_15, %c0_16], %17 {strides = array<i32>} : memref<128x128xf32, #tpu.memory_space<vmem>>, vector<128x128xf32>,
    } else {
    }
    return
  }
  func.func @transform_0(%arg0: i32, %arg1: i32, %arg2: i32) -> (i32, i32) {
    %c0_i32 = arith.constant 0 : i32
    return %arg0, %arg2 : i32, i32
  }
  func.func @transform_1(%arg0: i32, %arg1: i32, %arg2: i32) -> (i32, i32) {
    %c0_i32 = arith.constant 0 : i32
    return %arg2, %arg1 : i32, i32
  }
  func.func @transform_2(%arg0: i32, %arg1: i32, %arg2: i32) -> (i32, i32) {
    %c0_i32 = arith.constant 0 : i32
    %c0_i32_0 = arith.constant 0 : i32
    return %c0_i32, %arg1 : i32, i32
  }
  func.func @transform_3(%arg0: i32, %arg1: i32, %arg2: i32) -> (i32, i32) {
    %c0_i32 = arith.constant 0 : i32
    return %arg0, %arg1 : i32, i32
  }
}

module attributes {stable_mosaic.version = 11 : i64} {
  func.func @_matmul_bias_relu_kernel(%arg0: i32, %arg1: i32, %arg2: i32, %arg3: memref<128x384xf32, #tpu.memory_space<vmem>>, %arg4: memref<384x128xf32, #tpu.memory_space<vmem>>, %arg5: memref<1x128xf32, #tpu.memory_space<vmem>>, %arg6: memref<128x128xf32, #tpu.memory_space<vmem>>, %arg7: memref<128x128xf32, #tpu.memory_space<vmem>>) attributes {dimension_semantics = [#tpu.dimension_semantics<parallel>, #tpu.dimension_semantics<parallel>, #tpu.dimension_semantics<arbitrary>], iteration_bounds = array<i64: 4, 1, 1>, scalar_prefetch = 0 : i64, scratch_operands = 1 : i64, tpu.core_type = #tpu.core_type<tc>, window_params = [{transform_indices = @transform_0, window_bounds = array<i64: 128, 384>}, {transform_indices = @transform_1, window_bounds = array<i64: 384, 128>}, {transform_indices = @transform_2, window_bounds = array<i64: 1, 128>}, {transform_indices = @transform_3, window_bounds = array<i64: 128, 128>}]} {
    %c0_i32 = arith.constant 0 : i32
    %0 = arith.cmpi eq, %arg2, %c0_i32 : i32
    %1 = arith.extui %0 : i1 to i32
    %c0_i32_0 = arith.constant 0 : i32
    %2 = arith.cmpi ne, %1, %c0_i32_0 : i32
    scf.if %2 {
      %cst_10 = arith.constant 0.000000e+00 : f32
      %12 = vector.broadcast %cst_10 : f32 to vector<128x128xf32>
      %c0_11 = arith.constant 0 : index
      %c0_12 = arith.constant 0 : index
      %13 = vector.load %arg7[%c0_11, %c0_12] : memref<128x128xf32, #tpu.memory_space<vmem>>, vector<128x128xf32>
      tpu.vector_store %arg7[%c0_11, %c0_12], %12 {strides = array<i32>} : memref<128x128xf32, #tpu.memory_space<vmem>>, vector<128x128xf32>,
    } else {
    }
    %c0 = arith.constant 0 : index
    %c0_1 = arith.constant 0 : index
    %3 = vector.load %arg7[%c0, %c0_1] : memref<128x128xf32, #tpu.memory_space<vmem>>, vector<128x128xf32>
    %c0_2 = arith.constant 0 : index
    %c0_3 = arith.constant 0 : index
    %4 = vector.load %arg3[%c0_2, %c0_3] : memref<128x384xf32, #tpu.memory_space<vmem>>, vector<128x384xf32>
    %c0_4 = arith.constant 0 : index
    %c0_5 = arith.constant 0 : index
    %5 = vector.load %arg4[%c0_4, %c0_5] : memref<384x128xf32, #tpu.memory_space<vmem>>, vector<384x128xf32>
    %cst = arith.constant dense<0.000000e+00> : vector<128x128xf32>
    %6 = tpu.matmul %4, %5, %cst {dimension_numbers = #tpu.dot_dimension_numbers<[1], [0], [0], [1], [0, 0, 1, 1], [], []>} : vector<128x384xf32>, vector<384x128xf32>, vector<128x128xf32> -> vector<128x128xf32>
    %7 = arith.addf %3, %6 : vector<128x128xf32>
    %c0_6 = arith.constant 0 : index
    %c0_7 = arith.constant 0 : index
    %8 = vector.load %arg7[%c0_6, %c0_7] : memref<128x128xf32, #tpu.memory_space<vmem>>, vector<128x128xf32>
    tpu.vector_store %arg7[%c0_6, %c0_7], %7 {strides = array<i32>} : memref<128x128xf32, #tpu.memory_space<vmem>>, vector<128x128xf32>,
    %c0_i32_8 = arith.constant 0 : i32
    %9 = arith.cmpi eq, %arg2, %c0_i32_8 : i32
    %10 = arith.extui %9 : i1 to i32
    %c0_i32_9 = arith.constant 0 : i32
    %11 = arith.cmpi ne, %10, %c0_i32_9 : i32
    scf.if %11 {
      %c0_10 = arith.constant 0 : index
      %c0_11 = arith.constant 0 : index
      %12 = vector.load %arg7[%c0_10, %c0_11] : memref<128x128xf32, #tpu.memory_space<vmem>>, vector<128x128xf32>
      %c0_12 = arith.constant 0 : index
      %c0_13 = arith.constant 0 : index
      %13 = vector.load %arg5[%c0_12, %c0_13] : memref<1x128xf32, #tpu.memory_space<vmem>>, vector<1x128xf32>
      %14 = vector.broadcast %13 : vector<1x128xf32> to vector<128x128xf32>
      %15 = arith.addf %12, %14 : vector<128x128xf32>
      %cst_14 = arith.constant 0.000000e+00 : f32
      %16 = vector.broadcast %cst_14 : f32 to vector<128x128xf32>
      %17 = arith.maximumf %15, %16 : vector<128x128xf32>
      %c0_15 = arith.constant 0 : index
      %c0_16 = arith.constant 0 : index
      %18 = vector.load %arg6[%c0_15, %c0_16] : memref<128x128xf32, #tpu.memory_space<vmem>>, vector<128x128xf32>
      tpu.vector_store %arg6[%c0_15, %c0_16], %17 {strides = array<i32>} : memref<128x128xf32, #tpu.memory_space<vmem>>, vector<128x128xf32>,
    } else {
    }
    return
  }
  func.func @transform_0(%arg0: i32, %arg1: i32, %arg2: i32) -> (i32, i32) {
    %c0_i32 = arith.constant 0 : i32
    return %arg0, %arg2 : i32, i32
  }
  func.func @transform_1(%arg0: i32, %arg1: i32, %arg2: i32) -> (i32, i32) {
    %c0_i32 = arith.constant 0 : i32
    return %arg2, %arg1 : i32, i32
  }
  func.func @transform_2(%arg0: i32, %arg1: i32, %arg2: i32) -> (i32, i32) {
    %c0_i32 = arith.constant 0 : i32
    %c0_i32_0 = arith.constant 0 : i32
    return %c0_i32, %arg1 : i32, i32
  }
  func.func @transform_3(%arg0: i32, %arg1: i32, %arg2: i32) -> (i32, i32) {
    %c0_i32 = arith.constant 0 : i32
    return %arg0, %arg1 : i32, i32
  }
}

module attributes {stable_mosaic.version = 11 : i64} {
  func.func @_matmul_bias_relu_kernel(%arg0: i32, %arg1: i32, %arg2: i32, %arg3: memref<128x128xf32, #tpu.memory_space<vmem>>, %arg4: memref<128x128xf32, #tpu.memory_space<vmem>>, %arg5: memref<1x128xf32, #tpu.memory_space<vmem>>, %arg6: memref<128x128xf32, #tpu.memory_space<vmem>>, %arg7: memref<128x128xf32, #tpu.memory_space<vmem>>) attributes {dimension_semantics = [#tpu.dimension_semantics<parallel>, #tpu.dimension_semantics<parallel>, #tpu.dimension_semantics<arbitrary>], iteration_bounds = array<i64: 1, 1, 5>, scalar_prefetch = 0 : i64, scratch_operands = 1 : i64, tpu.core_type = #tpu.core_type<tc>, window_params = [{transform_indices = @transform_0, window_bounds = array<i64: 128, 128>}, {transform_indices = @transform_1, window_bounds = array<i64: 128, 128>}, {transform_indices = @transform_2, window_bounds = array<i64: 1, 128>}, {transform_indices = @transform_3, window_bounds = array<i64: 128, 128>}]} {
    %c0_i32 = arith.constant 0 : i32
    %0 = arith.cmpi eq, %arg2, %c0_i32 : i32
    %1 = arith.extui %0 : i1 to i32
    %c0_i32_0 = arith.constant 0 : i32
    %2 = arith.cmpi ne, %1, %c0_i32_0 : i32
    scf.if %2 {
      %cst_9 = arith.constant 0.000000e+00 : f32
      %12 = vector.broadcast %cst_9 : f32 to vector<128x128xf32>
      %c0_10 = arith.constant 0 : index
      %c0_11 = arith.constant 0 : index
      %13 = vector.load %arg7[%c0_10, %c0_11] : memref<128x128xf32, #tpu.memory_space<vmem>>, vector<128x128xf32>
      tpu.vector_store %arg7[%c0_10, %c0_11], %12 {strides = array<i32>} : memref<128x128xf32, #tpu.memory_space<vmem>>, vector<128x128xf32>,
    } else {
    }
    %c0 = arith.constant 0 : index
    %c0_1 = arith.constant 0 : index
    %3 = vector.load %arg7[%c0, %c0_1] : memref<128x128xf32, #tpu.memory_space<vmem>>, vector<128x128xf32>
    %c0_2 = arith.constant 0 : index
    %c0_3 = arith.constant 0 : index
    %4 = vector.load %arg3[%c0_2, %c0_3] : memref<128x128xf32, #tpu.memory_space<vmem>>, vector<128x128xf32>
    %c0_4 = arith.constant 0 : index
    %c0_5 = arith.constant 0 : index
    %5 = vector.load %arg4[%c0_4, %c0_5] : memref<128x128xf32, #tpu.memory_space<vmem>>, vector<128x128xf32>
    %cst = arith.constant dense<0.000000e+00> : vector<128x128xf32>
    %6 = tpu.matmul %4, %5, %cst {dimension_numbers = #tpu.dot_dimension_numbers<[1], [0], [0], [1], [0, 0, 1, 1], [], []>} : vector<128x128xf32>, vector<128x128xf32>, vector<128x128xf32> -> vector<128x128xf32>
    %7 = arith.addf %3, %6 : vector<128x128xf32>
    %c0_6 = arith.constant 0 : index
    %c0_7 = arith.constant 0 : index
    %8 = vector.load %arg7[%c0_6, %c0_7] : memref<128x128xf32, #tpu.memory_space<vmem>>, vector<128x128xf32>
    tpu.vector_store %arg7[%c0_6, %c0_7], %7 {strides = array<i32>} : memref<128x128xf32, #tpu.memory_space<vmem>>, vector<128x128xf32>,
    %c4_i32 = arith.constant 4 : i32
    %9 = arith.cmpi eq, %arg2, %c4_i32 : i32
    %10 = arith.extui %9 : i1 to i32
    %c0_i32_8 = arith.constant 0 : i32
    %11 = arith.cmpi ne, %10, %c0_i32_8 : i32
    scf.if %11 {
      %c0_9 = arith.constant 0 : index
      %c0_10 = arith.constant 0 : index
      %12 = vector.load %arg7[%c0_9, %c0_10] : memref<128x128xf32, #tpu.memory_space<vmem>>, vector<128x128xf32>
      %c0_11 = arith.constant 0 : index
      %c0_12 = arith.constant 0 : index
      %13 = vector.load %arg5[%c0_11, %c0_12] : memref<1x128xf32, #tpu.memory_space<vmem>>, vector<1x128xf32>
      %14 = vector.broadcast %13 : vector<1x128xf32> to vector<128x128xf32>
      %15 = arith.addf %12, %14 : vector<128x128xf32>
      %cst_13 = arith.constant 0.000000e+00 : f32
      %16 = vector.broadcast %cst_13 : f32 to vector<128x128xf32>
      %17 = arith.maximumf %15, %16 : vector<128x128xf32>
      %c0_14 = arith.constant 0 : index
      %c0_15 = arith.constant 0 : index
      %18 = vector.load %arg6[%c0_14, %c0_15] : memref<128x128xf32, #tpu.memory_space<vmem>>, vector<128x128xf32>
      tpu.vector_store %arg6[%c0_14, %c0_15], %17 {strides = array<i32>} : memref<128x128xf32, #tpu.memory_space<vmem>>, vector<128x128xf32>,
    } else {
    }
    return
  }
  func.func @transform_0(%arg0: i32, %arg1: i32, %arg2: i32) -> (i32, i32) {
    %c0_i32 = arith.constant 0 : i32
    return %arg0, %arg2 : i32, i32
  }
  func.func @transform_1(%arg0: i32, %arg1: i32, %arg2: i32) -> (i32, i32) {
    %c0_i32 = arith.constant 0 : i32
    return %arg2, %arg1 : i32, i32
  }
  func.func @transform_2(%arg0: i32, %arg1: i32, %arg2: i32) -> (i32, i32) {
    %c0_i32 = arith.constant 0 : i32
    %c0_i32_0 = arith.constant 0 : i32
    return %c0_i32, %arg1 : i32, i32
  }
  func.func @transform_3(%arg0: i32, %arg1: i32, %arg2: i32) -> (i32, i32) {
    %c0_i32 = arith.constant 0 : i32
    return %arg0, %arg1 : i32, i32
  }
}

module attributes {stable_mosaic.version = 11 : i64} {
  func.func @_pool4s2_kernel(%arg0: i32, %arg1: memref<8x2x17x64xf32, #tpu.memory_space<vmem>>, %arg2: memref<7x17x64xf32, #tpu.memory_space<vmem>>) attributes {dimension_semantics = [#tpu.dimension_semantics<parallel>], iteration_bounds = array<i64: 2>, scalar_prefetch = 0 : i64, scratch_operands = 0 : i64, tpu.core_type = #tpu.core_type<tc>, window_params = [{transform_indices = @transform_0, window_bounds = array<i64: 8, 2, 17, 64>}, {transform_indices = @transform_1, window_bounds = array<i64: 7, 17, 64>}]} {
    %c0 = arith.constant 0 : index
    %c0_0 = arith.constant 0 : index
    %c0_1 = arith.constant 0 : index
    %c0_2 = arith.constant 0 : index
    %0 = vector.load %arg1[%c0, %c0_0, %c0_1, %c0_2] : memref<8x2x17x64xf32, #tpu.memory_space<vmem>>, vector<8x2x17x64xf32>
    %1 = vector.extract_strided_slice %0 {offsets = [0, 0, 0, 0], sizes = [8, 1, 17, 64], strides = [1, 1, 1, 1]} : vector<8x2x17x64xf32> to vector<8x1x17x64xf32>
    %2 = vector.shape_cast %1 : vector<8x1x17x64xf32> to vector<8x17x64xf32>
    %3 = vector.extract_strided_slice %0 {offsets = [0, 1, 0, 0], sizes = [8, 1, 17, 64], strides = [1, 1, 1, 1]} : vector<8x2x17x64xf32> to vector<8x1x17x64xf32>
    %4 = vector.shape_cast %3 : vector<8x1x17x64xf32> to vector<8x17x64xf32>
    %5 = arith.maximumf %2, %4 : vector<8x17x64xf32>
    %6 = vector.extract_strided_slice %5 {offsets = [0, 0, 0], sizes = [7, 17, 64], strides = [1, 1, 1]} : vector<8x17x64xf32> to vector<7x17x64xf32>
    %7 = vector.extract_strided_slice %5 {offsets = [1, 0, 0], sizes = [7, 17, 64], strides = [1, 1, 1]} : vector<8x17x64xf32> to vector<7x17x64xf32>
    %8 = arith.maximumf %6, %7 : vector<7x17x64xf32>
    %c0_3 = arith.constant 0 : index
    %c0_4 = arith.constant 0 : index
    %c0_5 = arith.constant 0 : index
    %9 = vector.load %arg2[%c0_3, %c0_4, %c0_5] : memref<7x17x64xf32, #tpu.memory_space<vmem>>, vector<7x17x64xf32>
    tpu.vector_store %arg2[%c0_3, %c0_4, %c0_5], %8 {strides = array<i32>} : memref<7x17x64xf32, #tpu.memory_space<vmem>>, vector<7x17x64xf32>,
    return
  }
  func.func @transform_0(%arg0: i32) -> (i32, i32, i32, i32) {
    %c0_i32 = arith.constant 0 : i32
    %c0_i32_0 = arith.constant 0 : i32
    %c0_i32_1 = arith.constant 0 : i32
    %c0_i32_2 = arith.constant 0 : i32
    return %arg0, %c0_i32, %c0_i32_0, %c0_i32_1 : i32, i32, i32, i32
  }
  func.func @transform_1(%arg0: i32) -> (i32, i32, i32) {
    %c0_i32 = arith.constant 0 : i32
    %c0_i32_0 = arith.constant 0 : i32
    %c0_i32_1 = arith.constant 0 : i32
    return %arg0, %c0_i32, %c0_i32_0 : i32, i32, i32
  }
}

module attributes {stable_mosaic.version = 11 : i64} {
  func.func @_pool4s2_kernel(%arg0: i32, %arg1: memref<8x2x7x64xf32, #tpu.memory_space<vmem>>, %arg2: memref<7x7x64xf32, #tpu.memory_space<vmem>>) attributes {dimension_semantics = [#tpu.dimension_semantics<parallel>], iteration_bounds = array<i64: 2>, scalar_prefetch = 0 : i64, scratch_operands = 0 : i64, tpu.core_type = #tpu.core_type<tc>, window_params = [{transform_indices = @transform_0, window_bounds = array<i64: 8, 2, 7, 64>}, {transform_indices = @transform_1, window_bounds = array<i64: 7, 7, 64>}]} {
    %c0 = arith.constant 0 : index
    %c0_0 = arith.constant 0 : index
    %c0_1 = arith.constant 0 : index
    %c0_2 = arith.constant 0 : index
    %0 = vector.load %arg1[%c0, %c0_0, %c0_1, %c0_2] : memref<8x2x7x64xf32, #tpu.memory_space<vmem>>, vector<8x2x7x64xf32>
    %1 = vector.extract_strided_slice %0 {offsets = [0, 0, 0, 0], sizes = [8, 1, 7, 64], strides = [1, 1, 1, 1]} : vector<8x2x7x64xf32> to vector<8x1x7x64xf32>
    %2 = vector.shape_cast %1 : vector<8x1x7x64xf32> to vector<8x7x64xf32>
    %3 = vector.extract_strided_slice %0 {offsets = [0, 1, 0, 0], sizes = [8, 1, 7, 64], strides = [1, 1, 1, 1]} : vector<8x2x7x64xf32> to vector<8x1x7x64xf32>
    %4 = vector.shape_cast %3 : vector<8x1x7x64xf32> to vector<8x7x64xf32>
    %5 = arith.maximumf %2, %4 : vector<8x7x64xf32>
    %6 = vector.extract_strided_slice %5 {offsets = [0, 0, 0], sizes = [7, 7, 64], strides = [1, 1, 1]} : vector<8x7x64xf32> to vector<7x7x64xf32>
    %7 = vector.extract_strided_slice %5 {offsets = [1, 0, 0], sizes = [7, 7, 64], strides = [1, 1, 1]} : vector<8x7x64xf32> to vector<7x7x64xf32>
    %8 = arith.maximumf %6, %7 : vector<7x7x64xf32>
    %c0_3 = arith.constant 0 : index
    %c0_4 = arith.constant 0 : index
    %c0_5 = arith.constant 0 : index
    %9 = vector.load %arg2[%c0_3, %c0_4, %c0_5] : memref<7x7x64xf32, #tpu.memory_space<vmem>>, vector<7x7x64xf32>
    tpu.vector_store %arg2[%c0_3, %c0_4, %c0_5], %8 {strides = array<i32>} : memref<7x7x64xf32, #tpu.memory_space<vmem>>, vector<7x7x64xf32>,
    return
  }
  func.func @transform_0(%arg0: i32) -> (i32, i32, i32, i32) {
    %c0_i32 = arith.constant 0 : i32
    %c0_i32_0 = arith.constant 0 : i32
    %c0_i32_1 = arith.constant 0 : i32
    %c0_i32_2 = arith.constant 0 : i32
    return %arg0, %c0_i32, %c0_i32_0, %c0_i32_1 : i32, i32, i32, i32
  }
  func.func @transform_1(%arg0: i32) -> (i32, i32, i32) {
    %c0_i32 = arith.constant 0 : i32
    %c0_i32_0 = arith.constant 0 : i32
    %c0_i32_1 = arith.constant 0 : i32
    return %arg0, %c0_i32, %c0_i32_0 : i32, i32, i32
  }
}

module attributes {stable_mosaic.version = 11 : i64} {
  func.func @_matmul_bias_relu_kernel(%arg0: i32, %arg1: i32, %arg2: i32, %arg3: memref<128x256xf32, #tpu.memory_space<vmem>>, %arg4: memref<256x128xf32, #tpu.memory_space<vmem>>, %arg5: memref<1x128xf32, #tpu.memory_space<vmem>>, %arg6: memref<128x128xf32, #tpu.memory_space<vmem>>, %arg7: memref<128x128xf32, #tpu.memory_space<vmem>>) attributes {dimension_semantics = [#tpu.dimension_semantics<parallel>, #tpu.dimension_semantics<parallel>, #tpu.dimension_semantics<arbitrary>], iteration_bounds = array<i64: 1, 1, 1>, scalar_prefetch = 0 : i64, scratch_operands = 1 : i64, tpu.core_type = #tpu.core_type<tc>, window_params = [{transform_indices = @transform_0, window_bounds = array<i64: 128, 256>}, {transform_indices = @transform_1, window_bounds = array<i64: 256, 128>}, {transform_indices = @transform_2, window_bounds = array<i64: 1, 128>}, {transform_indices = @transform_3, window_bounds = array<i64: 128, 128>}]} {
    %c0_i32 = arith.constant 0 : i32
    %0 = arith.cmpi eq, %arg2, %c0_i32 : i32
    %1 = arith.extui %0 : i1 to i32
    %c0_i32_0 = arith.constant 0 : i32
    %2 = arith.cmpi ne, %1, %c0_i32_0 : i32
    scf.if %2 {
      %cst_10 = arith.constant 0.000000e+00 : f32
      %12 = vector.broadcast %cst_10 : f32 to vector<128x128xf32>
      %c0_11 = arith.constant 0 : index
      %c0_12 = arith.constant 0 : index
      %13 = vector.load %arg7[%c0_11, %c0_12] : memref<128x128xf32, #tpu.memory_space<vmem>>, vector<128x128xf32>
      tpu.vector_store %arg7[%c0_11, %c0_12], %12 {strides = array<i32>} : memref<128x128xf32, #tpu.memory_space<vmem>>, vector<128x128xf32>,
    } else {
    }
    %c0 = arith.constant 0 : index
    %c0_1 = arith.constant 0 : index
    %3 = vector.load %arg7[%c0, %c0_1] : memref<128x128xf32, #tpu.memory_space<vmem>>, vector<128x128xf32>
    %c0_2 = arith.constant 0 : index
    %c0_3 = arith.constant 0 : index
    %4 = vector.load %arg3[%c0_2, %c0_3] : memref<128x256xf32, #tpu.memory_space<vmem>>, vector<128x256xf32>
    %c0_4 = arith.constant 0 : index
    %c0_5 = arith.constant 0 : index
    %5 = vector.load %arg4[%c0_4, %c0_5] : memref<256x128xf32, #tpu.memory_space<vmem>>, vector<256x128xf32>
    %cst = arith.constant dense<0.000000e+00> : vector<128x128xf32>
    %6 = tpu.matmul %4, %5, %cst {dimension_numbers = #tpu.dot_dimension_numbers<[1], [0], [0], [1], [0, 0, 1, 1], [], []>} : vector<128x256xf32>, vector<256x128xf32>, vector<128x128xf32> -> vector<128x128xf32>
    %7 = arith.addf %3, %6 : vector<128x128xf32>
    %c0_6 = arith.constant 0 : index
    %c0_7 = arith.constant 0 : index
    %8 = vector.load %arg7[%c0_6, %c0_7] : memref<128x128xf32, #tpu.memory_space<vmem>>, vector<128x128xf32>
    tpu.vector_store %arg7[%c0_6, %c0_7], %7 {strides = array<i32>} : memref<128x128xf32, #tpu.memory_space<vmem>>, vector<128x128xf32>,
    %c0_i32_8 = arith.constant 0 : i32
    %9 = arith.cmpi eq, %arg2, %c0_i32_8 : i32
    %10 = arith.extui %9 : i1 to i32
    %c0_i32_9 = arith.constant 0 : i32
    %11 = arith.cmpi ne, %10, %c0_i32_9 : i32
    scf.if %11 {
      %c0_10 = arith.constant 0 : index
      %c0_11 = arith.constant 0 : index
      %12 = vector.load %arg7[%c0_10, %c0_11] : memref<128x128xf32, #tpu.memory_space<vmem>>, vector<128x128xf32>
      %c0_12 = arith.constant 0 : index
      %c0_13 = arith.constant 0 : index
      %13 = vector.load %arg5[%c0_12, %c0_13] : memref<1x128xf32, #tpu.memory_space<vmem>>, vector<1x128xf32>
      %14 = vector.broadcast %13 : vector<1x128xf32> to vector<128x128xf32>
      %15 = arith.addf %12, %14 : vector<128x128xf32>
      %cst_14 = arith.constant 0.000000e+00 : f32
      %16 = vector.broadcast %cst_14 : f32 to vector<128x128xf32>
      %17 = arith.maximumf %15, %16 : vector<128x128xf32>
      %c0_15 = arith.constant 0 : index
      %c0_16 = arith.constant 0 : index
      %18 = vector.load %arg6[%c0_15, %c0_16] : memref<128x128xf32, #tpu.memory_space<vmem>>, vector<128x128xf32>
      tpu.vector_store %arg6[%c0_15, %c0_16], %17 {strides = array<i32>} : memref<128x128xf32, #tpu.memory_space<vmem>>, vector<128x128xf32>,
    } else {
    }
    return
  }
  func.func @transform_0(%arg0: i32, %arg1: i32, %arg2: i32) -> (i32, i32) {
    %c0_i32 = arith.constant 0 : i32
    return %arg0, %arg2 : i32, i32
  }
  func.func @transform_1(%arg0: i32, %arg1: i32, %arg2: i32) -> (i32, i32) {
    %c0_i32 = arith.constant 0 : i32
    return %arg2, %arg1 : i32, i32
  }
  func.func @transform_2(%arg0: i32, %arg1: i32, %arg2: i32) -> (i32, i32) {
    %c0_i32 = arith.constant 0 : i32
    %c0_i32_0 = arith.constant 0 : i32
    return %c0_i32, %arg1 : i32, i32
  }
  func.func @transform_3(%arg0: i32, %arg1: i32, %arg2: i32) -> (i32, i32) {
    %c0_i32 = arith.constant 0 : i32
    return %arg0, %arg1 : i32, i32
  }
}

module attributes {stable_mosaic.version = 11 : i64} {
  func.func @_matmul_bias_relu_kernel(%arg0: i32, %arg1: i32, %arg2: i32, %arg3: memref<128x512xf32, #tpu.memory_space<vmem>>, %arg4: memref<512x128xf32, #tpu.memory_space<vmem>>, %arg5: memref<1x128xf32, #tpu.memory_space<vmem>>, %arg6: memref<128x128xf32, #tpu.memory_space<vmem>>, %arg7: memref<128x128xf32, #tpu.memory_space<vmem>>) attributes {dimension_semantics = [#tpu.dimension_semantics<parallel>, #tpu.dimension_semantics<parallel>, #tpu.dimension_semantics<arbitrary>], iteration_bounds = array<i64: 1, 1, 1>, scalar_prefetch = 0 : i64, scratch_operands = 1 : i64, tpu.core_type = #tpu.core_type<tc>, window_params = [{transform_indices = @transform_0, window_bounds = array<i64: 128, 512>}, {transform_indices = @transform_1, window_bounds = array<i64: 512, 128>}, {transform_indices = @transform_2, window_bounds = array<i64: 1, 128>}, {transform_indices = @transform_3, window_bounds = array<i64: 128, 128>}]} {
    %c0_i32 = arith.constant 0 : i32
    %0 = arith.cmpi eq, %arg2, %c0_i32 : i32
    %1 = arith.extui %0 : i1 to i32
    %c0_i32_0 = arith.constant 0 : i32
    %2 = arith.cmpi ne, %1, %c0_i32_0 : i32
    scf.if %2 {
      %cst_10 = arith.constant 0.000000e+00 : f32
      %12 = vector.broadcast %cst_10 : f32 to vector<128x128xf32>
      %c0_11 = arith.constant 0 : index
      %c0_12 = arith.constant 0 : index
      %13 = vector.load %arg7[%c0_11, %c0_12] : memref<128x128xf32, #tpu.memory_space<vmem>>, vector<128x128xf32>
      tpu.vector_store %arg7[%c0_11, %c0_12], %12 {strides = array<i32>} : memref<128x128xf32, #tpu.memory_space<vmem>>, vector<128x128xf32>,
    } else {
    }
    %c0 = arith.constant 0 : index
    %c0_1 = arith.constant 0 : index
    %3 = vector.load %arg7[%c0, %c0_1] : memref<128x128xf32, #tpu.memory_space<vmem>>, vector<128x128xf32>
    %c0_2 = arith.constant 0 : index
    %c0_3 = arith.constant 0 : index
    %4 = vector.load %arg3[%c0_2, %c0_3] : memref<128x512xf32, #tpu.memory_space<vmem>>, vector<128x512xf32>
    %c0_4 = arith.constant 0 : index
    %c0_5 = arith.constant 0 : index
    %5 = vector.load %arg4[%c0_4, %c0_5] : memref<512x128xf32, #tpu.memory_space<vmem>>, vector<512x128xf32>
    %cst = arith.constant dense<0.000000e+00> : vector<128x128xf32>
    %6 = tpu.matmul %4, %5, %cst {dimension_numbers = #tpu.dot_dimension_numbers<[1], [0], [0], [1], [0, 0, 1, 1], [], []>} : vector<128x512xf32>, vector<512x128xf32>, vector<128x128xf32> -> vector<128x128xf32>
    %7 = arith.addf %3, %6 : vector<128x128xf32>
    %c0_6 = arith.constant 0 : index
    %c0_7 = arith.constant 0 : index
    %8 = vector.load %arg7[%c0_6, %c0_7] : memref<128x128xf32, #tpu.memory_space<vmem>>, vector<128x128xf32>
    tpu.vector_store %arg7[%c0_6, %c0_7], %7 {strides = array<i32>} : memref<128x128xf32, #tpu.memory_space<vmem>>, vector<128x128xf32>,
    %c0_i32_8 = arith.constant 0 : i32
    %9 = arith.cmpi eq, %arg2, %c0_i32_8 : i32
    %10 = arith.extui %9 : i1 to i32
    %c0_i32_9 = arith.constant 0 : i32
    %11 = arith.cmpi ne, %10, %c0_i32_9 : i32
    scf.if %11 {
      %c0_10 = arith.constant 0 : index
      %c0_11 = arith.constant 0 : index
      %12 = vector.load %arg7[%c0_10, %c0_11] : memref<128x128xf32, #tpu.memory_space<vmem>>, vector<128x128xf32>
      %c0_12 = arith.constant 0 : index
      %c0_13 = arith.constant 0 : index
      %13 = vector.load %arg5[%c0_12, %c0_13] : memref<1x128xf32, #tpu.memory_space<vmem>>, vector<1x128xf32>
      %14 = vector.broadcast %13 : vector<1x128xf32> to vector<128x128xf32>
      %15 = arith.addf %12, %14 : vector<128x128xf32>
      %cst_14 = arith.constant 0.000000e+00 : f32
      %16 = vector.broadcast %cst_14 : f32 to vector<128x128xf32>
      %17 = arith.maximumf %15, %16 : vector<128x128xf32>
      %c0_15 = arith.constant 0 : index
      %c0_16 = arith.constant 0 : index
      %18 = vector.load %arg6[%c0_15, %c0_16] : memref<128x128xf32, #tpu.memory_space<vmem>>, vector<128x128xf32>
      tpu.vector_store %arg6[%c0_15, %c0_16], %17 {strides = array<i32>} : memref<128x128xf32, #tpu.memory_space<vmem>>, vector<128x128xf32>,
    } else {
    }
    return
  }
  func.func @transform_0(%arg0: i32, %arg1: i32, %arg2: i32) -> (i32, i32) {
    %c0_i32 = arith.constant 0 : i32
    return %arg0, %arg2 : i32, i32
  }
  func.func @transform_1(%arg0: i32, %arg1: i32, %arg2: i32) -> (i32, i32) {
    %c0_i32 = arith.constant 0 : i32
    return %arg2, %arg1 : i32, i32
  }
  func.func @transform_2(%arg0: i32, %arg1: i32, %arg2: i32) -> (i32, i32) {
    %c0_i32 = arith.constant 0 : i32
    %c0_i32_0 = arith.constant 0 : i32
    return %c0_i32, %arg1 : i32, i32
  }
  func.func @transform_3(%arg0: i32, %arg1: i32, %arg2: i32) -> (i32, i32) {
    %c0_i32 = arith.constant 0 : i32
    return %arg0, %arg1 : i32, i32
  }
}

module attributes {stable_mosaic.version = 11 : i64} {
  func.func @_matmul_bias_relu_kernel(%arg0: i32, %arg1: i32, %arg2: i32, %arg3: memref<128x256xf32, #tpu.memory_space<vmem>>, %arg4: memref<256x256xf32, #tpu.memory_space<vmem>>, %arg5: memref<1x256xf32, #tpu.memory_space<vmem>>, %arg6: memref<128x256xf32, #tpu.memory_space<vmem>>, %arg7: memref<128x256xf32, #tpu.memory_space<vmem>>) attributes {dimension_semantics = [#tpu.dimension_semantics<parallel>, #tpu.dimension_semantics<parallel>, #tpu.dimension_semantics<arbitrary>], iteration_bounds = array<i64: 1, 1, 7>, scalar_prefetch = 0 : i64, scratch_operands = 1 : i64, tpu.core_type = #tpu.core_type<tc>, window_params = [{transform_indices = @transform_0, window_bounds = array<i64: 128, 256>}, {transform_indices = @transform_1, window_bounds = array<i64: 256, 256>}, {transform_indices = @transform_2, window_bounds = array<i64: 1, 256>}, {transform_indices = @transform_3, window_bounds = array<i64: 128, 256>}]} {
    %c0_i32 = arith.constant 0 : i32
    %0 = arith.cmpi eq, %arg2, %c0_i32 : i32
    %1 = arith.extui %0 : i1 to i32
    %c0_i32_0 = arith.constant 0 : i32
    %2 = arith.cmpi ne, %1, %c0_i32_0 : i32
    scf.if %2 {
      %cst_9 = arith.constant 0.000000e+00 : f32
      %12 = vector.broadcast %cst_9 : f32 to vector<128x256xf32>
      %c0_10 = arith.constant 0 : index
      %c0_11 = arith.constant 0 : index
      %13 = vector.load %arg7[%c0_10, %c0_11] : memref<128x256xf32, #tpu.memory_space<vmem>>, vector<128x256xf32>
      tpu.vector_store %arg7[%c0_10, %c0_11], %12 {strides = array<i32>} : memref<128x256xf32, #tpu.memory_space<vmem>>, vector<128x256xf32>,
    } else {
    }
    %c0 = arith.constant 0 : index
    %c0_1 = arith.constant 0 : index
    %3 = vector.load %arg7[%c0, %c0_1] : memref<128x256xf32, #tpu.memory_space<vmem>>, vector<128x256xf32>
    %c0_2 = arith.constant 0 : index
    %c0_3 = arith.constant 0 : index
    %4 = vector.load %arg3[%c0_2, %c0_3] : memref<128x256xf32, #tpu.memory_space<vmem>>, vector<128x256xf32>
    %c0_4 = arith.constant 0 : index
    %c0_5 = arith.constant 0 : index
    %5 = vector.load %arg4[%c0_4, %c0_5] : memref<256x256xf32, #tpu.memory_space<vmem>>, vector<256x256xf32>
    %cst = arith.constant dense<0.000000e+00> : vector<128x256xf32>
    %6 = tpu.matmul %4, %5, %cst {dimension_numbers = #tpu.dot_dimension_numbers<[1], [0], [0], [1], [0, 0, 1, 1], [], []>} : vector<128x256xf32>, vector<256x256xf32>, vector<128x256xf32> -> vector<128x256xf32>
    %7 = arith.addf %3, %6 : vector<128x256xf32>
    %c0_6 = arith.constant 0 : index
    %c0_7 = arith.constant 0 : index
    %8 = vector.load %arg7[%c0_6, %c0_7] : memref<128x256xf32, #tpu.memory_space<vmem>>, vector<128x256xf32>
    tpu.vector_store %arg7[%c0_6, %c0_7], %7 {strides = array<i32>} : memref<128x256xf32, #tpu.memory_space<vmem>>, vector<128x256xf32>,
    %c6_i32 = arith.constant 6 : i32
    %9 = arith.cmpi eq, %arg2, %c6_i32 : i32
    %10 = arith.extui %9 : i1 to i32
    %c0_i32_8 = arith.constant 0 : i32
    %11 = arith.cmpi ne, %10, %c0_i32_8 : i32
    scf.if %11 {
      %c0_9 = arith.constant 0 : index
      %c0_10 = arith.constant 0 : index
      %12 = vector.load %arg7[%c0_9, %c0_10] : memref<128x256xf32, #tpu.memory_space<vmem>>, vector<128x256xf32>
      %c0_11 = arith.constant 0 : index
      %c0_12 = arith.constant 0 : index
      %13 = vector.load %arg5[%c0_11, %c0_12] : memref<1x256xf32, #tpu.memory_space<vmem>>, vector<1x256xf32>
      %14 = vector.broadcast %13 : vector<1x256xf32> to vector<128x256xf32>
      %15 = arith.addf %12, %14 : vector<128x256xf32>
      %cst_13 = arith.constant 0.000000e+00 : f32
      %16 = vector.broadcast %cst_13 : f32 to vector<128x256xf32>
      %17 = arith.maximumf %15, %16 : vector<128x256xf32>
      %c0_14 = arith.constant 0 : index
      %c0_15 = arith.constant 0 : index
      %18 = vector.load %arg6[%c0_14, %c0_15] : memref<128x256xf32, #tpu.memory_space<vmem>>, vector<128x256xf32>
      tpu.vector_store %arg6[%c0_14, %c0_15], %17 {strides = array<i32>} : memref<128x256xf32, #tpu.memory_space<vmem>>, vector<128x256xf32>,
    } else {
    }
    return
  }
  func.func @transform_0(%arg0: i32, %arg1: i32, %arg2: i32) -> (i32, i32) {
    %c0_i32 = arith.constant 0 : i32
    return %arg0, %arg2 : i32, i32
  }
  func.func @transform_1(%arg0: i32, %arg1: i32, %arg2: i32) -> (i32, i32) {
    %c0_i32 = arith.constant 0 : i32
    return %arg2, %arg1 : i32, i32
  }
  func.func @transform_2(%arg0: i32, %arg1: i32, %arg2: i32) -> (i32, i32) {
    %c0_i32 = arith.constant 0 : i32
    %c0_i32_0 = arith.constant 0 : i32
    return %c0_i32, %arg1 : i32, i32
  }
  func.func @transform_3(%arg0: i32, %arg1: i32, %arg2: i32) -> (i32, i32) {
    %c0_i32 = arith.constant 0 : i32
    return %arg0, %arg1 : i32, i32
  }
}

module attributes {stable_mosaic.version = 11 : i64} {
  func.func @_pool4s2_kernel(%arg0: i32, %arg1: memref<3x2x7x192xf32, #tpu.memory_space<vmem>>, %arg2: memref<2x7x192xf32, #tpu.memory_space<vmem>>) attributes {dimension_semantics = [#tpu.dimension_semantics<parallel>], iteration_bounds = array<i64: 2>, scalar_prefetch = 0 : i64, scratch_operands = 0 : i64, tpu.core_type = #tpu.core_type<tc>, window_params = [{transform_indices = @transform_0, window_bounds = array<i64: 3, 2, 7, 192>}, {transform_indices = @transform_1, window_bounds = array<i64: 2, 7, 192>}]} {
    %c0 = arith.constant 0 : index
    %c0_0 = arith.constant 0 : index
    %c0_1 = arith.constant 0 : index
    %c0_2 = arith.constant 0 : index
    %0 = vector.load %arg1[%c0, %c0_0, %c0_1, %c0_2] : memref<3x2x7x192xf32, #tpu.memory_space<vmem>>, vector<3x2x7x192xf32>
    %1 = vector.extract_strided_slice %0 {offsets = [0, 0, 0, 0], sizes = [3, 1, 7, 192], strides = [1, 1, 1, 1]} : vector<3x2x7x192xf32> to vector<3x1x7x192xf32>
    %2 = vector.shape_cast %1 : vector<3x1x7x192xf32> to vector<3x7x192xf32>
    %3 = vector.extract_strided_slice %0 {offsets = [0, 1, 0, 0], sizes = [3, 1, 7, 192], strides = [1, 1, 1, 1]} : vector<3x2x7x192xf32> to vector<3x1x7x192xf32>
    %4 = vector.shape_cast %3 : vector<3x1x7x192xf32> to vector<3x7x192xf32>
    %5 = arith.maximumf %2, %4 : vector<3x7x192xf32>
    %6 = vector.extract_strided_slice %5 {offsets = [0, 0, 0], sizes = [2, 7, 192], strides = [1, 1, 1]} : vector<3x7x192xf32> to vector<2x7x192xf32>
    %7 = vector.extract_strided_slice %5 {offsets = [1, 0, 0], sizes = [2, 7, 192], strides = [1, 1, 1]} : vector<3x7x192xf32> to vector<2x7x192xf32>
    %8 = arith.maximumf %6, %7 : vector<2x7x192xf32>
    %c0_3 = arith.constant 0 : index
    %c0_4 = arith.constant 0 : index
    %c0_5 = arith.constant 0 : index
    %9 = vector.load %arg2[%c0_3, %c0_4, %c0_5] : memref<2x7x192xf32, #tpu.memory_space<vmem>>, vector<2x7x192xf32>
    tpu.vector_store %arg2[%c0_3, %c0_4, %c0_5], %8 {strides = array<i32>} : memref<2x7x192xf32, #tpu.memory_space<vmem>>, vector<2x7x192xf32>,
    return
  }
  func.func @transform_0(%arg0: i32) -> (i32, i32, i32, i32) {
    %c0_i32 = arith.constant 0 : i32
    %c0_i32_0 = arith.constant 0 : i32
    %c0_i32_1 = arith.constant 0 : i32
    %c0_i32_2 = arith.constant 0 : i32
    return %arg0, %c0_i32, %c0_i32_0, %c0_i32_1 : i32, i32, i32, i32
  }
  func.func @transform_1(%arg0: i32) -> (i32, i32, i32) {
    %c0_i32 = arith.constant 0 : i32
    %c0_i32_0 = arith.constant 0 : i32
    %c0_i32_1 = arith.constant 0 : i32
    return %arg0, %c0_i32, %c0_i32_0 : i32, i32, i32
  }
}

module attributes {stable_mosaic.version = 11 : i64} {
  func.func @_pool4s2_kernel(%arg0: i32, %arg1: memref<3x2x2x192xf32, #tpu.memory_space<vmem>>, %arg2: memref<2x2x192xf32, #tpu.memory_space<vmem>>) attributes {dimension_semantics = [#tpu.dimension_semantics<parallel>], iteration_bounds = array<i64: 2>, scalar_prefetch = 0 : i64, scratch_operands = 0 : i64, tpu.core_type = #tpu.core_type<tc>, window_params = [{transform_indices = @transform_0, window_bounds = array<i64: 3, 2, 2, 192>}, {transform_indices = @transform_1, window_bounds = array<i64: 2, 2, 192>}]} {
    %c0 = arith.constant 0 : index
    %c0_0 = arith.constant 0 : index
    %c0_1 = arith.constant 0 : index
    %c0_2 = arith.constant 0 : index
    %0 = vector.load %arg1[%c0, %c0_0, %c0_1, %c0_2] : memref<3x2x2x192xf32, #tpu.memory_space<vmem>>, vector<3x2x2x192xf32>
    %1 = vector.extract_strided_slice %0 {offsets = [0, 0, 0, 0], sizes = [3, 1, 2, 192], strides = [1, 1, 1, 1]} : vector<3x2x2x192xf32> to vector<3x1x2x192xf32>
    %2 = vector.shape_cast %1 : vector<3x1x2x192xf32> to vector<3x2x192xf32>
    %3 = vector.extract_strided_slice %0 {offsets = [0, 1, 0, 0], sizes = [3, 1, 2, 192], strides = [1, 1, 1, 1]} : vector<3x2x2x192xf32> to vector<3x1x2x192xf32>
    %4 = vector.shape_cast %3 : vector<3x1x2x192xf32> to vector<3x2x192xf32>
    %5 = arith.maximumf %2, %4 : vector<3x2x192xf32>
    %6 = vector.extract_strided_slice %5 {offsets = [0, 0, 0], sizes = [2, 2, 192], strides = [1, 1, 1]} : vector<3x2x192xf32> to vector<2x2x192xf32>
    %7 = vector.extract_strided_slice %5 {offsets = [1, 0, 0], sizes = [2, 2, 192], strides = [1, 1, 1]} : vector<3x2x192xf32> to vector<2x2x192xf32>
    %8 = arith.maximumf %6, %7 : vector<2x2x192xf32>
    %c0_3 = arith.constant 0 : index
    %c0_4 = arith.constant 0 : index
    %c0_5 = arith.constant 0 : index
    %9 = vector.load %arg2[%c0_3, %c0_4, %c0_5] : memref<2x2x192xf32, #tpu.memory_space<vmem>>, vector<2x2x192xf32>
    tpu.vector_store %arg2[%c0_3, %c0_4, %c0_5], %8 {strides = array<i32>} : memref<2x2x192xf32, #tpu.memory_space<vmem>>, vector<2x2x192xf32>,
    return
  }
  func.func @transform_0(%arg0: i32) -> (i32, i32, i32, i32) {
    %c0_i32 = arith.constant 0 : i32
    %c0_i32_0 = arith.constant 0 : i32
    %c0_i32_1 = arith.constant 0 : i32
    %c0_i32_2 = arith.constant 0 : i32
    return %arg0, %c0_i32, %c0_i32_0, %c0_i32_1 : i32, i32, i32, i32
  }
  func.func @transform_1(%arg0: i32) -> (i32, i32, i32) {
    %c0_i32 = arith.constant 0 : i32
    %c0_i32_0 = arith.constant 0 : i32
    %c0_i32_1 = arith.constant 0 : i32
    return %arg0, %c0_i32, %c0_i32_0 : i32, i32, i32
  }
}

</mosaic_0001>

<bundles_post_ra>
// kernel: _lambda_.15
= control target key start
LH: loop header
LB: loop body
LE: loop exit
PB: predicated region body
PF: predicated region fallthrough
CT: control target
= control target key end

     0   :  { %s891_s12 = smov 0   ;;  %s893_s13 = smov 0   ;;  %s1021_s0 = inlined_call_operand.vmem [shape: f32[640,128], index: 0, kind: input, shape index: {}]   ;;  %s1022_s1 = inlined_call_operand.vmem [shape: f32[128,128], index: 1, kind: input, shape index: {}]   ;;  %s1023_s2 = inlined_call_operand.vmem [shape: f32[1,128], index: 2, kind: input, shape index: {}]   ;;  %s1024_s3 = inlined_call_operand.vmem [shape: f32[640,128], index: 3, kind: output, shape index: {}]  }
   0x1   :  { %s895_s14 = smov 0  }
   0x2 LB: > { %s32_s15 = sadd.s32 1, %s865_s13  ;;  %p695_p0 = scmp.ge.s32.totalorder %s869_s14, 1  ;;  %s869_s14 = sphi %s895_s14, %s13_s14   ;;  %s865_s13 = sphi %s893_s13, %s1026_s13   ;;  %s861_s12 = sphi %s891_s12, %s1025_s12  }
   0x3   : > { %p34_p1 = scmp.ge.s32.totalorder %s32_s15, 5  ;;  %p188_p2 = scmp.lt.s32.totalorder %s869_s14, 6 }
   0x5   : > { %s1028_s15 = smov (%p34_p1, %s32_s15), 0  ;;  %p189_p3 = pnand %p695_p0, %p188_p2 }
   0x6   : > { %s696_s5 = sshll.u32 (!%p189_p3), %s861_s12, 4 }
   0x7   : > { %192 = sbr.rel (%p189_p3) target bundleno = 258 (0x102), region = 32  ;;  %p230_p4 = scmp.lt.s32.totalorder (!%p189_p3), %s696_s5, 79 }
   0xc   : > { %v326_v0 = vld [vmem:[%s1022_s1 + $0x78] sm:$0xff]  ;;  %v325_v1 = vld [vmem:[%s1022_s1 + $0x70] sm:$0xff]  ;;  %v324_v2 = vld [vmem:[%s1022_s1 + $0x68] sm:$0xff]  ;;  %s1030_s5 = smov (!%p230_p4, %s696_s5), 79 }
   0xd   : > { %735 = vmatprep.subr.mxu0 %v326_v0  ;;  %791 = vmatprep.subr.mxu1 %v326_v0  ;;  %v323_v3 = vld [vmem:[%s1022_s1 + $0x60] sm:$0xff]  ;;  %v322_v4 = vld [vmem:[%s1022_s1 + $0x58] sm:$0xff]  ;;  %v321_v5 = vld [vmem:[%s1022_s1 + $0x50] sm:$0xff]  ;;  %s697_s21 = sshll.u32 %s1030_s5, 3 }
   0xe   : > { %736 = vmatpush3.msra.mxu0 %v326_v0  ;;  %807 = vmatpush3.msra.mxu1 %v326_v0  ;;  %v320_v6 = vld [vmem:[%s1022_s1 + $0x48] sm:$0xff]  ;;  %v319_v7 = vld [vmem:[%s1022_s1 + $0x40] sm:$0xff]  ;;  %v318_v8 = vld [vmem:[%s1022_s1 + $0x38] sm:$0xff]  ;;  %s965_s26 = scalar_lea.vmem %s1021_s0, %s697_s21  ;;  %s994_s7 = scalar_lea.vmem %s1024_s3, %s697_s21 }
   0xf   : > { %737 = vmatprep.subr.mxu0 %v325_v1  ;;  %792 = vmatprep.subr.mxu1 %v325_v1  ;;  %v317_v9 = vld [vmem:[%s1022_s1 + $0x30] sm:$0xff]  ;;  %v316_v10 = vld [vmem:[%s1022_s1 + $0x28] sm:$0xff]  ;;  %v315_v11 = vld [vmem:[%s1022_s1 + $0x20] sm:$0xff] }
  0x10   : > { %738 = vmatpush3.msra.mxu0 %v325_v1  ;;  %808 = vmatpush3.msra.mxu1 %v325_v1  ;;  %v314_v12 = vld [vmem:[%s1022_s1 + $0x18] sm:$0xff]  ;;  %v313_v13 = vld [vmem:[%s1022_s1 + $0x10] sm:$0xff]  ;;  %v312_v14 = vld [vmem:[%s1022_s1 + $0x8] sm:$0xff] }
  0x11   : > { %739 = vmatprep.subr.mxu0 %v324_v2  ;;  %793 = vmatprep.subr.mxu1 %v324_v2  ;;  %v311_v15 = vld [vmem:[%s1022_s1] sm:$0xff]  ;;  %v296_v18 = vld [vmem:[%s965_s26 + $0x8] sm:$0xff]  ;;  %v297_v20 = vld [vmem:[%s965_s26 + $0x10] sm:$0xff] }
  0x12   : > { %740 = vmatpush3.msra.mxu0 %v324_v2  ;;  %809 = vmatpush3.msra.mxu1 %v324_v2  ;;  %v295_v16 = vld [vmem:[%s965_s26] sm:$0xff]  ;;  %v304_v19 = vld [vmem:[%s965_s26 + $0x48] sm:$0xff]  ;;  %v305_v21 = vld [vmem:[%s965_s26 + $0x50] sm:$0xff] }
  0x13   : > { %741 = vmatprep.subr.mxu0 %v323_v3  ;;  %794 = vmatprep.subr.mxu1 %v323_v3  ;;  %v303_v17 = vld [vmem:[%s965_s26 + $0x40] sm:$0xff]  ;;  %v298_v22 = vld [vmem:[%s965_s26 + $0x18] sm:$0xff]  ;;  %v300_v26 = vld [vmem:[%s965_s26 + $0x28] sm:$0xff] }
  0x14   : > { %742 = vmatpush3.msra.mxu0 %v323_v3  ;;  %810 = vmatpush3.msra.mxu1 %v323_v3  ;;  %v306_v23 = vld [vmem:[%s965_s26 + $0x58] sm:$0xff]  ;;  %v299_v24 = vld [vmem:[%s965_s26 + $0x20] sm:$0xff]  ;;  %v308_v27 = vld [vmem:[%s965_s26 + $0x68] sm:$0xff] }
  0x15   : > { %743 = vmatprep.subr.mxu0 %v322_v4  ;;  %795 = vmatprep.subr.mxu1 %v322_v4  ;;  %v307_v25 = vld [vmem:[%s965_s26 + $0x60] sm:$0xff]  ;;  %v301_v28 = vld [vmem:[%s965_s26 + $0x30] sm:$0xff]  ;;  %v302_v30 = vld [vmem:[%s965_s26 + $0x38] sm:$0xff] }
  0x16   : > { %744 = vmatpush3.msra.mxu0 %v322_v4  ;;  %811 = vmatpush3.msra.mxu1 %v322_v4  ;;  %v309_v29 = vld [vmem:[%s965_s26 + $0x70] sm:$0xff]  ;;  %v310_v31 = vld [vmem:[%s965_s26 + $0x78] sm:$0xff]  ;;  %v700_v32 = vld [vmem:[%s1023_s2] ss:$0 sm:$0xff] }
  0x17   : > { %745 = vmatprep.subr.mxu0 %v321_v5  ;;  %796 = vmatprep.subr.mxu1 %v321_v5 }
  0x18   : > { %746 = vmatpush3.msra.mxu0 %v321_v5  ;;  %812 = vmatpush3.msra.mxu1 %v321_v5 }
  0x19   : > { %747 = vmatprep.subr.mxu0 %v320_v6  ;;  %797 = vmatprep.subr.mxu1 %v320_v6 }
  0x1a   : > { %748 = vmatpush3.msra.mxu0 %v320_v6  ;;  %813 = vmatpush3.msra.mxu1 %v320_v6 }
  0x1b   : > { %749 = vmatprep.subr.mxu0 %v319_v7  ;;  %798 = vmatprep.subr.mxu1 %v319_v7 }
  0x1c   : > { %750 = vmatpush3.msra.mxu0 %v319_v7  ;;  %814 = vmatpush3.msra.mxu1 %v319_v7 }
  0x1d   : > { %751 = vmatprep.subr.mxu0 %v318_v8  ;;  %799 = vmatprep.subr.mxu1 %v318_v8 }
  0x1e   : > { %752 = vmatpush3.msra.mxu0 %v318_v8  ;;  %815 = vmatpush3.msra.mxu1 %v318_v8 }
  0x1f   : > { %753 = vmatprep.subr.mxu0 %v317_v9  ;;  %800 = vmatprep.subr.mxu1 %v317_v9 }
  0x20   : > { %754 = vmatpush3.msra.mxu0 %v317_v9  ;;  %816 = vmatpush3.msra.mxu1 %v317_v9 }
  0x21   : > { %755 = vmatprep.subr.mxu0 %v316_v10  ;;  %801 = vmatprep.subr.mxu1 %v316_v10 }
  0x22   : > { %756 = vmatpush3.msra.mxu0 %v316_v10  ;;  %817 = vmatpush3.msra.mxu1 %v316_v10 }
  0x23   : > { %757 = vmatprep.subr.mxu0 %v315_v11  ;;  %802 = vmatprep.subr.mxu1 %v315_v11 }
  0x24   : > { %758 = vmatpush3.msra.mxu0 %v315_v11  ;;  %818 = vmatpush3.msra.mxu1 %v315_v11 }
  0x25   : > { %759 = vmatprep.subr.mxu0 %v314_v12  ;;  %803 = vmatprep.subr.mxu1 %v314_v12 }
  0x26   : > { %760 = vmatpush3.msra.mxu0 %v314_v12  ;;  %819 = vmatpush3.msra.mxu1 %v314_v12 }
  0x27   : > { %761 = vmatprep.subr.mxu0 %v313_v13  ;;  %804 = vmatprep.subr.mxu1 %v313_v13 }
  0x28   : > { %762 = vmatpush3.msra.mxu0 %v313_v13  ;;  %820 = vmatpush3.msra.mxu1 %v313_v13 }
  0x29   : > { %763 = vmatprep.subr.mxu0 %v312_v14  ;;  %805 = vmatprep.subr.mxu1 %v312_v14 }
  0x2a   : > { %764 = vmatpush3.msra.mxu0 %v312_v14  ;;  %821 = vmatpush3.msra.mxu1 %v312_v14 }
  0x2b   : > { %765 = vmatprep.subr.mxu0 %v311_v15  ;;  %806 = vmatprep.subr.mxu1 %v311_v15 }
  0x2c   : > { %766 = vmatpush3.msra.mxu0 %v311_v15  ;;  %822 = vmatpush3.msra.mxu1 %v311_v15 }
  0x2d   : > { %767 = vmatprep.mubr.f32.mxu0 %v295_v16  ;;  %779 = vmatprep.mubr.f32.mxu1 %v303_v17 }
  0x2e   : > { %768 = vmatmul.mubr.f32.vlgmr.msra.gmra.mxu0 %v296_v18  ;;  %780 = vmatmul.mubr.f32.vlgmr.msra.gmra.mxu1 %v304_v19 }
  0x2f   : > { %770 = vmatprep.mubr.f32.mxu0 %v297_v20  ;;  %782 = vmatprep.mubr.f32.mxu1 %v305_v21 }
  0x32   : > { %771 = vmatmul.mubr.f32.gmra.mxu0 %v298_v22  ;;  %783 = vmatmul.mubr.f32.gmra.mxu1 %v306_v23 }
  0x33   : > { %773 = vmatprep.mubr.f32.mxu0 %v299_v24  ;;  %785 = vmatprep.mubr.f32.mxu1 %v307_v25 }
  0x36   : > { %774 = vmatmul.mubr.f32.gmra.mxu0 %v300_v26  ;;  %786 = vmatmul.mubr.f32.gmra.mxu1 %v308_v27 }
  0x37   : > { %776 = vmatprep.mubr.f32.mxu0 %v301_v28  ;;  %788 = vmatprep.mubr.f32.mxu1 %v309_v29 }
  0x3a   : > { %777 = vmatmul.mubr.f32.gmra.mxu0 %v302_v30  ;;  %789 = vmatmul.mubr.f32.gmra.mxu1 %v310_v31 }
  0xee   : > { %v769_v33 = vpop.f32.mrf.mxu0  ;;  %v781_v34 = vpop.f32.mrf.mxu1 }
  0xef   : > { %v531_v35 = vadd.f32 %v769_v33, %v700_v32  ;;  %v539_v36 = vadd.f32 %v781_v34, %v700_v32 }
  0xf0   : > { %v393_v37 = vpop.f32.mrf.mxu0  ;;  %v433_v38 = vpop.f32.mrf.mxu1 }
  0xf1   : > { %v547_v39 = vmax.f32 %v531_v35, 0.0  ;;  %v555_v40 = vmax.f32 %v539_v36, 0.0  ;;  %v530_v41 = vadd.f32 %v700_v32, %v393_v37  ;;  %v538_v42 = vadd.f32 %v700_v32, %v433_v38 }
  0xf2   : > { %v772_v43 = vpop.f32.mrf.mxu0  ;;  %v784_v44 = vpop.f32.mrf.mxu1 }
  0xf3   : > { %563 = vst [vmem:[%s994_s7 + $0x8] sm:$0xff] %v547_v39  ;;  %571 = vst [vmem:[%s994_s7 + $0x48] sm:$0xff] %v555_v40  ;;  %v546_v45 = vmax.f32 %v530_v41, 0.0  ;;  %v554_v46 = vmax.f32 %v538_v42, 0.0  ;;  %v533_v47 = vadd.f32 %v772_v43, %v700_v32  ;;  %v541_v48 = vadd.f32 %v784_v44, %v700_v32 }
  0xf4   : > { %v403_v49 = vpop.f32.mrf.mxu0  ;;  %v443_v50 = vpop.f32.mrf.mxu1 }
  0xf5   : > { %562 = vst [vmem:[%s994_s7] sm:$0xff] %v546_v45  ;;  %570 = vst [vmem:[%s994_s7 + $0x40] sm:$0xff] %v554_v46  ;;  %v549_v51 = vmax.f32 %v533_v47, 0.0  ;;  %v557_v52 = vmax.f32 %v541_v48, 0.0  ;;  %v532_v53 = vadd.f32 %v700_v32, %v403_v49  ;;  %v540_v54 = vadd.f32 %v700_v32, %v443_v50 }
  0xf6   : > { %v775_v55 = vpop.f32.mrf.mxu0  ;;  %v787_v56 = vpop.f32.mrf.mxu1 }
  0xf7   : > { %565 = vst [vmem:[%s994_s7 + $0x18] sm:$0xff] %v549_v51  ;;  %573 = vst [vmem:[%s994_s7 + $0x58] sm:$0xff] %v557_v52  ;;  %v548_v57 = vmax.f32 %v532_v53, 0.0  ;;  %v556_v58 = vmax.f32 %v540_v54, 0.0  ;;  %v535_v59 = vadd.f32 %v775_v55, %v700_v32  ;;  %v543_v60 = vadd.f32 %v787_v56, %v700_v32 }
  0xf8   : > { %v413_v61 = vpop.f32.mrf.mxu0  ;;  %v453_v62 = vpop.f32.mrf.mxu1 }
  0xf9   : > { %564 = vst [vmem:[%s994_s7 + $0x10] sm:$0xff] %v548_v57  ;;  %572 = vst [vmem:[%s994_s7 + $0x50] sm:$0xff] %v556_v58  ;;  %v551_v63 = vmax.f32 %v535_v59, 0.0  ;;  %v559_v0 = vmax.f32 %v543_v60, 0.0  ;;  %v534_v1 = vadd.f32 %v700_v32, %v413_v61  ;;  %v542_v2 = vadd.f32 %v700_v32, %v453_v62 }
  0xfa   : > { %v778_v3 = vpop.f32.mrf.mxu0  ;;  %v790_v4 = vpop.f32.mrf.mxu1 }
  0xfb   : > { %567 = vst [vmem:[%s994_s7 + $0x28] sm:$0xff] %v551_v63  ;;  %575 = vst [vmem:[%s994_s7 + $0x68] sm:$0xff] %v559_v0  ;;  %v550_v5 = vmax.f32 %v534_v1, 0.0  ;;  %v558_v6 = vmax.f32 %v542_v2, 0.0  ;;  %v537_v7 = vadd.f32 %v778_v3, %v700_v32  ;;  %v545_v8 = vadd.f32 %v790_v4, %v700_v32 }
  0xfc   : > { %v423_v9 = vpop.f32.mrf.mxu0  ;;  %v463_v10 = vpop.f32.mrf.mxu1 }
  0xfd   : > { %566 = vst [vmem:[%s994_s7 + $0x20] sm:$0xff] %v550_v5  ;;  %574 = vst [vmem:[%s994_s7 + $0x60] sm:$0xff] %v558_v6  ;;  %v553_v11 = vmax.f32 %v537_v7, 0.0  ;;  %v561_v12 = vmax.f32 %v545_v8, 0.0  ;;  %v536_v13 = vadd.f32 %v700_v32, %v423_v9  ;;  %v544_v14 = vadd.f32 %v700_v32, %v463_v10 }
  0xff   : > { %569 = vst [vmem:[%s994_s7 + $0x38] sm:$0xff] %v553_v11  ;;  %577 = vst [vmem:[%s994_s7 + $0x78] sm:$0xff] %v561_v12  ;;  %v552_v15 = vmax.f32 %v536_v13, 0.0  ;;  %v560_v16 = vmax.f32 %v544_v14, 0.0 }
 0x101   : > { %568 = vst [vmem:[%s994_s7 + $0x30] sm:$0xff] %v552_v15  ;;  %576 = vst [vmem:[%s994_s7 + $0x70] sm:$0xff] %v560_v16 }
 0x102 PF: > { %s13_s14 = sadd.s32 1, %s869_s14   ;;  %s1025_s12 = smov %s865_s13 }
 0x103   : > { %p10_p5 = scmp.ge.s32.totalorder %s13_s14, 7   ;;  %s1026_s13 = smov %s1028_s15 }
 0x105   :  { %12 = sbr.rel (!%p10_p5) target bundleno = 2 (0x2), region = 76 }

// kernel: _lambda_.16
= control target key start
LH: loop header
LB: loop body
LE: loop exit
PB: predicated region body
PF: predicated region fallthrough
CT: control target
= control target key end

     0   :  { %s1160_s12 = smov 0   ;;  %s1162_s13 = smov 0   ;;  %s1439_s0 = inlined_call_operand.vmem [shape: f32[512,384], index: 0, kind: input, shape index: {}]   ;;  %s1440_s1 = inlined_call_operand.vmem [shape: f32[384,128], index: 1, kind: input, shape index: {}]   ;;  %s1441_s2 = inlined_call_operand.vmem [shape: f32[1,128], index: 2, kind: input, shape index: {}]   ;;  %s1442_s3 = inlined_call_operand.vmem [shape: f32[512,128], index: 3, kind: output, shape index: {}]  }
   0x1   :  { %s1164_s14 = smov 0  }
   0x2 LB: > { %s32_s15 = sadd.s32 1, %s1134_s13  ;;  %p915_p0 = scmp.ge.s32.totalorder %s1138_s14, 1  ;;  %s1138_s14 = sphi %s1164_s14, %s13_s14   ;;  %s1134_s13 = sphi %s1162_s13, %s1445_s13   ;;  %s1130_s12 = sphi %s1160_s12, %s1444_s12  }
   0x3   : > { %p34_p1 = scmp.ge.s32.totalorder %s32_s15, 4  ;;  %p191_p2 = scmp.lt.s32.totalorder %s1138_s14, 5 }
   0x5   : > { %s1447_s15 = smov (%p34_p1, %s32_s15), 0  ;;  %p192_p3 = pnand %p915_p0, %p191_p2 }
   0x6   : > { %s916_s4 = sshll.u32 (!%p192_p3), %s1130_s12, 4 }
   0x7   : > { %195 = sbr.rel (%p192_p3) target bundleno = 309 (0x135), region = 32  ;;  %p1253_p4 = scmp.lt.s32.totalorder (!%p192_p3), %s916_s4, 63 }
   0xc   : > { %v382_v0 = vld [vmem:[%s1440_s1 + $0xf8] sm:$0xff]  ;;  %v381_v2 = vld [vmem:[%s1440_s1 + $0xf0] sm:$0xff]  ;;  %v380_v5 = vld [vmem:[%s1440_s1 + $0xe8] sm:$0xff]  ;;  %s1449_s4 = smov (!%p1253_p4, %s916_s4), 63 }
   0xd   : > { %v366_v1 = vld [vmem:[%s1440_s1 + $0x78] sm:$0xff]  ;;  %923 = vmatprep.subr.mxu0 %v382_v0  ;;  %v365_v4 = vld [vmem:[%s1440_s1 + $0x70] sm:$0xff]  ;;  %v364_v7 = vld [vmem:[%s1440_s1 + $0x68] sm:$0xff]  ;;  %s1091_s20 = smul.u32 24, %s1449_s4  ;;  %s919_s27 = sshll.u32 %s1449_s4, 3 }
   0xe   : > { %v398_v3 = vld [vmem:[%s1440_s1 + $0x178] sm:$0xff]  ;;  %924 = vmatpush3.msra.mxu0 %v366_v1  ;;  %v397_v6 = vld [vmem:[%s1440_s1 + $0x170] sm:$0xff]  ;;  %v396_v8 = vld [vmem:[%s1440_s1 + $0x168] sm:$0xff]  ;;  %s1397_s30 = scalar_lea.vmem %s1442_s3, %s919_s27 }
   0xf   : > { %1035 = vmatprep.subr.mxu1 %v398_v3  ;;  %925 = vmatprep.subr.mxu0 %v381_v2  ;;  %v379_v9 = vld [vmem:[%s1440_s1 + $0xe0] sm:$0xff]  ;;  %v378_v12 = vld [vmem:[%s1440_s1 + $0xd8] sm:$0xff]  ;;  %v377_v15 = vld [vmem:[%s1440_s1 + $0xd0] sm:$0xff]  ;;  %s1319_s9 = scalar_lea.vmem %s1439_s0, %s1091_s20 }
  0x10   : > { %1036 = vmatpush3.msra.mxu1 %v398_v3  ;;  %926 = vmatpush3.msra.mxu0 %v365_v4  ;;  %v363_v10 = vld [vmem:[%s1440_s1 + $0x60] sm:$0xff]  ;;  %v362_v13 = vld [vmem:[%s1440_s1 + $0x58] sm:$0xff]  ;;  %v361_v16 = vld [vmem:[%s1440_s1 + $0x50] sm:$0xff] }
  0x11   : > { %1037 = vmatprep.subr.mxu1 %v397_v6  ;;  %927 = vmatprep.subr.mxu0 %v380_v5  ;;  %v395_v11 = vld [vmem:[%s1440_s1 + $0x160] sm:$0xff]  ;;  %v394_v14 = vld [vmem:[%s1440_s1 + $0x158] sm:$0xff]  ;;  %v393_v17 = vld [vmem:[%s1440_s1 + $0x150] sm:$0xff] }
  0x12   : > { %1038 = vmatpush3.msra.mxu1 %v397_v6  ;;  %928 = vmatpush3.msra.mxu0 %v364_v7  ;;  %v376_v18 = vld [vmem:[%s1440_s1 + $0xc8] sm:$0xff]  ;;  %v375_v21 = vld [vmem:[%s1440_s1 + $0xc0] sm:$0xff]  ;;  %v374_v24 = vld [vmem:[%s1440_s1 + $0xb8] sm:$0xff] }
  0x13   : > { %1039 = vmatprep.subr.mxu1 %v396_v8  ;;  %929 = vmatprep.subr.mxu0 %v379_v9  ;;  %v360_v19 = vld [vmem:[%s1440_s1 + $0x48] sm:$0xff]  ;;  %v359_v22 = vld [vmem:[%s1440_s1 + $0x40] sm:$0xff]  ;;  %v358_v25 = vld [vmem:[%s1440_s1 + $0x38] sm:$0xff] }
  0x14   : > { %1040 = vmatpush3.msra.mxu1 %v396_v8  ;;  %930 = vmatpush3.msra.mxu0 %v363_v10  ;;  %v392_v20 = vld [vmem:[%s1440_s1 + $0x148] sm:$0xff]  ;;  %v391_v23 = vld [vmem:[%s1440_s1 + $0x140] sm:$0xff]  ;;  %v390_v26 = vld [vmem:[%s1440_s1 + $0x138] sm:$0xff] }
  0x15   : > { %1041 = vmatprep.subr.mxu1 %v395_v11  ;;  %931 = vmatprep.subr.mxu0 %v378_v12  ;;  %v373_v27 = vld [vmem:[%s1440_s1 + $0xb0] sm:$0xff]  ;;  %v372_v30 = vld [vmem:[%s1440_s1 + $0xa8] sm:$0xff]  ;;  %v371_v33 = vld [vmem:[%s1440_s1 + $0xa0] sm:$0xff] }
  0x16   : > { %1042 = vmatpush3.msra.mxu1 %v395_v11  ;;  %932 = vmatpush3.msra.mxu0 %v362_v13  ;;  %v357_v28 = vld [vmem:[%s1440_s1 + $0x30] sm:$0xff]  ;;  %v356_v31 = vld [vmem:[%s1440_s1 + $0x28] sm:$0xff]  ;;  %v355_v34 = vld [vmem:[%s1440_s1 + $0x20] sm:$0xff] }
  0x17   : > { %1043 = vmatprep.subr.mxu1 %v394_v14  ;;  %933 = vmatprep.subr.mxu0 %v377_v15  ;;  %v389_v29 = vld [vmem:[%s1440_s1 + $0x130] sm:$0xff]  ;;  %v388_v32 = vld [vmem:[%s1440_s1 + $0x128] sm:$0xff]  ;;  %v387_v35 = vld [vmem:[%s1440_s1 + $0x120] sm:$0xff] }
  0x18   : > { %1044 = vmatpush3.msra.mxu1 %v394_v14  ;;  %934 = vmatpush3.msra.mxu0 %v361_v16  ;;  %v370_v36 = vld [vmem:[%s1440_s1 + $0x98] sm:$0xff]  ;;  %v369_v39 = vld [vmem:[%s1440_s1 + $0x90] sm:$0xff]  ;;  %v368_v42 = vld [vmem:[%s1440_s1 + $0x88] sm:$0xff] }
  0x19   : > { %1045 = vmatprep.subr.mxu1 %v393_v17  ;;  %935 = vmatprep.subr.mxu0 %v376_v18  ;;  %v354_v37 = vld [vmem:[%s1440_s1 + $0x18] sm:$0xff]  ;;  %v353_v40 = vld [vmem:[%s1440_s1 + $0x10] sm:$0xff]  ;;  %v352_v43 = vld [vmem:[%s1440_s1 + $0x8] sm:$0xff] }
  0x1a   : > { %1046 = vmatpush3.msra.mxu1 %v393_v17  ;;  %936 = vmatpush3.msra.mxu0 %v360_v19  ;;  %v386_v38 = vld [vmem:[%s1440_s1 + $0x118] sm:$0xff]  ;;  %v385_v41 = vld [vmem:[%s1440_s1 + $0x110] sm:$0xff]  ;;  %v384_v44 = vld [vmem:[%s1440_s1 + $0x108] sm:$0xff] }
  0x1b   : > { %1047 = vmatprep.subr.mxu1 %v392_v20  ;;  %937 = vmatprep.subr.mxu0 %v375_v21  ;;  %v367_v45 = vld [vmem:[%s1440_s1 + $0x80] sm:$0xff]  ;;  %v304_v46 = vld [vmem:[%s1319_s9 + $0x8] sm:$0xff]  ;;  %v305_v50 = vld [vmem:[%s1319_s9 + $0x10] sm:$0xff] }
  0x1c   : > { %1048 = vmatpush3.msra.mxu1 %v392_v20  ;;  %938 = vmatpush3.msra.mxu0 %v359_v22  ;;  %v351_v47 = vld [vmem:[%s1440_s1] sm:$0xff]  ;;  %v308_v51 = vld [vmem:[%s1319_s9 + $0x28] sm:$0xff]  ;;  %v306_v54 = vld [vmem:[%s1319_s9 + $0x18] sm:$0xff] }
  0x1d   : > { %1049 = vmatprep.subr.mxu1 %v391_v23  ;;  %939 = vmatprep.subr.mxu0 %v374_v24  ;;  %v303_v48 = vld [vmem:[%s1319_s9] sm:$0xff]  ;;  %v310_v55 = vld [vmem:[%s1319_s9 + $0x38] sm:$0xff]  ;;  %v317_v57 = vld [vmem:[%s1319_s9 + $0x70] sm:$0xff] }
  0x1e   : > { %1050 = vmatpush3.msra.mxu1 %v391_v23  ;;  %940 = vmatpush3.msra.mxu0 %v358_v25  ;;  %v383_v49 = vld [vmem:[%s1440_s1 + $0x100] sm:$0xff]  ;;  %v314_v56 = vld [vmem:[%s1319_s9 + $0x58] sm:$0xff]  ;;  %v309_v58 = vld [vmem:[%s1319_s9 + $0x30] sm:$0xff] }
  0x1f   : > { %1051 = vmatprep.subr.mxu1 %v390_v26  ;;  %941 = vmatprep.subr.mxu0 %v373_v27  ;;  %v307_v52 = vld [vmem:[%s1319_s9 + $0x20] sm:$0xff]  ;;  %v313_v59 = vld [vmem:[%s1319_s9 + $0x50] sm:$0xff]  ;;  %v320_v60 = vld [vmem:[%s1319_s9 + $0x88] sm:$0xff] }
  0x20   : > { %1052 = vmatpush3.msra.mxu1 %v390_v26  ;;  %942 = vmatpush3.msra.mxu0 %v357_v28  ;;  %v311_v53 = vld [vmem:[%s1319_s9 + $0x40] sm:$0xff]  ;;  %v312_v62 = vld [vmem:[%s1319_s9 + $0x48] sm:$0xff]  ;;  %v326_v0 = vld [vmem:[%s1319_s9 + $0xb8] sm:$0xff] }
  0x21   : > { %1053 = vmatprep.subr.mxu1 %v389_v29  ;;  %943 = vmatprep.subr.mxu0 %v372_v30  ;;  %v323_v61 = vld [vmem:[%s1319_s9 + $0xa0] sm:$0xff]  ;;  %v316_v63 = vld [vmem:[%s1319_s9 + $0x68] sm:$0xff]  ;;  %v329_v1 = vld [vmem:[%s1319_s9 + $0xd0] sm:$0xff] }
  0x22   : > { %1054 = vmatpush3.msra.mxu1 %v389_v29  ;;  %944 = vmatpush3.msra.mxu0 %v356_v31  ;;  %v315_v2 = vld [vmem:[%s1319_s9 + $0x60] sm:$0xff]  ;;  %v332_v4 = vld [vmem:[%s1319_s9 + $0xe8] sm:$0xff]  ;;  %v318_v6 = vld [vmem:[%s1319_s9 + $0x78] sm:$0xff] }
  0x23   : > { %1055 = vmatprep.subr.mxu1 %v388_v32  ;;  %945 = vmatprep.subr.mxu0 %v371_v33  ;;  %v319_v3 = vld [vmem:[%s1319_s9 + $0x80] sm:$0xff]  ;;  %v322_v7 = vld [vmem:[%s1319_s9 + $0x98] sm:$0xff]  ;;  %v341_v9 = vld [vmem:[%s1319_s9 + $0x130] sm:$0xff] }
  0x24   : > { %1056 = vmatpush3.msra.mxu1 %v388_v32  ;;  %946 = vmatpush3.msra.mxu0 %v355_v34  ;;  %v335_v5 = vld [vmem:[%s1319_s9 + $0x100] sm:$0xff]  ;;  %v338_v8 = vld [vmem:[%s1319_s9 + $0x118] sm:$0xff]  ;;  %v321_v10 = vld [vmem:[%s1319_s9 + $0x90] sm:$0xff] }
  0x25   : > { %1057 = vmatprep.subr.mxu1 %v387_v35  ;;  %947 = vmatprep.subr.mxu0 %v370_v36  ;;  %v325_v11 = vld [vmem:[%s1319_s9 + $0xb0] sm:$0xff]  ;;  %v344_v12 = vld [vmem:[%s1319_s9 + $0x148] sm:$0xff]  ;;  %v347_v13 = vld [vmem:[%s1319_s9 + $0x160] sm:$0xff] }
  0x26   : > { %1058 = vmatpush3.msra.mxu1 %v387_v35  ;;  %948 = vmatpush3.msra.mxu0 %v354_v37  ;;  %v324_v14 = vld [vmem:[%s1319_s9 + $0xa8] sm:$0xff]  ;;  %v350_v16 = vld [vmem:[%s1319_s9 + $0x178] sm:$0xff]  ;;  %v327_v17 = vld [vmem:[%s1319_s9 + $0xc0] sm:$0xff] }
  0x27   : > { %1059 = vmatprep.subr.mxu1 %v386_v38  ;;  %949 = vmatprep.subr.mxu0 %v369_v39  ;;  %v328_v15 = vld [vmem:[%s1319_s9 + $0xc8] sm:$0xff]  ;;  %v331_v18 = vld [vmem:[%s1319_s9 + $0xe0] sm:$0xff]  ;;  %v330_v19 = vld [vmem:[%s1319_s9 + $0xd8] sm:$0xff] }
  0x28   : > { %1060 = vmatpush3.msra.mxu1 %v386_v38  ;;  %950 = vmatpush3.msra.mxu0 %v353_v40  ;;  %v334_v20 = vld [vmem:[%s1319_s9 + $0xf8] sm:$0xff]  ;;  %v333_v21 = vld [vmem:[%s1319_s9 + $0xf0] sm:$0xff]  ;;  %v336_v23 = vld [vmem:[%s1319_s9 + $0x108] sm:$0xff] }
  0x29   : > { %1061 = vmatprep.subr.mxu1 %v385_v41  ;;  %951 = vmatprep.subr.mxu0 %v368_v42  ;;  %v337_v22 = vld [vmem:[%s1319_s9 + $0x110] sm:$0xff]  ;;  %v340_v24 = vld [vmem:[%s1319_s9 + $0x128] sm:$0xff]  ;;  %v339_v25 = vld [vmem:[%s1319_s9 + $0x120] sm:$0xff] }
  0x2a   : > { %1062 = vmatpush3.msra.mxu1 %v385_v41  ;;  %952 = vmatpush3.msra.mxu0 %v352_v43  ;;  %v343_v26 = vld [vmem:[%s1319_s9 + $0x140] sm:$0xff]  ;;  %v342_v27 = vld [vmem:[%s1319_s9 + $0x138] sm:$0xff]  ;;  %v345_v29 = vld [vmem:[%s1319_s9 + $0x150] sm:$0xff] }
  0x2b   : > { %1063 = vmatprep.subr.mxu1 %v384_v44  ;;  %953 = vmatprep.subr.mxu0 %v367_v45  ;;  %v346_v28 = vld [vmem:[%s1319_s9 + $0x158] sm:$0xff]  ;;  %v349_v30 = vld [vmem:[%s1319_s9 + $0x170] sm:$0xff]  ;;  %v348_v31 = vld [vmem:[%s1319_s9 + $0x168] sm:$0xff] }
  0x2c   : > { %463 = vmatprep.mubr.f32.mxu0 %v304_v46  ;;  %954 = vmatpush3.msra.mxu0 %v351_v47  ;;  %v1390_v38 = vld [vmem:[%s1441_s2] ss:$0 sm:$0xff] }
  0x2d   : > { %1064 = vmatpush3.msra.mxu1 %v384_v44  ;;  %464 = vmatmul.mubr.f32.vlgmr.msra.gmra.mxu0 %v303_v48 }
  0x2e   : > { %1065 = vmatprep.subr.mxu1 %v383_v49  ;;  %1067 = vmatprep.mubr.f32.mxu1 %v305_v50 }
  0x2f   : > { %1066 = vmatpush3.msra.mxu1 %v383_v49  ;;  %468 = vmatprep.mubr.f32.mxu0 %v307_v52 }
  0x30   : > { %1068 = vmatmul.mubr.f32.vlgmr.msra.gmra.mxu1 %v308_v51 }
  0x31   : > { %1070 = vmatprep.mubr.f32.mxu1 %v311_v53  ;;  %469 = vmatmul.mubr.f32.gmra.mxu0 %v306_v54 }
  0x32   : > { %473 = vmatprep.mubr.f32.mxu0 %v310_v55 }
  0x34   : > { %1071 = vmatmul.mubr.f32.gmra.mxu1 %v314_v56 }
  0x35   : > { %1073 = vmatprep.mubr.f32.mxu1 %v317_v57  ;;  %474 = vmatmul.mubr.f32.gmra.mxu0 %v309_v58 }
  0x36   : > { %478 = vmatprep.mubr.f32.mxu0 %v313_v59 }
  0x38   : > { %1074 = vmatmul.mubr.f32.gmra.mxu1 %v320_v60 }
  0x39   : > { %1076 = vmatprep.mubr.f32.mxu1 %v323_v61  ;;  %479 = vmatmul.mubr.f32.gmra.mxu0 %v312_v62 }
  0x3a   : > { %483 = vmatprep.mubr.f32.mxu0 %v316_v63 }
  0x3c   : > { %1077 = vmatmul.mubr.f32.gmra.mxu1 %v326_v0 }
  0x3d   : > { %1079 = vmatprep.mubr.f32.mxu1 %v329_v1  ;;  %484 = vmatmul.mubr.f32.gmra.mxu0 %v315_v2 }
  0x3e   : > { %488 = vmatprep.mubr.f32.mxu0 %v319_v3 }
  0x40   : > { %1080 = vmatmul.mubr.f32.gmra.mxu1 %v332_v4 }
  0x41   : > { %1082 = vmatprep.mubr.f32.mxu1 %v335_v5  ;;  %489 = vmatmul.mubr.f32.gmra.mxu0 %v318_v6 }
  0x42   : > { %493 = vmatprep.mubr.f32.mxu0 %v322_v7 }
  0x44   : > { %1083 = vmatmul.mubr.f32.gmra.mxu1 %v338_v8 }
  0x45   : > { %1085 = vmatprep.mubr.f32.mxu1 %v341_v9  ;;  %494 = vmatmul.mubr.f32.gmra.mxu0 %v321_v10 }
  0x46   : > { %498 = vmatprep.mubr.f32.mxu0 %v325_v11 }
  0x48   : > { %1086 = vmatmul.mubr.f32.gmra.mxu1 %v344_v12 }
  0x49   : > { %1088 = vmatprep.mubr.f32.mxu1 %v347_v13  ;;  %499 = vmatmul.mubr.f32.gmra.mxu0 %v324_v14 }
  0x4a   : > { %503 = vmatprep.mubr.f32.mxu0 %v328_v15 }
  0x4c   : > { %1089 = vmatmul.mubr.f32.gmra.mxu1 %v350_v16 }
  0x4d   : > { %504 = vmatmul.mubr.f32.gmra.mxu0 %v327_v17 }
  0x4e   : > { %508 = vmatprep.mubr.f32.mxu0 %v331_v18 }
  0x51   : > { %509 = vmatmul.mubr.f32.gmra.mxu0 %v330_v19 }
  0x52   : > { %513 = vmatprep.mubr.f32.mxu0 %v334_v20 }
  0x55   : > { %514 = vmatmul.mubr.f32.gmra.mxu0 %v333_v21 }
  0x56   : > { %518 = vmatprep.mubr.f32.mxu0 %v337_v22 }
  0x59   : > { %519 = vmatmul.mubr.f32.gmra.mxu0 %v336_v23 }
  0x5a   : > { %523 = vmatprep.mubr.f32.mxu0 %v340_v24 }
  0x5d   : > { %524 = vmatmul.mubr.f32.gmra.mxu0 %v339_v25 }
  0x5e   : > { %528 = vmatprep.mubr.f32.mxu0 %v343_v26 }
  0x61   : > { %529 = vmatmul.mubr.f32.gmra.mxu0 %v342_v27 }
  0x62   : > { %533 = vmatprep.mubr.f32.mxu0 %v346_v28 }
  0x65   : > { %534 = vmatmul.mubr.f32.gmra.mxu0 %v345_v29 }
  0x66   : > { %538 = vmatprep.mubr.f32.mxu0 %v349_v30 }
  0x69   : > { %539 = vmatmul.mubr.f32.gmra.mxu0 %v348_v31 }
  0xed   : > { %v955_v32 = vpop.f32.mrf.mxu0 }
  0xef   : > { %v956_v33 = vpop.f32.mrf.mxu0 }
  0xf0   : > { %v1069_v34 = vpop.f32.mrf.mxu1  ;;  %v957_v35 = vadd.f32 %v956_v33, %v955_v32 }
  0xf1   : > { %v958_v36 = vpop.f32.mrf.mxu0 }
  0xf2   : > { %v610_v37 = vpop.f32.mrf.mxu1 }
  0xf3   : > { %v611_v39 = vadd.f32 %v957_v35, %v610_v37  ;;  %v959_v40 = vpop.f32.mrf.mxu0 }
  0xf4   : > { %v1072_v41 = vpop.f32.mrf.mxu1  ;;  %v960_v43 = vadd.f32 %v959_v40, %v958_v36 }
  0xf5   : > { %v747_v42 = vadd.f32 %v1390_v38, %v611_v39  ;;  %v961_v44 = vpop.f32.mrf.mxu0 }
  0xf6   : > { %v616_v46 = vadd.f32 %v1069_v34, %v960_v43  ;;  %v620_v48 = vpop.f32.mrf.mxu1 }
  0xf7   : > { %v763_v45 = vmax.f32 %v747_v42, 0.0  ;;  %v962_v47 = vpop.f32.mrf.mxu0 }
  0xf8   : > { %v748_v49 = vadd.f32 %v1390_v38, %v616_v46  ;;  %v963_v50 = vadd.f32 %v962_v47, %v961_v44  ;;  %v1075_v55 = vpop.f32.mrf.mxu1 }
  0xf9   : > { %779 = vst [vmem:[%s1397_s30] sm:$0xff] %v763_v45  ;;  %v964_v51 = vpop.f32.mrf.mxu0 }
  0xfa   : > { %v764_v52 = vmax.f32 %v748_v49, 0.0  ;;  %v621_v53 = vadd.f32 %v963_v50, %v620_v48  ;;  %v630_v62 = vpop.f32.mrf.mxu1 }
  0xfb   : > { %v965_v54 = vpop.f32.mrf.mxu0 }
  0xfc   : > { %780 = vst [vmem:[%s1397_s30 + $0x8] sm:$0xff] %v764_v52  ;;  %v749_v56 = vadd.f32 %v1390_v38, %v621_v53  ;;  %v966_v57 = vadd.f32 %v965_v54, %v964_v51  ;;  %v1078_v5 = vpop.f32.mrf.mxu1 }
  0xfd   : > { %v967_v58 = vpop.f32.mrf.mxu0 }
  0xfe   : > { %v765_v59 = vmax.f32 %v749_v56, 0.0  ;;  %v626_v60 = vadd.f32 %v1072_v41, %v966_v57  ;;  %v640_v12 = vpop.f32.mrf.mxu1 }
  0xff   : > { %v968_v61 = vpop.f32.mrf.mxu0 }
 0x100   : > { %781 = vst [vmem:[%s1397_s30 + $0x10] sm:$0xff] %v765_v59  ;;  %v750_v63 = vadd.f32 %v1390_v38, %v626_v60  ;;  %v969_v0 = vadd.f32 %v968_v61, %v967_v58  ;;  %v1081_v19 = vpop.f32.mrf.mxu1 }
 0x101   : > { %v970_v1 = vpop.f32.mrf.mxu0 }
 0x102   : > { %v766_v2 = vmax.f32 %v750_v63, 0.0  ;;  %v631_v3 = vadd.f32 %v969_v0, %v630_v62  ;;  %v650_v26 = vpop.f32.mrf.mxu1 }
 0x103   : > { %v971_v4 = vpop.f32.mrf.mxu0 }
 0x104   : > { %782 = vst [vmem:[%s1397_s30 + $0x18] sm:$0xff] %v766_v2  ;;  %v751_v6 = vadd.f32 %v1390_v38, %v631_v3  ;;  %v972_v7 = vadd.f32 %v971_v4, %v970_v1  ;;  %v1084_v33 = vpop.f32.mrf.mxu1 }
 0x105   : > { %v973_v8 = vpop.f32.mrf.mxu0 }
 0x106   : > { %v767_v9 = vmax.f32 %v751_v6, 0.0  ;;  %v636_v10 = vadd.f32 %v1075_v55, %v972_v7  ;;  %v660_v41 = vpop.f32.mrf.mxu1 }
 0x107   : > { %v974_v11 = vpop.f32.mrf.mxu0 }
 0x108   : > { %783 = vst [vmem:[%s1397_s30 + $0x20] sm:$0xff] %v767_v9  ;;  %v752_v13 = vadd.f32 %v1390_v38, %v636_v10  ;;  %v975_v14 = vadd.f32 %v974_v11, %v973_v8  ;;  %v1087_v48 = vpop.f32.mrf.mxu1 }
 0x109   : > { %v976_v15 = vpop.f32.mrf.mxu0 }
 0x10a   : > { %v768_v16 = vmax.f32 %v752_v13, 0.0  ;;  %v641_v17 = vadd.f32 %v975_v14, %v640_v12  ;;  %v670_v55 = vpop.f32.mrf.mxu1 }
 0x10b   : > { %v977_v18 = vpop.f32.mrf.mxu0 }
 0x10c   : > { %784 = vst [vmem:[%s1397_s30 + $0x28] sm:$0xff] %v768_v16  ;;  %v753_v20 = vadd.f32 %v1390_v38, %v641_v17  ;;  %v978_v21 = vadd.f32 %v977_v18, %v976_v15  ;;  %v1090_v62 = vpop.f32.mrf.mxu1 }
 0x10d   : > { %v979_v22 = vpop.f32.mrf.mxu0 }
 0x10e   : > { %v769_v23 = vmax.f32 %v753_v20, 0.0  ;;  %v646_v24 = vadd.f32 %v1078_v5, %v978_v21  ;;  %v680_v5 = vpop.f32.mrf.mxu1 }
 0x10f   : > { %v980_v25 = vpop.f32.mrf.mxu0 }
 0x110   : > { %785 = vst [vmem:[%s1397_s30 + $0x30] sm:$0xff] %v769_v23  ;;  %v754_v27 = vadd.f32 %v1390_v38, %v646_v24  ;;  %v981_v28 = vadd.f32 %v980_v25, %v979_v22 }
 0x111   : > { %v982_v29 = vpop.f32.mrf.mxu0 }
 0x112   : > { %v770_v30 = vmax.f32 %v754_v27, 0.0  ;;  %v651_v31 = vadd.f32 %v981_v28, %v650_v26 }
 0x113   : > { %v983_v32 = vpop.f32.mrf.mxu0 }
 0x114   : > { %786 = vst [vmem:[%s1397_s30 + $0x38] sm:$0xff] %v770_v30  ;;  %v755_v34 = vadd.f32 %v1390_v38, %v651_v31  ;;  %v984_v35 = vadd.f32 %v983_v32, %v982_v29 }
 0x115   : > { %v985_v36 = vpop.f32.mrf.mxu0 }
 0x116   : > { %v771_v37 = vmax.f32 %v755_v34, 0.0  ;;  %v656_v39 = vadd.f32 %v1081_v19, %v984_v35 }
 0x117   : > { %v986_v40 = vpop.f32.mrf.mxu0 }
 0x118   : > { %787 = vst [vmem:[%s1397_s30 + $0x40] sm:$0xff] %v771_v37  ;;  %v756_v42 = vadd.f32 %v1390_v38, %v656_v39  ;;  %v987_v43 = vadd.f32 %v986_v40, %v985_v36 }
 0x119   : > { %v988_v44 = vpop.f32.mrf.mxu0 }
 0x11a   : > { %v772_v45 = vmax.f32 %v756_v42, 0.0  ;;  %v661_v46 = vadd.f32 %v987_v43, %v660_v41 }
 0x11b   : > { %v989_v47 = vpop.f32.mrf.mxu0 }
 0x11c   : > { %788 = vst [vmem:[%s1397_s30 + $0x48] sm:$0xff] %v772_v45  ;;  %v757_v49 = vadd.f32 %v1390_v38, %v661_v46  ;;  %v990_v50 = vadd.f32 %v989_v47, %v988_v44 }
 0x11d   : > { %v991_v51 = vpop.f32.mrf.mxu0 }
 0x11e   : > { %v773_v52 = vmax.f32 %v757_v49, 0.0  ;;  %v666_v53 = vadd.f32 %v1084_v33, %v990_v50 }
 0x11f   : > { %v992_v54 = vpop.f32.mrf.mxu0 }
 0x120   : > { %789 = vst [vmem:[%s1397_s30 + $0x50] sm:$0xff] %v773_v52  ;;  %v758_v56 = vadd.f32 %v1390_v38, %v666_v53  ;;  %v993_v57 = vadd.f32 %v992_v54, %v991_v51 }
 0x121   : > { %v994_v58 = vpop.f32.mrf.mxu0 }
 0x122   : > { %v774_v59 = vmax.f32 %v758_v56, 0.0  ;;  %v671_v60 = vadd.f32 %v993_v57, %v670_v55 }
 0x123   : > { %v995_v61 = vpop.f32.mrf.mxu0 }
 0x124   : > { %790 = vst [vmem:[%s1397_s30 + $0x58] sm:$0xff] %v774_v59  ;;  %v759_v63 = vadd.f32 %v1390_v38, %v671_v60  ;;  %v996_v0 = vadd.f32 %v995_v61, %v994_v58 }
 0x125   : > { %v997_v1 = vpop.f32.mrf.mxu0 }
 0x126   : > { %v775_v2 = vmax.f32 %v759_v63, 0.0  ;;  %v676_v3 = vadd.f32 %v1087_v48, %v996_v0 }
 0x127   : > { %v998_v4 = vpop.f32.mrf.mxu0 }
 0x128   : > { %791 = vst [vmem:[%s1397_s30 + $0x60] sm:$0xff] %v775_v2  ;;  %v760_v6 = vadd.f32 %v1390_v38, %v676_v3  ;;  %v999_v7 = vadd.f32 %v998_v4, %v997_v1 }
 0x129   : > { %v1000_v8 = vpop.f32.mrf.mxu0 }
 0x12a   : > { %v776_v9 = vmax.f32 %v760_v6, 0.0  ;;  %v681_v10 = vadd.f32 %v999_v7, %v680_v5 }
 0x12b   : > { %v1001_v11 = vpop.f32.mrf.mxu0 }
 0x12c   : > { %792 = vst [vmem:[%s1397_s30 + $0x68] sm:$0xff] %v776_v9  ;;  %v761_v12 = vadd.f32 %v1390_v38, %v681_v10  ;;  %v1002_v13 = vadd.f32 %v1001_v11, %v1000_v8 }
 0x12e   : > { %v777_v14 = vmax.f32 %v761_v12, 0.0  ;;  %v686_v15 = vadd.f32 %v1090_v62, %v1002_v13 }
 0x130   : > { %793 = vst [vmem:[%s1397_s30 + $0x70] sm:$0xff] %v777_v14  ;;  %v762_v16 = vadd.f32 %v1390_v38, %v686_v15 }
 0x132   : > { %v778_v17 = vmax.f32 %v762_v16, 0.0 }
 0x134   : > { %794 = vst [vmem:[%s1397_s30 + $0x78] sm:$0xff] %v778_v17 }
 0x135 PF: > { %s13_s14 = sadd.s32 1, %s1138_s14   ;;  %s1444_s12 = smov %s1134_s13 }
 0x136   : > { %p10_p5 = scmp.ge.s32.totalorder %s13_s14, 6   ;;  %s1445_s13 = smov %s1447_s15 }
 0x138   :  { %12 = sbr.rel (!%p10_p5) target bundleno = 2 (0x2), region = 76 }

// kernel: _lambda_.18
= control target key start
LH: loop header
LB: loop body
LE: loop exit
PB: predicated region body
PF: predicated region fallthrough
CT: control target
= control target key end

     0   :  { %s1016_s12 = smov 0   ;;  %s1018_s13 = smov 0   ;;  %s1188_s0 = inlined_call_operand.vmem [shape: f32[128,640], index: 0, kind: input, shape index: {}]   ;;  %s1189_s1 = inlined_call_operand.vmem [shape: f32[640,128], index: 1, kind: input, shape index: {}]   ;;  %s1190_s2 = inlined_call_operand.vmem [shape: f32[1,128], index: 2, kind: input, shape index: {}]   ;;  %s1191_s3 = inlined_call_operand.vmem [shape: f32[128,128], index: 3, kind: output, shape index: {}]  }
   0x1   :  { %s1020_s14 = smov 0   ;;  %s1022_s15 = smov 0  }
   0x2   :  { %s1024_s16 = smov 0  }
   0x3 LB: > { %s25_s17 = sadd.s32 1, %s989_s15  ;;  %p48_p1 = scmp.ne.s32.totalorder %s981_s13, %s977_s12  ;;  %s993_s16 = sphi %s1024_s16, %s13_s16   ;;  %s989_s15 = sphi %s1022_s15, %s1195_s15   ;;  %s985_s14 = sphi %s1020_s14, %s1194_s14   ;;  %s981_s13 = sphi %s1018_s13, %s1193_s13   ;;  %s977_s12 = sphi %s1016_s12, %s1192_s12  }
   0x4   : > { %p26_p0 = scmp.ge.s32.totalorder %s25_s17, 5  ;;  %p49_p2 = scmp.eq.s32.totalorder %s993_s16, 0 }
   0x5   : > { %s41_s19 = sadd.s32 1, %s981_s13  ;;  %p780_p5 = scmp.ge.s32.totalorder %s993_s16, 5 }
   0x6   : > { %s1197_s17 = smov (%p26_p0, %s25_s17), 0  ;;  %p50_p3 = por %p49_p2, %p48_p1 }
   0x7   : > { %s37_s18 = ssub.s32 %s989_s15, %s1197_s17  ;;  %162 = sbr.rel (%p780_p5) target bundleno = 24 (0x18), region = 20 }
   0x8   : > { %p39_p4 = scmp.eq.s32.totalorder %s37_s18, 0 }
   0xa   : > { %s1051_s20 = scalar_select %p39_p4, %s981_s13, %s41_s19  }
   0xc   : > { %165 = sbr.rel (!%p50_p3) target bundleno = 24 (0x18), region = 24  ;;  %s167_s21 = sand.u32 (%p50_p3), 1, %s981_s13  }
   0xd   : > { %s782_s22 = sshll.u32 (%p50_p3), %s989_s15, 3  ;;  %s781_s23 = sshll.u32 (%p50_p3), %s167_s21, 7 }
   0xe   : > { %s1059_s26 = scalar_lea.vmem (%p50_p3), %s1188_s0, %s782_s22  ;;  %s169_s27 = scalar_lea.vmem (%p50_p3), [#allocation3], %s781_s23 }
   0xf   : > { %v233_v0 = vld [vmem:[%s1059_s26] sm:$0xff] (%p50_p3)  ;;  %v235_v1 = vld [vmem:[%s1059_s26 + $0x28] sm:$0xff] (%p50_p3)  ;;  %v237_v2 = vld [vmem:[%s1059_s26 + $0x50] sm:$0xff] (%p50_p3) }
  0x10   : > { %234 = vst [vmem:[%s169_s27] sm:$0xff] (%p50_p3), %v233_v0  ;;  %236 = vst [vmem:[%s169_s27 + $0x8] sm:$0xff] (%p50_p3), %v235_v1  ;;  %v239_v3 = vld [vmem:[%s1059_s26 + $0x78] sm:$0xff] (%p50_p3)  ;;  %v241_v4 = vld [vmem:[%s1059_s26 + $0xa0] sm:$0xff] (%p50_p3) }
  0x11   : > { %238 = vst [vmem:[%s169_s27 + $0x10] sm:$0xff] %v237_v2  ;;  %v243_v5 = vld [vmem:[%s1059_s26 + $0xc8] sm:$0xff]  ;;  %240 = vst [vmem:[%s169_s27 + $0x18] sm:$0xff] %v239_v3  ;;  %v245_v6 = vld [vmem:[%s1059_s26 + $0xf0] sm:$0xff] }
  0x12   : > { %242 = vst [vmem:[%s169_s27 + $0x20] sm:$0xff] %v241_v4  ;;  %244 = vst [vmem:[%s169_s27 + $0x28] sm:$0xff] %v243_v5  ;;  %v247_v7 = vld [vmem:[%s1059_s26 + $0x118] sm:$0xff]  ;;  %v249_v8 = vld [vmem:[%s1059_s26 + $0x140] sm:$0xff] }
  0x13   : > { %246 = vst [vmem:[%s169_s27 + $0x30] sm:$0xff] %v245_v6  ;;  %248 = vst [vmem:[%s169_s27 + $0x38] sm:$0xff] %v247_v7  ;;  %v251_v9 = vld [vmem:[%s1059_s26 + $0x168] sm:$0xff]  ;;  %v253_v10 = vld [vmem:[%s1059_s26 + $0x190] sm:$0xff] }
  0x14   : > { %250 = vst [vmem:[%s169_s27 + $0x40] sm:$0xff] %v249_v8  ;;  %v255_v11 = vld [vmem:[%s1059_s26 + $0x1b8] sm:$0xff]  ;;  %252 = vst [vmem:[%s169_s27 + $0x48] sm:$0xff] %v251_v9  ;;  %v257_v12 = vld [vmem:[%s1059_s26 + $0x1e0] sm:$0xff] }
  0x15   : > { %254 = vst [vmem:[%s169_s27 + $0x50] sm:$0xff] %v253_v10  ;;  %256 = vst [vmem:[%s169_s27 + $0x58] sm:$0xff] %v255_v11  ;;  %v259_v13 = vld [vmem:[%s1059_s26 + $0x208] sm:$0xff]  ;;  %v261_v14 = vld [vmem:[%s1059_s26 + $0x230] sm:$0xff] }
  0x16   : > { %258 = vst [vmem:[%s169_s27 + $0x60] sm:$0xff] %v257_v12  ;;  %260 = vst [vmem:[%s169_s27 + $0x68] sm:$0xff] %v259_v13  ;;  %v263_v15 = vld [vmem:[%s1059_s26 + $0x258] sm:$0xff] }
  0x17   : > { %262 = vst [vmem:[%s169_s27 + $0x70] sm:$0xff] %v261_v14  ;;  %264 = vst [vmem:[%s169_s27 + $0x78] sm:$0xff] %v263_v15 }
  0x18 PF: > { %p783_p6 = scmp.ge.s32.totalorder %s993_s16, 1  ;;  %p281_p7 = scmp.lt.s32.totalorder %s993_s16, 6 }
  0x1a   : > { %p282_p8 = pnand %p783_p6, %p281_p7 }
  0x1b   : > { %s288_s28 = sand.u32 (!%p282_p8), 1, %s977_s12   ;;  %s785_s29 = sshll.u32 (!%p282_p8), %s985_s14, 4 }
  0x1c   : > { %285 = sbr.rel (%p282_p8) target bundleno = 304 (0x130), region = 66  ;;  %s784_s30 = sshll.u32 (!%p282_p8), %s288_s28, 7 }
  0x1d   : > { %p327_p9 = scmp.lt.s32.totalorder (!%p282_p8), %s785_s29, 79  ;;  %s1086_s8 = scalar_lea.vmem (!%p282_p8), [#allocation3], %s784_s30 }
  0x1e   : > { %p787_p10 = scmp.ne.s32.totalorder (!%p282_p8), %s985_s14, 0 }
  0x21   : > { %s1199_s29 = smov (!%p327_p9, %s785_s29), 79  ;;  %350 = sbr.rel (%p787_p10) target bundleno = 47 (0x2f), region = 74 }
  0x22   : > { %s786_s4 = sshll.u32 %s1199_s29, 3 }
  0x23   : > { %s1084_s7 = scalar_lea.vmem %s1189_s1, %s786_s4 }
  0x26   : > { %v995_v16 = vmov 0.0  }
  0x27   : > { %351 = vst [vmem:[#allocation2 + $0x30] sm:$0xff] %v995_v16  ;;  %352 = vst [vmem:[#allocation2] sm:$0xff] %v995_v16 }
  0x28   : > { %353 = vst [vmem:[#allocation2 + $0x58] sm:$0xff] %v995_v16  ;;  %354 = vst [vmem:[#allocation2 + $0x18] sm:$0xff] %v995_v16 }
  0x29   : > { %355 = vst [vmem:[#allocation2 + $0x50] sm:$0xff] %v995_v16  ;;  %356 = vst [vmem:[#allocation2 + $0x68] sm:$0xff] %v995_v16 }
  0x2a   : > { %357 = vst [vmem:[#allocation2 + $0x8] sm:$0xff] %v995_v16  ;;  %358 = vst [vmem:[#allocation2 + $0x48] sm:$0xff] %v995_v16 }
  0x2b   : > { %359 = vst [vmem:[#allocation2 + $0x40] sm:$0xff] %v995_v16  ;;  %360 = vst [vmem:[#allocation2 + $0x20] sm:$0xff] %v995_v16 }
  0x2c   : > { %361 = vst [vmem:[#allocation2 + $0x10] sm:$0xff] %v995_v16  ;;  %362 = vst [vmem:[#allocation2 + $0x38] sm:$0xff] %v995_v16 }
  0x2d   : > { %363 = vst [vmem:[#allocation2 + $0x60] sm:$0xff] %v995_v16  ;;  %364 = vst [vmem:[#allocation2 + $0x70] sm:$0xff] %v995_v16 }
  0x2e   : > { %365 = vst [vmem:[#allocation2 + $0x78] sm:$0xff] %v995_v16  ;;  %366 = vst [vmem:[#allocation2 + $0x28] sm:$0xff] %v995_v16 }
  0x2f PF: > { %v414_v17 = vld [vmem:[%s1084_s7 + $0x78] sm:$0xff]  ;;  %v413_v18 = vld [vmem:[%s1084_s7 + $0x70] sm:$0xff]  ;;  %v412_v19 = vld [vmem:[%s1084_s7 + $0x68] sm:$0xff]  ;;  %p788_p11 = scmp.ne.s32.totalorder %s985_s14, 4 }
  0x30   : > { %826 = vmatprep.subr.mxu0 %v414_v17  ;;  %882 = vmatprep.subr.mxu1 %v414_v17  ;;  %v411_v20 = vld [vmem:[%s1084_s7 + $0x60] sm:$0xff]  ;;  %v410_v21 = vld [vmem:[%s1084_s7 + $0x58] sm:$0xff]  ;;  %v409_v22 = vld [vmem:[%s1084_s7 + $0x50] sm:$0xff] }
  0x31   : > { %827 = vmatpush3.msra.mxu0 %v414_v17  ;;  %898 = vmatpush3.msra.mxu1 %v414_v17  ;;  %v408_v23 = vld [vmem:[%s1084_s7 + $0x48] sm:$0xff]  ;;  %v407_v24 = vld [vmem:[%s1084_s7 + $0x40] sm:$0xff]  ;;  %v406_v25 = vld [vmem:[%s1084_s7 + $0x38] sm:$0xff] }
  0x32   : > { %828 = vmatprep.subr.mxu0 %v413_v18  ;;  %883 = vmatprep.subr.mxu1 %v413_v18  ;;  %v405_v26 = vld [vmem:[%s1084_s7 + $0x30] sm:$0xff]  ;;  %v404_v27 = vld [vmem:[%s1084_s7 + $0x28] sm:$0xff]  ;;  %v403_v28 = vld [vmem:[%s1084_s7 + $0x20] sm:$0xff] }
  0x33   : > { %829 = vmatpush3.msra.mxu0 %v413_v18  ;;  %899 = vmatpush3.msra.mxu1 %v413_v18  ;;  %v402_v29 = vld [vmem:[%s1084_s7 + $0x18] sm:$0xff]  ;;  %v401_v30 = vld [vmem:[%s1084_s7 + $0x10] sm:$0xff]  ;;  %v400_v31 = vld [vmem:[%s1084_s7 + $0x8] sm:$0xff] }
  0x34   : > { %830 = vmatprep.subr.mxu0 %v412_v19  ;;  %884 = vmatprep.subr.mxu1 %v412_v19  ;;  %v399_v32 = vld [vmem:[%s1084_s7] sm:$0xff]  ;;  %v384_v35 = vld [vmem:[%s1086_s8 + $0x8] sm:$0xff]  ;;  %v385_v37 = vld [vmem:[%s1086_s8 + $0x10] sm:$0xff] }
  0x35   : > { %831 = vmatpush3.msra.mxu0 %v412_v19  ;;  %900 = vmatpush3.msra.mxu1 %v412_v19  ;;  %v383_v33 = vld [vmem:[%s1086_s8] sm:$0xff]  ;;  %v392_v36 = vld [vmem:[%s1086_s8 + $0x48] sm:$0xff]  ;;  %v393_v38 = vld [vmem:[%s1086_s8 + $0x50] sm:$0xff] }
  0x36   : > { %832 = vmatprep.subr.mxu0 %v411_v20  ;;  %885 = vmatprep.subr.mxu1 %v411_v20  ;;  %v391_v34 = vld [vmem:[%s1086_s8 + $0x40] sm:$0xff]  ;;  %v386_v39 = vld [vmem:[%s1086_s8 + $0x18] sm:$0xff]  ;;  %v388_v43 = vld [vmem:[%s1086_s8 + $0x28] sm:$0xff] }
  0x37   : > { %833 = vmatpush3.msra.mxu0 %v411_v20  ;;  %901 = vmatpush3.msra.mxu1 %v411_v20  ;;  %v394_v40 = vld [vmem:[%s1086_s8 + $0x58] sm:$0xff]  ;;  %v387_v41 = vld [vmem:[%s1086_s8 + $0x20] sm:$0xff]  ;;  %v396_v44 = vld [vmem:[%s1086_s8 + $0x68] sm:$0xff] }
  0x38   : > { %834 = vmatprep.subr.mxu0 %v410_v21  ;;  %886 = vmatprep.subr.mxu1 %v410_v21  ;;  %v395_v42 = vld [vmem:[%s1086_s8 + $0x60] sm:$0xff]  ;;  %v389_v45 = vld [vmem:[%s1086_s8 + $0x30] sm:$0xff]  ;;  %v390_v47 = vld [vmem:[%s1086_s8 + $0x38] sm:$0xff] }
  0x39   : > { %835 = vmatpush3.msra.mxu0 %v410_v21  ;;  %902 = vmatpush3.msra.mxu1 %v410_v21  ;;  %v397_v46 = vld [vmem:[%s1086_s8 + $0x70] sm:$0xff]  ;;  %v398_v48 = vld [vmem:[%s1086_s8 + $0x78] sm:$0xff]  ;;  %v368_v49 = vld [vmem:[#allocation2] sm:$0xff] }
  0x3a   : > { %836 = vmatprep.subr.mxu0 %v409_v22  ;;  %887 = vmatprep.subr.mxu1 %v409_v22  ;;  %v376_v50 = vld [vmem:[#allocation2 + $0x20] sm:$0xff]  ;;  %v367_v53 = vld [vmem:[#allocation2 + $0x30] sm:$0xff]  ;;  %v370_v59 = vld [vmem:[#allocation2 + $0x18] sm:$0xff] }
  0x3b   : > { %837 = vmatpush3.msra.mxu0 %v409_v22  ;;  %903 = vmatpush3.msra.mxu1 %v409_v22  ;;  %v375_v54 = vld [vmem:[#allocation2 + $0x40] sm:$0xff]  ;;  %v378_v60 = vld [vmem:[#allocation2 + $0x38] sm:$0xff]  ;;  %v377_v2 = vld [vmem:[#allocation2 + $0x10] sm:$0xff] }
  0x3c   : > { %838 = vmatprep.subr.mxu0 %v408_v23  ;;  %888 = vmatprep.subr.mxu1 %v408_v23  ;;  %v369_v1 = vld [vmem:[#allocation2 + $0x58] sm:$0xff]  ;;  %v372_v7 = vld [vmem:[#allocation2 + $0x68] sm:$0xff]  ;;  %v380_v8 = vld [vmem:[#allocation2 + $0x70] sm:$0xff] }
  0x3d   : > { %839 = vmatpush3.msra.mxu0 %v408_v23  ;;  %904 = vmatpush3.msra.mxu1 %v408_v23  ;;  %v371_v13 = vld [vmem:[#allocation2 + $0x50] sm:$0xff]  ;;  %v379_v14 = vld [vmem:[#allocation2 + $0x60] sm:$0xff]  ;;  %v374_v19 = vld [vmem:[#allocation2 + $0x48] sm:$0xff] }
  0x3e   : > { %840 = vmatprep.subr.mxu0 %v407_v24  ;;  %889 = vmatprep.subr.mxu1 %v407_v24  ;;  %v382_v20 = vld [vmem:[#allocation2 + $0x28] sm:$0xff] }
  0x3f   : > { %841 = vmatpush3.msra.mxu0 %v407_v24  ;;  %905 = vmatpush3.msra.mxu1 %v407_v24 }
  0x40   : > { %842 = vmatprep.subr.mxu0 %v406_v25  ;;  %890 = vmatprep.subr.mxu1 %v406_v25 }
  0x41   : > { %843 = vmatpush3.msra.mxu0 %v406_v25  ;;  %906 = vmatpush3.msra.mxu1 %v406_v25  ;;  %v373_v25 = vld [vmem:[#allocation2 + $0x8] sm:$0xff] }
  0x42   : > { %844 = vmatprep.subr.mxu0 %v405_v26  ;;  %891 = vmatprep.subr.mxu1 %v405_v26 }
  0x43   : > { %845 = vmatpush3.msra.mxu0 %v405_v26  ;;  %907 = vmatpush3.msra.mxu1 %v405_v26  ;;  %v381_v26 = vld [vmem:[#allocation2 + $0x78] sm:$0xff] }
  0x44   : > { %846 = vmatprep.subr.mxu0 %v404_v27  ;;  %892 = vmatprep.subr.mxu1 %v404_v27 }
  0x45   : > { %847 = vmatpush3.msra.mxu0 %v404_v27  ;;  %908 = vmatpush3.msra.mxu1 %v404_v27 }
  0x46   : > { %848 = vmatprep.subr.mxu0 %v403_v28  ;;  %893 = vmatprep.subr.mxu1 %v403_v28 }
  0x47   : > { %849 = vmatpush3.msra.mxu0 %v403_v28  ;;  %909 = vmatpush3.msra.mxu1 %v403_v28 }
  0x48   : > { %850 = vmatprep.subr.mxu0 %v402_v29  ;;  %894 = vmatprep.subr.mxu1 %v402_v29 }
  0x49   : > { %851 = vmatpush3.msra.mxu0 %v402_v29  ;;  %910 = vmatpush3.msra.mxu1 %v402_v29 }
  0x4a   : > { %852 = vmatprep.subr.mxu0 %v401_v30  ;;  %895 = vmatprep.subr.mxu1 %v401_v30 }
  0x4b   : > { %853 = vmatpush3.msra.mxu0 %v401_v30  ;;  %911 = vmatpush3.msra.mxu1 %v401_v30 }
  0x4c   : > { %854 = vmatprep.subr.mxu0 %v400_v31  ;;  %896 = vmatprep.subr.mxu1 %v400_v31 }
  0x4d   : > { %855 = vmatpush3.msra.mxu0 %v400_v31  ;;  %912 = vmatpush3.msra.mxu1 %v400_v31 }
  0x4e   : > { %856 = vmatprep.subr.mxu0 %v399_v32  ;;  %897 = vmatprep.subr.mxu1 %v399_v32 }
  0x4f   : > { %857 = vmatpush3.msra.mxu0 %v399_v32  ;;  %913 = vmatpush3.msra.mxu1 %v399_v32 }
  0x50   : > { %858 = vmatprep.mubr.f32.mxu0 %v383_v33  ;;  %870 = vmatprep.mubr.f32.mxu1 %v391_v34 }
  0x51   : > { %859 = vmatmul.mubr.f32.vlgmr.msra.gmra.mxu0 %v384_v35  ;;  %871 = vmatmul.mubr.f32.vlgmr.msra.gmra.mxu1 %v392_v36 }
  0x52   : > { %861 = vmatprep.mubr.f32.mxu0 %v385_v37  ;;  %873 = vmatprep.mubr.f32.mxu1 %v393_v38 }
  0x55   : > { %862 = vmatmul.mubr.f32.gmra.mxu0 %v386_v39  ;;  %874 = vmatmul.mubr.f32.gmra.mxu1 %v394_v40 }
  0x56   : > { %864 = vmatprep.mubr.f32.mxu0 %v387_v41  ;;  %876 = vmatprep.mubr.f32.mxu1 %v395_v42 }
  0x59   : > { %865 = vmatmul.mubr.f32.gmra.mxu0 %v388_v43  ;;  %877 = vmatmul.mubr.f32.gmra.mxu1 %v396_v44 }
  0x5a   : > { %867 = vmatprep.mubr.f32.mxu0 %v389_v45  ;;  %879 = vmatprep.mubr.f32.mxu1 %v397_v46 }
  0x5d   : > { %868 = vmatmul.mubr.f32.gmra.mxu0 %v390_v47  ;;  %880 = vmatmul.mubr.f32.gmra.mxu1 %v398_v48 }
 0x111   : > { %v860_v51 = vpop.f32.mrf.mxu0  ;;  %v872_v52 = vpop.f32.mrf.mxu1 }
 0x112   : > { %v561_v55 = vadd.f32 %v860_v51, %v368_v49  ;;  %v569_v56 = vadd.f32 %v872_v52, %v376_v50 }
 0x113   : > { %v481_v57 = vpop.f32.mrf.mxu0  ;;  %v521_v58 = vpop.f32.mrf.mxu1 }
 0x114   : > { %577 = vst [vmem:[#allocation2] sm:$0xff] %v561_v55  ;;  %585 = vst [vmem:[#allocation2 + $0x20] sm:$0xff] %v569_v56  ;;  %v560_v61 = vadd.f32 %v481_v57, %v367_v53  ;;  %v568_v62 = vadd.f32 %v521_v58, %v375_v54 }
 0x115   : > { %v863_v63 = vpop.f32.mrf.mxu0  ;;  %v875_v0 = vpop.f32.mrf.mxu1 }
 0x116   : > { %576 = vst [vmem:[#allocation2 + $0x30] sm:$0xff] %v560_v61  ;;  %584 = vst [vmem:[#allocation2 + $0x40] sm:$0xff] %v568_v62  ;;  %v563_v3 = vadd.f32 %v863_v63, %v370_v59  ;;  %v571_v4 = vadd.f32 %v875_v0, %v378_v60 }
 0x117   : > { %v491_v5 = vpop.f32.mrf.mxu0  ;;  %v531_v6 = vpop.f32.mrf.mxu1 }
 0x118   : > { %579 = vst [vmem:[#allocation2 + $0x18] sm:$0xff] %v563_v3  ;;  %587 = vst [vmem:[#allocation2 + $0x38] sm:$0xff] %v571_v4  ;;  %v562_v9 = vadd.f32 %v491_v5, %v369_v1  ;;  %v570_v10 = vadd.f32 %v531_v6, %v377_v2 }
 0x119   : > { %v866_v11 = vpop.f32.mrf.mxu0  ;;  %v878_v12 = vpop.f32.mrf.mxu1 }
 0x11a   : > { %578 = vst [vmem:[#allocation2 + $0x58] sm:$0xff] %v562_v9  ;;  %586 = vst [vmem:[#allocation2 + $0x10] sm:$0xff] %v570_v10  ;;  %v565_v15 = vadd.f32 %v866_v11, %v372_v7  ;;  %v573_v16 = vadd.f32 %v878_v12, %v380_v8 }
 0x11b   : > { %v501_v17 = vpop.f32.mrf.mxu0  ;;  %v541_v18 = vpop.f32.mrf.mxu1 }
 0x11c   : > { %581 = vst [vmem:[#allocation2 + $0x68] sm:$0xff] %v565_v15  ;;  %589 = vst [vmem:[#allocation2 + $0x70] sm:$0xff] %v573_v16  ;;  %v564_v21 = vadd.f32 %v501_v17, %v371_v13  ;;  %v572_v22 = vadd.f32 %v541_v18, %v379_v14 }
 0x11d   : > { %v869_v23 = vpop.f32.mrf.mxu0  ;;  %v881_v24 = vpop.f32.mrf.mxu1 }
 0x11e   : > { %580 = vst [vmem:[#allocation2 + $0x50] sm:$0xff] %v564_v21  ;;  %588 = vst [vmem:[#allocation2 + $0x60] sm:$0xff] %v572_v22  ;;  %v567_v27 = vadd.f32 %v869_v23, %v374_v19  ;;  %v575_v28 = vadd.f32 %v881_v24, %v382_v20  ;;  %595 = sbr.rel (%p788_p11) target bundleno = 304 (0x130), region = 78 }
 0x11f   : > { %v511_v29 = vpop.f32.mrf.mxu0  ;;  %v551_v30 = vpop.f32.mrf.mxu1 }
 0x120   : > { %583 = vst [vmem:[#allocation2 + $0x48] sm:$0xff] %v567_v27  ;;  %591 = vst [vmem:[#allocation2 + $0x28] sm:$0xff] %v575_v28  ;;  %v566_v31 = vadd.f32 %v511_v29, %v373_v25  ;;  %v574_v32 = vadd.f32 %v551_v30, %v381_v26 }
 0x122   : > { %582 = vst [vmem:[#allocation2 + $0x8] sm:$0xff] %v566_v31  ;;  %590 = vst [vmem:[#allocation2 + $0x78] sm:$0xff] %v574_v32 }
 0x123   : > { %v596_v33 = vld [vmem:[#allocation2 + $0x30] sm:$0xff]  ;;  %v789_v34 = vld [vmem:[%s1190_s2] ss:$0 sm:$0xff]  ;;  %v598_v38 = vld [vmem:[#allocation2 + $0x58] sm:$0xff] }
 0x124   : > { %v597_v35 = vld [vmem:[#allocation2] sm:$0xff]  ;;  %v619_v36 = vadd.f32 %v789_v34, %v596_v33  ;;  %v599_v39 = vld [vmem:[#allocation2 + $0x18] sm:$0xff]  ;;  %v621_v41 = vadd.f32 %v789_v34, %v598_v38  ;;  %v601_v44 = vld [vmem:[#allocation2 + $0x68] sm:$0xff] }
 0x125   : > { %v620_v37 = vadd.f32 %v789_v34, %v597_v35  ;;  %v600_v40 = vld [vmem:[#allocation2 + $0x50] sm:$0xff]  ;;  %v622_v42 = vadd.f32 %v789_v34, %v599_v39  ;;  %v624_v49 = vadd.f32 %v789_v34, %v601_v44  ;;  %v604_v51 = vld [vmem:[#allocation2 + $0x40] sm:$0xff]  ;;  %v607_v58 = vld [vmem:[#allocation2 + $0x38] sm:$0xff] }
 0x126   : > { %v623_v43 = vadd.f32 %v789_v34, %v600_v40  ;;  %v635_v47 = vmax.f32 %v619_v36, 0.0  ;;  %v605_v52 = vld [vmem:[#allocation2 + $0x20] sm:$0xff]  ;;  %v606_v53 = vld [vmem:[#allocation2 + $0x10] sm:$0xff]  ;;  %v637_v54 = vmax.f32 %v621_v41, 0.0  ;;  %v627_v63 = vadd.f32 %v789_v34, %v604_v51 }
 0x127   : > { %v603_v46 = vld [vmem:[#allocation2 + $0x48] sm:$0xff]  ;;  %v636_v48 = vmax.f32 %v620_v37, 0.0  ;;  %v638_v55 = vmax.f32 %v622_v42, 0.0  ;;  %v608_v59 = vld [vmem:[#allocation2 + $0x60] sm:$0xff]  ;;  %v609_v60 = vld [vmem:[#allocation2 + $0x70] sm:$0xff]  ;;  %v640_v61 = vmax.f32 %v624_v49, 0.0  ;;  %v628_v0 = vadd.f32 %v789_v34, %v605_v52 }
 0x128   : > { %v639_v56 = vmax.f32 %v623_v43, 0.0  ;;  %v626_v57 = vadd.f32 %v789_v34, %v603_v46  ;;  %651 = vst [vmem:[%s1191_s3] sm:$0xff] %v635_v47  ;;  %v611_v2 = vld [vmem:[#allocation2 + $0x28] sm:$0xff]  ;;  %653 = vst [vmem:[%s1191_s3 + $0x10] sm:$0xff] %v637_v54  ;;  %v629_v4 = vadd.f32 %v789_v34, %v606_v53  ;;  %v630_v5 = vadd.f32 %v789_v34, %v607_v58 }
 0x129   : > { %v602_v45 = vld [vmem:[#allocation2 + $0x8] sm:$0xff]  ;;  %652 = vst [vmem:[%s1191_s3 + $0x8] sm:$0xff] %v636_v48  ;;  %v610_v1 = vld [vmem:[#allocation2 + $0x78] sm:$0xff]  ;;  %654 = vst [vmem:[%s1191_s3 + $0x18] sm:$0xff] %v638_v55  ;;  %v631_v6 = vadd.f32 %v789_v34, %v608_v59  ;;  %v643_v7 = vmax.f32 %v627_v63, 0.0  ;;  %v644_v8 = vmax.f32 %v628_v0, 0.0  ;;  %v632_v9 = vadd.f32 %v789_v34, %v609_v60 }
 0x12a   : > { %v625_v50 = vadd.f32 %v789_v34, %v602_v45  ;;  %655 = vst [vmem:[%s1191_s3 + $0x20] sm:$0xff] %v639_v56  ;;  %v642_v3 = vmax.f32 %v626_v57, 0.0  ;;  %656 = vst [vmem:[%s1191_s3 + $0x28] sm:$0xff] %v640_v61  ;;  %v633_v10 = vadd.f32 %v789_v34, %v610_v1  ;;  %v645_v11 = vmax.f32 %v629_v4, 0.0 }
 0x12b   : > { %v646_v12 = vmax.f32 %v630_v5, 0.0  ;;  %v647_v13 = vmax.f32 %v631_v6, 0.0  ;;  %v634_v14 = vadd.f32 %v789_v34, %v611_v2  ;;  %659 = vst [vmem:[%s1191_s3 + $0x40] sm:$0xff] %v643_v7  ;;  %660 = vst [vmem:[%s1191_s3 + $0x48] sm:$0xff] %v644_v8  ;;  %v648_v15 = vmax.f32 %v632_v9, 0.0 }
 0x12c   : > { %v641_v62 = vmax.f32 %v625_v50, 0.0  ;;  %658 = vst [vmem:[%s1191_s3 + $0x38] sm:$0xff] %v642_v3  ;;  %v649_v16 = vmax.f32 %v633_v10, 0.0  ;;  %661 = vst [vmem:[%s1191_s3 + $0x50] sm:$0xff] %v645_v11 }
 0x12d   : > { %662 = vst [vmem:[%s1191_s3 + $0x58] sm:$0xff] %v646_v12  ;;  %663 = vst [vmem:[%s1191_s3 + $0x60] sm:$0xff] %v647_v13  ;;  %v650_v17 = vmax.f32 %v634_v14, 0.0 }
 0x12e   : > { %657 = vst [vmem:[%s1191_s3 + $0x30] sm:$0xff] %v641_v62  ;;  %664 = vst [vmem:[%s1191_s3 + $0x68] sm:$0xff] %v648_v15 }
 0x12f   : > { %665 = vst [vmem:[%s1191_s3 + $0x70] sm:$0xff] %v649_v16  ;;  %666 = vst [vmem:[%s1191_s3 + $0x78] sm:$0xff] %v650_v17 }
 0x130 PF: > { %s13_s16 = sadd.s32 1, %s993_s16   ;;  %s1192_s12 = smov %s981_s13 }
 0x131   : > { %p10_p12 = scmp.ge.s32.totalorder %s13_s16, 7   ;;  %s1193_s13 = smov %s1051_s20 }
 0x132   : > { %s1194_s14 = smov %s989_s15  ;;  %s1195_s15 = smov %s1197_s17 }
 0x133   :  { %12 = sbr.rel (!%p10_p12) target bundleno = 3 (0x3), region = 119 }

// kernel: _lambda_.19
= control target key start
LH: loop header
LB: loop body
LE: loop exit
PB: predicated region body
PF: predicated region fallthrough
CT: control target
= control target key end

     0   :  { %s337_s6 = smov 0   ;;  %s448_s0 = inlined_call_operand.vmem [shape: f32[16,2,17,64], index: 0, kind: input, shape index: {}]   ;;  %s449_s1 = inlined_call_operand.vmem [shape: f32[14,17,64], index: 1, kind: output, shape index: {}]  }
   0x1 LB: > { %s299_s7 = sadd.s32 4294967295, %s325_s6   ;;  %p303_p0 = scmp.ge.s32.totalorder %s325_s6, 1  ;;  %s325_s6 = sphi %s337_s6, %s11_s6  }
   0x2   : > { %p89_p1 = scmp.lt.s32.totalorder %s325_s6, 3 }
   0x4   : > { %p90_p2 = pnand %p303_p0, %p89_p1 }
   0x5   : > { %s304_s8 = sshll.u32 (!%p90_p2), %s299_s7, 3  ;;  %s118_s9 = smul.u32 (!%p90_p2), 7, %s299_s7 }
   0x6   : > { %93 = sbr.rel (%p90_p2) target bundleno = 37 (0x25), region = 24  ;;  %p112_p3 = scmp.lt.s32.totalorder (!%p90_p2), %s304_s8, 15 }
   0x7   : > { %p119_p4 = scmp.lt.s32.totalorder (!%p90_p2), %s118_s9, 13 }
   0xb   : > { %s451_s8 = smov (!%p112_p3, %s304_s8), 15  ;;  %s453_s9 = smov (!%p119_p4, %s118_s9), 13  ;;  %vm218_vm0 = vcmask 523264   ;;  %vm221_vm1 = vcmask 516096  }
   0xc   : > { %s309_s10 = smul.u32 48, %s451_s8 }
   0xd   : > { %s310_s14 = smul.u32 24, %s453_s9 }
   0xe   : > { %s348_s13 = scalar_lea.vmem %s448_s0, %s309_s10 }
   0xf   : > { %v125_v0 = vld [vmem:[%s348_s13] sm:$0xff]  ;;  %v128_v1 = vld [vmem:[%s348_s13 + $0x18] sm:$0xff]  ;;  %v131_v2 = vld [vmem:[%s348_s13 + $0x30] sm:$0xff]  ;;  %s362_s17 = scalar_lea.vmem %s449_s1, %s310_s14 }
  0x10   : > { %v134_v3 = vld [vmem:[%s348_s13 + $0x48] sm:$0xff]  ;;  %v173_v4 = vmax.f32 %v125_v0, %v128_v1  ;;  %v129_v6 = vld [vmem:[%s348_s13 + $0x20] sm:$0xff]  ;;  %v132_v8 = vld [vmem:[%s348_s13 + $0x38] sm:$0xff] }
  0x11   : > { %v126_v5 = vld [vmem:[%s348_s13 + $0x8] sm:$0xff]  ;;  %v176_v7 = vmax.f32 %v131_v2, %v134_v3  ;;  %v135_v9 = vld [vmem:[%s348_s13 + $0x50] sm:$0xff]  ;;  %v133_v14 = vld [vmem:[%s348_s13 + $0x40] sm:$0x1] }
  0x12   : > { %v174_v10 = vmax.f32 %v126_v5, %v129_v6  ;;  %v127_v11 = vld [vmem:[%s348_s13 + $0x10] sm:$0x1]  ;;  %v177_v12 = vmax.f32 %v132_v8, %v135_v9  ;;  %v130_v13 = vld [vmem:[%s348_s13 + $0x28] sm:$0x1]  ;;  %v136_v15 = vld [vmem:[%s348_s13 + $0x58] sm:$0x1] }
  0x13   : > { %v197_v16 = vmax.f32 %v173_v4, %v176_v7  ;;  %v175_v17 = vmax.f32 %v127_v11, %v130_v13  ;;  %v178_v18 = vmax.f32 %v133_v14, %v136_v15  ;;  %v137_v19 = vld [vmem:[%s348_s13 + $0x60] sm:$0xff]  ;;  %v140_v20 = vld [vmem:[%s348_s13 + $0x78] sm:$0xff]  ;;  %v138_v21 = vld [vmem:[%s348_s13 + $0x68] sm:$0xff] }
  0x14   : > { %v198_v22 = vmax.f32 %v174_v10, %v177_v12  ;;  %v179_v23 = vmax.f32 %v137_v19, %v140_v20  ;;  %v141_v24 = vld [vmem:[%s348_s13 + $0x80] sm:$0xff]  ;;  %v139_v25 = vld [vmem:[%s348_s13 + $0x70] sm:$0x1]  ;;  %v142_v26 = vld [vmem:[%s348_s13 + $0x88] sm:$0x1] }
  0x15   : > { %219 = vst.msk [vmem:[%s362_s17] sm:$0xff] %vm218_vm0, %v197_v16  ;;  %v199_v27 = vmax.f32 %v175_v17, %v178_v18  ;;  %v180_v28 = vmax.f32 %v138_v21, %v141_v24  ;;  %v181_v29 = vmax.f32 %v139_v25, %v142_v26  ;;  %v143_v30 = vld [vmem:[%s348_s13 + $0x90] sm:$0xff]  ;;  %v146_v31 = vld [vmem:[%s348_s13 + $0xa8] sm:$0xff]  ;;  %v144_v32 = vld [vmem:[%s348_s13 + $0x98] sm:$0xff] }
  0x16   : > { %220 = vst.msk [vmem:[%s362_s17 + $0x8] sm:$0xff] %vm218_vm0, %v198_v22  ;;  %v200_v33 = vmax.f32 %v176_v7, %v179_v23  ;;  %v182_v34 = vmax.f32 %v143_v30, %v146_v31  ;;  %v147_v35 = vld [vmem:[%s348_s13 + $0xb0] sm:$0xff]  ;;  %v145_v36 = vld [vmem:[%s348_s13 + $0xa0] sm:$0x1]  ;;  %v148_v37 = vld [vmem:[%s348_s13 + $0xb8] sm:$0x1] }
  0x17   : > { %222 = vst.msk [vmem:[%s362_s17 + $0x10] sm:$0x1] %vm221_vm1, %v199_v27  ;;  %v201_v38 = vmax.f32 %v177_v12, %v180_v28  ;;  %v202_v39 = vmax.f32 %v178_v18, %v181_v29  ;;  %v183_v40 = vmax.f32 %v144_v32, %v147_v35  ;;  %v184_v41 = vmax.f32 %v145_v36, %v148_v37  ;;  %v149_v42 = vld [vmem:[%s348_s13 + $0xc0] sm:$0xff]  ;;  %v152_v43 = vld [vmem:[%s348_s13 + $0xd8] sm:$0xff]  ;;  %v150_v44 = vld [vmem:[%s348_s13 + $0xc8] sm:$0xff] }
  0x18   : > { %223 = vst.msk [vmem:[%s362_s17 + $0x18] sm:$0xff] %vm218_vm0, %v200_v33  ;;  %v203_v45 = vmax.f32 %v179_v23, %v182_v34  ;;  %v185_v46 = vmax.f32 %v149_v42, %v152_v43  ;;  %v153_v47 = vld [vmem:[%s348_s13 + $0xe0] sm:$0xff]  ;;  %v151_v48 = vld [vmem:[%s348_s13 + $0xd0] sm:$0x1]  ;;  %v154_v49 = vld [vmem:[%s348_s13 + $0xe8] sm:$0x1] }
  0x19   : > { %224 = vst.msk [vmem:[%s362_s17 + $0x20] sm:$0xff] %vm218_vm0, %v201_v38  ;;  %v204_v50 = vmax.f32 %v180_v28, %v183_v40  ;;  %v205_v51 = vmax.f32 %v181_v29, %v184_v41  ;;  %v186_v52 = vmax.f32 %v150_v44, %v153_v47  ;;  %v187_v53 = vmax.f32 %v151_v48, %v154_v49  ;;  %v155_v54 = vld [vmem:[%s348_s13 + $0xf0] sm:$0xff]  ;;  %v158_v55 = vld [vmem:[%s348_s13 + $0x108] sm:$0xff]  ;;  %v156_v56 = vld [vmem:[%s348_s13 + $0xf8] sm:$0xff] }
  0x1a   : > { %225 = vst.msk [vmem:[%s362_s17 + $0x28] sm:$0x1] %vm221_vm1, %v202_v39  ;;  %v206_v57 = vmax.f32 %v182_v34, %v185_v46  ;;  %v188_v58 = vmax.f32 %v155_v54, %v158_v55  ;;  %v159_v59 = vld [vmem:[%s348_s13 + $0x110] sm:$0xff]  ;;  %v157_v60 = vld [vmem:[%s348_s13 + $0x100] sm:$0x1]  ;;  %v164_v3 = vld [vmem:[%s348_s13 + $0x138] sm:$0xff] }
  0x1b   : > { %226 = vst.msk [vmem:[%s362_s17 + $0x30] sm:$0xff] %vm218_vm0, %v203_v45  ;;  %v160_v61 = vld [vmem:[%s348_s13 + $0x118] sm:$0x1]  ;;  %227 = vst.msk [vmem:[%s362_s17 + $0x38] sm:$0xff] %vm218_vm0, %v204_v50  ;;  %v207_v62 = vmax.f32 %v183_v40, %v186_v52  ;;  %v208_v63 = vmax.f32 %v184_v41, %v187_v53  ;;  %v189_v0 = vmax.f32 %v156_v56, %v159_v59  ;;  %v161_v2 = vld [vmem:[%s348_s13 + $0x120] sm:$0xff] }
  0x1c   : > { %228 = vst.msk [vmem:[%s362_s17 + $0x40] sm:$0x1] %vm221_vm1, %v205_v51  ;;  %v190_v1 = vmax.f32 %v157_v60, %v160_v61  ;;  %v162_v4 = vld [vmem:[%s348_s13 + $0x128] sm:$0xff]  ;;  %v209_v5 = vmax.f32 %v185_v46, %v188_v58  ;;  %v191_v6 = vmax.f32 %v161_v2, %v164_v3  ;;  %v165_v7 = vld [vmem:[%s348_s13 + $0x140] sm:$0xff]  ;;  %v163_v8 = vld [vmem:[%s348_s13 + $0x130] sm:$0x1] }
  0x1d   : > { %229 = vst.msk [vmem:[%s362_s17 + $0x48] sm:$0xff] %vm218_vm0, %v206_v57  ;;  %v166_v9 = vld [vmem:[%s348_s13 + $0x148] sm:$0x1]  ;;  %230 = vst.msk [vmem:[%s362_s17 + $0x50] sm:$0xff] %vm218_vm0, %v207_v62  ;;  %v210_v10 = vmax.f32 %v186_v52, %v189_v0  ;;  %v192_v12 = vmax.f32 %v162_v4, %v165_v7  ;;  %v167_v14 = vld [vmem:[%s348_s13 + $0x150] sm:$0xff] }
  0x1e   : > { %231 = vst.msk [vmem:[%s362_s17 + $0x58] sm:$0x1] %vm221_vm1, %v208_v63  ;;  %v211_v11 = vmax.f32 %v187_v53, %v190_v1  ;;  %v193_v13 = vmax.f32 %v163_v8, %v166_v9  ;;  %v170_v15 = vld [vmem:[%s348_s13 + $0x168] sm:$0xff]  ;;  %v168_v16 = vld [vmem:[%s348_s13 + $0x158] sm:$0xff]  ;;  %v212_v17 = vmax.f32 %v188_v58, %v191_v6  ;;  %v171_v19 = vld [vmem:[%s348_s13 + $0x170] sm:$0xff] }
  0x1f   : > { %232 = vst.msk [vmem:[%s362_s17 + $0x60] sm:$0xff] %vm218_vm0, %v209_v5  ;;  %v194_v18 = vmax.f32 %v167_v14, %v170_v15  ;;  %v169_v20 = vld [vmem:[%s348_s13 + $0x160] sm:$0x1]  ;;  %v172_v21 = vld [vmem:[%s348_s13 + $0x178] sm:$0x1]  ;;  %233 = vst.msk [vmem:[%s362_s17 + $0x68] sm:$0xff] %vm218_vm0, %v210_v10  ;;  %v213_v22 = vmax.f32 %v189_v0, %v192_v12  ;;  %v195_v24 = vmax.f32 %v168_v16, %v171_v19 }
  0x20   : > { %234 = vst.msk [vmem:[%s362_s17 + $0x70] sm:$0x1] %vm221_vm1, %v211_v11  ;;  %v214_v23 = vmax.f32 %v190_v1, %v193_v13  ;;  %v196_v25 = vmax.f32 %v169_v20, %v172_v21 }
  0x21   : > { %235 = vst.msk [vmem:[%s362_s17 + $0x78] sm:$0xff] %vm218_vm0, %v212_v17  ;;  %v215_v26 = vmax.f32 %v191_v6, %v194_v18  ;;  %236 = vst.msk [vmem:[%s362_s17 + $0x80] sm:$0xff] %vm218_vm0, %v213_v22  ;;  %v216_v27 = vmax.f32 %v192_v12, %v195_v24 }
  0x22   : > { %237 = vst.msk [vmem:[%s362_s17 + $0x88] sm:$0x1] %vm221_vm1, %v214_v23  ;;  %v217_v28 = vmax.f32 %v193_v13, %v196_v25 }
  0x23   : > { %238 = vst.msk [vmem:[%s362_s17 + $0x90] sm:$0xff] %vm218_vm0, %v215_v26  ;;  %239 = vst.msk [vmem:[%s362_s17 + $0x98] sm:$0xff] %vm218_vm0, %v216_v27 }
  0x24   : > { %240 = vst.msk [vmem:[%s362_s17 + $0xa0] sm:$0x1] %vm221_vm1, %v217_v28 }
  0x25 PF: > { %s11_s6 = sadd.s32 1, %s325_s6  }
  0x26   : > { %p8_p5 = scmp.ge.s32.totalorder %s11_s6, 4  }
  0x28   :  { %10 = sbr.rel (!%p8_p5) target bundleno = 1 (0x1), region = 54 }

// kernel: _lambda_.20
= control target key start
LH: loop header
LB: loop body
LE: loop exit
PB: predicated region body
PF: predicated region fallthrough
CT: control target
= control target key end

     0   :  { %s256_s6 = smov 0   ;;  %s280_s0 = inlined_call_operand.vmem [shape: f32[16,2,7,64], index: 0, kind: input, shape index: {}]   ;;  %s281_s1 = inlined_call_operand.vmem [shape: f32[14,7,64], index: 1, kind: output, shape index: {}]  }
   0x1 LB: > { %s218_s7 = sadd.s32 4294967295, %s244_s6   ;;  %p222_p0 = scmp.ge.s32.totalorder %s244_s6, 1  ;;  %s244_s6 = sphi %s256_s6, %s11_s6  }
   0x2   : > { %p89_p1 = scmp.lt.s32.totalorder %s244_s6, 3 }
   0x4   : > { %p90_p2 = pnand %p222_p0, %p89_p1 }
   0x5   : > { %s223_s8 = sshll.u32 (!%p90_p2), %s218_s7, 3  ;;  %s117_s9 = smul.u32 (!%p90_p2), 7, %s218_s7 }
   0x6   : > { %93 = sbr.rel (%p90_p2) target bundleno = 25 (0x19), region = 24  ;;  %p111_p3 = scmp.lt.s32.totalorder (!%p90_p2), %s223_s8, 15 }
   0x7   : > { %p118_p4 = scmp.lt.s32.totalorder (!%p90_p2), %s117_s9, 13 }
   0xb   : > { %s283_s8 = smov (!%p111_p3, %s223_s8), 15  ;;  %s285_s9 = smov (!%p118_p4, %s117_s9), 13  ;;  %vm154_vm0 = vcmask 522240  }
   0xc   : > { %s229_s10 = sshll.u32 %s283_s8, 4  ;;  %s226_s14 = sshll.u32 %s285_s9, 3 }
   0xd   : > { %s115_s13 = scalar_lea.vmem %s280_s0, %s229_s10  ;;  %s121_s17 = scalar_lea.vmem %s281_s1, %s226_s14 }
   0xe   : > { %v123_v0 = vld [vmem:[%s115_s13] sm:$0x7f]  ;;  %v124_v1 = vld [vmem:[%s115_s13 + $0x8] sm:$0x7f]  ;;  %v125_v2 = vld [vmem:[%s115_s13 + $0x10] sm:$0x7f] }
   0xf   : > { %v126_v3 = vld [vmem:[%s115_s13 + $0x18] sm:$0x7f]  ;;  %v139_v4 = vmax.f32 %v123_v0, %v124_v1  ;;  %v127_v5 = vld [vmem:[%s115_s13 + $0x20] sm:$0x7f]  ;;  %v128_v6 = vld [vmem:[%s115_s13 + $0x28] sm:$0x7f] }
  0x10   : > { %v140_v7 = vmax.f32 %v125_v2, %v126_v3  ;;  %v141_v8 = vmax.f32 %v127_v5, %v128_v6  ;;  %v129_v9 = vld [vmem:[%s115_s13 + $0x30] sm:$0x7f]  ;;  %v130_v10 = vld [vmem:[%s115_s13 + $0x38] sm:$0x7f]  ;;  %v131_v11 = vld [vmem:[%s115_s13 + $0x40] sm:$0x7f] }
  0x11   : > { %v142_v12 = vmax.f32 %v129_v9, %v130_v10  ;;  %v132_v13 = vld [vmem:[%s115_s13 + $0x48] sm:$0x7f]  ;;  %v133_v14 = vld [vmem:[%s115_s13 + $0x50] sm:$0x7f]  ;;  %v134_v15 = vld [vmem:[%s115_s13 + $0x58] sm:$0x7f] }
  0x12   : > { %v147_v16 = vmax.f32 %v139_v4, %v140_v7  ;;  %v148_v17 = vmax.f32 %v140_v7, %v141_v8  ;;  %v143_v18 = vmax.f32 %v131_v11, %v132_v13  ;;  %v144_v19 = vmax.f32 %v133_v14, %v134_v15  ;;  %v135_v20 = vld [vmem:[%s115_s13 + $0x60] sm:$0x7f]  ;;  %v136_v21 = vld [vmem:[%s115_s13 + $0x68] sm:$0x7f]  ;;  %v137_v22 = vld [vmem:[%s115_s13 + $0x70] sm:$0x7f] }
  0x13   : > { %v149_v23 = vmax.f32 %v141_v8, %v142_v12  ;;  %v145_v24 = vmax.f32 %v135_v20, %v136_v21  ;;  %v138_v25 = vld [vmem:[%s115_s13 + $0x78] sm:$0x7f] }
  0x14   : > { %155 = vst.msk [vmem:[%s121_s17] sm:$0x7f] %vm154_vm0, %v147_v16  ;;  %156 = vst.msk [vmem:[%s121_s17 + $0x8] sm:$0x7f] %vm154_vm0, %v148_v17  ;;  %v150_v26 = vmax.f32 %v142_v12, %v143_v18  ;;  %v151_v27 = vmax.f32 %v143_v18, %v144_v19  ;;  %v146_v28 = vmax.f32 %v137_v22, %v138_v25 }
  0x15   : > { %157 = vst.msk [vmem:[%s121_s17 + $0x10] sm:$0x7f] %vm154_vm0, %v149_v23  ;;  %v152_v29 = vmax.f32 %v144_v19, %v145_v24 }
  0x16   : > { %158 = vst.msk [vmem:[%s121_s17 + $0x18] sm:$0x7f] %vm154_vm0, %v150_v26  ;;  %159 = vst.msk [vmem:[%s121_s17 + $0x20] sm:$0x7f] %vm154_vm0, %v151_v27  ;;  %v153_v30 = vmax.f32 %v145_v24, %v146_v28 }
  0x17   : > { %160 = vst.msk [vmem:[%s121_s17 + $0x28] sm:$0x7f] %vm154_vm0, %v152_v29 }
  0x18   : > { %161 = vst.msk [vmem:[%s121_s17 + $0x30] sm:$0x7f] %vm154_vm0, %v153_v30 }
  0x19 PF: > { %s11_s6 = sadd.s32 1, %s244_s6  }
  0x1a   : > { %p8_p5 = scmp.ge.s32.totalorder %s11_s6, 4  }
  0x1c   :  { %10 = sbr.rel (!%p8_p5) target bundleno = 1 (0x1), region = 54 }

// kernel: _lambda_.21
= control target key start
LH: loop header
LB: loop body
LE: loop exit
PB: predicated region body
PF: predicated region fallthrough
CT: control target
= control target key end

     0   :  { %s763_s1 = inlined_call_operand.vmem [shape: f32[256,128], index: 1, kind: input, shape index: {}]   ;;  %s764_s0 = inlined_call_operand.vmem [shape: f32[128,256], index: 0, kind: input, shape index: {}]   ;;  %s765_s2 = inlined_call_operand.vmem [shape: f32[1,128], index: 2, kind: input, shape index: {}]   ;;  %s766_s3 = inlined_call_operand.vmem [shape: f32[128,128], index: 3, kind: output, shape index: {}]  }
   0x1   :  { %v113_v0 = vld [vmem:[%s763_s1 + $0xf8] sm:$0xff]  ;;  %v112_v2 = vld [vmem:[%s763_s1 + $0xf0] sm:$0xff]  ;;  %v111_v4 = vld [vmem:[%s763_s1 + $0xe8] sm:$0xff] }
   0x2   :  { %v97_v1 = vld [vmem:[%s763_s1 + $0x78] sm:$0xff]  ;;  %370 = vmatprep.subr.mxu0 %v113_v0  ;;  %450 = vmatprep.subr.mxu1 %v113_v0  ;;  %v96_v3 = vld [vmem:[%s763_s1 + $0x70] sm:$0xff]  ;;  %v95_v5 = vld [vmem:[%s763_s1 + $0x68] sm:$0xff] }
   0x3   :  { %371 = vmatpush3.msra.mxu0 %v97_v1  ;;  %466 = vmatpush3.msra.mxu1 %v97_v1  ;;  %v110_v6 = vld [vmem:[%s763_s1 + $0xe0] sm:$0xff]  ;;  %v109_v8 = vld [vmem:[%s763_s1 + $0xd8] sm:$0xff]  ;;  %v108_v10 = vld [vmem:[%s763_s1 + $0xd0] sm:$0xff] }
   0x4   :  { %372 = vmatprep.subr.mxu0 %v112_v2  ;;  %451 = vmatprep.subr.mxu1 %v112_v2  ;;  %v94_v7 = vld [vmem:[%s763_s1 + $0x60] sm:$0xff]  ;;  %v93_v9 = vld [vmem:[%s763_s1 + $0x58] sm:$0xff]  ;;  %v92_v11 = vld [vmem:[%s763_s1 + $0x50] sm:$0xff] }
   0x5   :  { %373 = vmatpush3.msra.mxu0 %v96_v3  ;;  %467 = vmatpush3.msra.mxu1 %v96_v3  ;;  %v107_v12 = vld [vmem:[%s763_s1 + $0xc8] sm:$0xff]  ;;  %v106_v14 = vld [vmem:[%s763_s1 + $0xc0] sm:$0xff]  ;;  %v105_v16 = vld [vmem:[%s763_s1 + $0xb8] sm:$0xff] }
   0x6   :  { %374 = vmatprep.subr.mxu0 %v111_v4  ;;  %452 = vmatprep.subr.mxu1 %v111_v4  ;;  %v91_v13 = vld [vmem:[%s763_s1 + $0x48] sm:$0xff]  ;;  %v90_v15 = vld [vmem:[%s763_s1 + $0x40] sm:$0xff]  ;;  %v89_v17 = vld [vmem:[%s763_s1 + $0x38] sm:$0xff] }
   0x7   :  { %375 = vmatpush3.msra.mxu0 %v95_v5  ;;  %468 = vmatpush3.msra.mxu1 %v95_v5  ;;  %v104_v18 = vld [vmem:[%s763_s1 + $0xb0] sm:$0xff]  ;;  %v103_v20 = vld [vmem:[%s763_s1 + $0xa8] sm:$0xff]  ;;  %v102_v22 = vld [vmem:[%s763_s1 + $0xa0] sm:$0xff] }
   0x8   :  { %376 = vmatprep.subr.mxu0 %v110_v6  ;;  %453 = vmatprep.subr.mxu1 %v110_v6  ;;  %v88_v19 = vld [vmem:[%s763_s1 + $0x30] sm:$0xff]  ;;  %v87_v21 = vld [vmem:[%s763_s1 + $0x28] sm:$0xff]  ;;  %v86_v23 = vld [vmem:[%s763_s1 + $0x20] sm:$0xff] }
   0x9   :  { %377 = vmatpush3.msra.mxu0 %v94_v7  ;;  %469 = vmatpush3.msra.mxu1 %v94_v7  ;;  %v101_v24 = vld [vmem:[%s763_s1 + $0x98] sm:$0xff]  ;;  %v100_v26 = vld [vmem:[%s763_s1 + $0x90] sm:$0xff]  ;;  %v99_v28 = vld [vmem:[%s763_s1 + $0x88] sm:$0xff] }
   0xa   :  { %378 = vmatprep.subr.mxu0 %v109_v8  ;;  %454 = vmatprep.subr.mxu1 %v109_v8  ;;  %v85_v25 = vld [vmem:[%s763_s1 + $0x18] sm:$0xff]  ;;  %v84_v27 = vld [vmem:[%s763_s1 + $0x10] sm:$0xff]  ;;  %v83_v29 = vld [vmem:[%s763_s1 + $0x8] sm:$0xff] }
   0xb   :  { %379 = vmatpush3.msra.mxu0 %v93_v9  ;;  %470 = vmatpush3.msra.mxu1 %v93_v9  ;;  %v98_v30 = vld [vmem:[%s763_s1 + $0x80] sm:$0xff]  ;;  %v51_v32 = vld [vmem:[%s764_s0 + $0x8] sm:$0xff]  ;;  %v53_v36 = vld [vmem:[%s764_s0 + $0x18] sm:$0xff] }
   0xc   :  { %380 = vmatprep.subr.mxu0 %v108_v10  ;;  %455 = vmatprep.subr.mxu1 %v108_v10  ;;  %v82_v31 = vld [vmem:[%s763_s1] sm:$0xff]  ;;  %v67_v33 = vld [vmem:[%s764_s0 + $0x88] sm:$0xff]  ;;  %v69_v37 = vld [vmem:[%s764_s0 + $0x98] sm:$0xff] }
   0xd   :  { %381 = vmatpush3.msra.mxu0 %v92_v11  ;;  %471 = vmatpush3.msra.mxu1 %v92_v11  ;;  %v50_v34 = vld [vmem:[%s764_s0] sm:$0xff]  ;;  %v52_v38 = vld [vmem:[%s764_s0 + $0x10] sm:$0xff]  ;;  %v55_v40 = vld [vmem:[%s764_s0 + $0x28] sm:$0xff] }
   0xe   :  { %382 = vmatprep.subr.mxu0 %v107_v12  ;;  %456 = vmatprep.subr.mxu1 %v107_v12  ;;  %v66_v35 = vld [vmem:[%s764_s0 + $0x80] sm:$0xff]  ;;  %v68_v39 = vld [vmem:[%s764_s0 + $0x90] sm:$0xff]  ;;  %v71_v41 = vld [vmem:[%s764_s0 + $0xa8] sm:$0xff] }
   0xf   :  { %383 = vmatpush3.msra.mxu0 %v91_v13  ;;  %472 = vmatpush3.msra.mxu1 %v91_v13  ;;  %v54_v42 = vld [vmem:[%s764_s0 + $0x20] sm:$0xff]  ;;  %v57_v44 = vld [vmem:[%s764_s0 + $0x38] sm:$0xff]  ;;  %v56_v46 = vld [vmem:[%s764_s0 + $0x30] sm:$0xff] }
  0x10   :  { %384 = vmatprep.subr.mxu0 %v106_v14  ;;  %457 = vmatprep.subr.mxu1 %v106_v14  ;;  %v70_v43 = vld [vmem:[%s764_s0 + $0xa0] sm:$0xff]  ;;  %v73_v45 = vld [vmem:[%s764_s0 + $0xb8] sm:$0xff]  ;;  %v72_v47 = vld [vmem:[%s764_s0 + $0xb0] sm:$0xff] }
  0x11   :  { %385 = vmatpush3.msra.mxu0 %v90_v15  ;;  %473 = vmatpush3.msra.mxu1 %v90_v15  ;;  %v59_v48 = vld [vmem:[%s764_s0 + $0x48] sm:$0xff]  ;;  %v58_v50 = vld [vmem:[%s764_s0 + $0x40] sm:$0xff]  ;;  %v61_v52 = vld [vmem:[%s764_s0 + $0x58] sm:$0xff] }
  0x12   :  { %386 = vmatprep.subr.mxu0 %v105_v16  ;;  %458 = vmatprep.subr.mxu1 %v105_v16  ;;  %v75_v49 = vld [vmem:[%s764_s0 + $0xc8] sm:$0xff]  ;;  %v74_v51 = vld [vmem:[%s764_s0 + $0xc0] sm:$0xff]  ;;  %v77_v53 = vld [vmem:[%s764_s0 + $0xd8] sm:$0xff] }
  0x13   :  { %387 = vmatpush3.msra.mxu0 %v89_v17  ;;  %474 = vmatpush3.msra.mxu1 %v89_v17  ;;  %v60_v54 = vld [vmem:[%s764_s0 + $0x50] sm:$0xff]  ;;  %v63_v56 = vld [vmem:[%s764_s0 + $0x68] sm:$0xff]  ;;  %v62_v58 = vld [vmem:[%s764_s0 + $0x60] sm:$0xff] }
  0x14   :  { %388 = vmatprep.subr.mxu0 %v104_v18  ;;  %459 = vmatprep.subr.mxu1 %v104_v18  ;;  %v76_v55 = vld [vmem:[%s764_s0 + $0xd0] sm:$0xff]  ;;  %v79_v57 = vld [vmem:[%s764_s0 + $0xe8] sm:$0xff]  ;;  %v78_v59 = vld [vmem:[%s764_s0 + $0xe0] sm:$0xff] }
  0x15   :  { %389 = vmatpush3.msra.mxu0 %v88_v19  ;;  %475 = vmatpush3.msra.mxu1 %v88_v19  ;;  %v65_v60 = vld [vmem:[%s764_s0 + $0x78] sm:$0xff]  ;;  %v64_v62 = vld [vmem:[%s764_s0 + $0x70] sm:$0xff]  ;;  %v697_v3 = vld [vmem:[%s765_s2] ss:$0 sm:$0xff] }
  0x16   :  { %390 = vmatprep.subr.mxu0 %v103_v20  ;;  %460 = vmatprep.subr.mxu1 %v103_v20  ;;  %v81_v61 = vld [vmem:[%s764_s0 + $0xf8] sm:$0xff]  ;;  %v80_v63 = vld [vmem:[%s764_s0 + $0xf0] sm:$0xff] }
  0x17   :  { %391 = vmatpush3.msra.mxu0 %v87_v21  ;;  %476 = vmatpush3.msra.mxu1 %v87_v21 }
  0x18   :  { %392 = vmatprep.subr.mxu0 %v102_v22  ;;  %461 = vmatprep.subr.mxu1 %v102_v22 }
  0x19   :  { %393 = vmatpush3.msra.mxu0 %v86_v23  ;;  %477 = vmatpush3.msra.mxu1 %v86_v23 }
  0x1a   :  { %394 = vmatprep.subr.mxu0 %v101_v24  ;;  %462 = vmatprep.subr.mxu1 %v101_v24 }
  0x1b   :  { %395 = vmatpush3.msra.mxu0 %v85_v25  ;;  %478 = vmatpush3.msra.mxu1 %v85_v25 }
  0x1c   :  { %396 = vmatprep.subr.mxu0 %v100_v26  ;;  %463 = vmatprep.subr.mxu1 %v100_v26 }
  0x1d   :  { %397 = vmatpush3.msra.mxu0 %v84_v27  ;;  %479 = vmatpush3.msra.mxu1 %v84_v27 }
  0x1e   :  { %398 = vmatprep.subr.mxu0 %v99_v28  ;;  %464 = vmatprep.subr.mxu1 %v99_v28 }
  0x1f   :  { %399 = vmatpush3.msra.mxu0 %v83_v29  ;;  %480 = vmatpush3.msra.mxu1 %v83_v29 }
  0x20   :  { %400 = vmatprep.subr.mxu0 %v98_v30  ;;  %465 = vmatprep.subr.mxu1 %v98_v30 }
  0x21   :  { %401 = vmatpush3.msra.mxu0 %v82_v31  ;;  %481 = vmatpush3.msra.mxu1 %v82_v31 }
  0x22   :  { %178 = vmatprep.mubr.f32.mxu0 %v51_v32  ;;  %218 = vmatprep.mubr.f32.mxu1 %v67_v33 }
  0x23   :  { %179 = vmatmul.mubr.f32.vlgmr.msra.gmra.mxu0 %v50_v34  ;;  %219 = vmatmul.mubr.f32.vlgmr.msra.gmra.mxu1 %v66_v35 }
  0x24   :  { %183 = vmatprep.mubr.f32.mxu0 %v53_v36  ;;  %223 = vmatprep.mubr.f32.mxu1 %v69_v37 }
  0x27   :  { %184 = vmatmul.mubr.f32.gmra.mxu0 %v52_v38  ;;  %224 = vmatmul.mubr.f32.gmra.mxu1 %v68_v39 }
  0x28   :  { %188 = vmatprep.mubr.f32.mxu0 %v55_v40  ;;  %228 = vmatprep.mubr.f32.mxu1 %v71_v41 }
  0x2b   :  { %189 = vmatmul.mubr.f32.gmra.mxu0 %v54_v42  ;;  %229 = vmatmul.mubr.f32.gmra.mxu1 %v70_v43 }
  0x2c   :  { %193 = vmatprep.mubr.f32.mxu0 %v57_v44  ;;  %233 = vmatprep.mubr.f32.mxu1 %v73_v45 }
  0x2f   :  { %194 = vmatmul.mubr.f32.gmra.mxu0 %v56_v46  ;;  %234 = vmatmul.mubr.f32.gmra.mxu1 %v72_v47 }
  0x30   :  { %198 = vmatprep.mubr.f32.mxu0 %v59_v48  ;;  %238 = vmatprep.mubr.f32.mxu1 %v75_v49 }
  0x33   :  { %199 = vmatmul.mubr.f32.gmra.mxu0 %v58_v50  ;;  %239 = vmatmul.mubr.f32.gmra.mxu1 %v74_v51 }
  0x34   :  { %203 = vmatprep.mubr.f32.mxu0 %v61_v52  ;;  %243 = vmatprep.mubr.f32.mxu1 %v77_v53 }
  0x37   :  { %204 = vmatmul.mubr.f32.gmra.mxu0 %v60_v54  ;;  %244 = vmatmul.mubr.f32.gmra.mxu1 %v76_v55 }
  0x38   :  { %208 = vmatprep.mubr.f32.mxu0 %v63_v56  ;;  %248 = vmatprep.mubr.f32.mxu1 %v79_v57 }
  0x3b   :  { %209 = vmatmul.mubr.f32.gmra.mxu0 %v62_v58  ;;  %249 = vmatmul.mubr.f32.gmra.mxu1 %v78_v59 }
  0x3c   :  { %213 = vmatprep.mubr.f32.mxu0 %v65_v60  ;;  %253 = vmatprep.mubr.f32.mxu1 %v81_v61 }
  0x3f   :  { %214 = vmatmul.mubr.f32.gmra.mxu0 %v64_v62  ;;  %254 = vmatmul.mubr.f32.gmra.mxu1 %v80_v63 }
  0xe3   :  { %v402_v0 = vpop.f32.mrf.mxu0  ;;  %v426_v1 = vpop.f32.mrf.mxu1 }
  0xe5   :  { %v403_v2 = vpop.f32.mrf.mxu0  ;;  %v427_v4 = vpop.f32.mrf.mxu1 }
  0xe6   :  { %v404_v5 = vadd.f32 %v403_v2, %v402_v0  ;;  %v428_v6 = vadd.f32 %v427_v4, %v426_v1 }
  0xe7   :  { %v405_v7 = vpop.f32.mrf.mxu0  ;;  %v429_v8 = vpop.f32.mrf.mxu1 }
  0xe8   :  { %v317_v9 = vadd.f32 %v404_v5, %v697_v3  ;;  %v325_v10 = vadd.f32 %v428_v6, %v697_v3 }
  0xe9   :  { %v406_v11 = vpop.f32.mrf.mxu0  ;;  %v430_v12 = vpop.f32.mrf.mxu1 }
  0xea   :  { %v333_v13 = vmax.f32 %v317_v9, 0.0  ;;  %v341_v14 = vmax.f32 %v325_v10, 0.0  ;;  %v407_v15 = vadd.f32 %v406_v11, %v405_v7  ;;  %v431_v16 = vadd.f32 %v430_v12, %v429_v8 }
  0xeb   :  { %v408_v17 = vpop.f32.mrf.mxu0  ;;  %v432_v18 = vpop.f32.mrf.mxu1 }
  0xec   :  { %349 = vst [vmem:[%s766_s3] sm:$0xff] %v333_v13  ;;  %357 = vst [vmem:[%s766_s3 + $0x40] sm:$0xff] %v341_v14  ;;  %v318_v19 = vadd.f32 %v407_v15, %v697_v3  ;;  %v326_v20 = vadd.f32 %v431_v16, %v697_v3 }
  0xed   :  { %v409_v21 = vpop.f32.mrf.mxu0  ;;  %v433_v22 = vpop.f32.mrf.mxu1 }
  0xee   :  { %v334_v23 = vmax.f32 %v318_v19, 0.0  ;;  %v342_v24 = vmax.f32 %v326_v20, 0.0  ;;  %v410_v25 = vadd.f32 %v409_v21, %v408_v17  ;;  %v434_v26 = vadd.f32 %v433_v22, %v432_v18 }
  0xef   :  { %v411_v27 = vpop.f32.mrf.mxu0  ;;  %v435_v28 = vpop.f32.mrf.mxu1 }
  0xf0   :  { %350 = vst [vmem:[%s766_s3 + $0x8] sm:$0xff] %v334_v23  ;;  %358 = vst [vmem:[%s766_s3 + $0x48] sm:$0xff] %v342_v24  ;;  %v319_v29 = vadd.f32 %v410_v25, %v697_v3  ;;  %v327_v30 = vadd.f32 %v434_v26, %v697_v3 }
  0xf1   :  { %v412_v31 = vpop.f32.mrf.mxu0  ;;  %v436_v32 = vpop.f32.mrf.mxu1 }
  0xf2   :  { %v335_v33 = vmax.f32 %v319_v29, 0.0  ;;  %v343_v34 = vmax.f32 %v327_v30, 0.0  ;;  %v413_v35 = vadd.f32 %v412_v31, %v411_v27  ;;  %v437_v36 = vadd.f32 %v436_v32, %v435_v28 }
  0xf3   :  { %v414_v37 = vpop.f32.mrf.mxu0  ;;  %v438_v38 = vpop.f32.mrf.mxu1 }
  0xf4   :  { %351 = vst [vmem:[%s766_s3 + $0x10] sm:$0xff] %v335_v33  ;;  %359 = vst [vmem:[%s766_s3 + $0x50] sm:$0xff] %v343_v34  ;;  %v320_v39 = vadd.f32 %v413_v35, %v697_v3  ;;  %v328_v40 = vadd.f32 %v437_v36, %v697_v3 }
  0xf5   :  { %v415_v41 = vpop.f32.mrf.mxu0  ;;  %v439_v42 = vpop.f32.mrf.mxu1 }
  0xf6   :  { %v336_v43 = vmax.f32 %v320_v39, 0.0  ;;  %v344_v44 = vmax.f32 %v328_v40, 0.0  ;;  %v416_v45 = vadd.f32 %v415_v41, %v414_v37  ;;  %v440_v46 = vadd.f32 %v439_v42, %v438_v38 }
  0xf7   :  { %v417_v47 = vpop.f32.mrf.mxu0  ;;  %v441_v48 = vpop.f32.mrf.mxu1 }
  0xf8   :  { %352 = vst [vmem:[%s766_s3 + $0x18] sm:$0xff] %v336_v43  ;;  %360 = vst [vmem:[%s766_s3 + $0x58] sm:$0xff] %v344_v44  ;;  %v321_v49 = vadd.f32 %v416_v45, %v697_v3  ;;  %v329_v50 = vadd.f32 %v440_v46, %v697_v3 }
  0xf9   :  { %v418_v51 = vpop.f32.mrf.mxu0  ;;  %v442_v52 = vpop.f32.mrf.mxu1 }
  0xfa   :  { %v337_v53 = vmax.f32 %v321_v49, 0.0  ;;  %v345_v54 = vmax.f32 %v329_v50, 0.0  ;;  %v419_v55 = vadd.f32 %v418_v51, %v417_v47  ;;  %v443_v56 = vadd.f32 %v442_v52, %v441_v48 }
  0xfb   :  { %v420_v57 = vpop.f32.mrf.mxu0  ;;  %v444_v58 = vpop.f32.mrf.mxu1 }
  0xfc   :  { %353 = vst [vmem:[%s766_s3 + $0x20] sm:$0xff] %v337_v53  ;;  %361 = vst [vmem:[%s766_s3 + $0x60] sm:$0xff] %v345_v54  ;;  %v322_v59 = vadd.f32 %v419_v55, %v697_v3  ;;  %v330_v60 = vadd.f32 %v443_v56, %v697_v3 }
  0xfd   :  { %v421_v61 = vpop.f32.mrf.mxu0  ;;  %v445_v62 = vpop.f32.mrf.mxu1 }
  0xfe   :  { %v338_v63 = vmax.f32 %v322_v59, 0.0  ;;  %v346_v0 = vmax.f32 %v330_v60, 0.0  ;;  %v422_v1 = vadd.f32 %v421_v61, %v420_v57  ;;  %v446_v2 = vadd.f32 %v445_v62, %v444_v58 }
  0xff   :  { %v423_v4 = vpop.f32.mrf.mxu0  ;;  %v447_v5 = vpop.f32.mrf.mxu1 }
 0x100   :  { %354 = vst [vmem:[%s766_s3 + $0x28] sm:$0xff] %v338_v63  ;;  %362 = vst [vmem:[%s766_s3 + $0x68] sm:$0xff] %v346_v0  ;;  %v323_v6 = vadd.f32 %v422_v1, %v697_v3  ;;  %v331_v7 = vadd.f32 %v446_v2, %v697_v3 }
 0x101   :  { %v424_v8 = vpop.f32.mrf.mxu0  ;;  %v448_v9 = vpop.f32.mrf.mxu1 }
 0x102   :  { %v339_v10 = vmax.f32 %v323_v6, 0.0  ;;  %v347_v11 = vmax.f32 %v331_v7, 0.0  ;;  %v425_v12 = vadd.f32 %v424_v8, %v423_v4  ;;  %v449_v13 = vadd.f32 %v448_v9, %v447_v5 }
 0x104   :  { %355 = vst [vmem:[%s766_s3 + $0x30] sm:$0xff] %v339_v10  ;;  %363 = vst [vmem:[%s766_s3 + $0x70] sm:$0xff] %v347_v11  ;;  %v324_v14 = vadd.f32 %v425_v12, %v697_v3  ;;  %v332_v15 = vadd.f32 %v449_v13, %v697_v3 }
 0x106   :  { %v340_v16 = vmax.f32 %v324_v14, 0.0  ;;  %v348_v17 = vmax.f32 %v332_v15, 0.0 }
 0x108   :  { %356 = vst [vmem:[%s766_s3 + $0x38] sm:$0xff] %v340_v16  ;;  %364 = vst [vmem:[%s766_s3 + $0x78] sm:$0xff] %v348_v17 }

// kernel: _lambda_.24
= control target key start
LH: loop header
LB: loop body
LE: loop exit
PB: predicated region body
PF: predicated region fallthrough
CT: control target
= control target key end

     0   :  { %s1212_s1 = inlined_call_operand.vmem [shape: f32[512,128], index: 1, kind: input, shape index: {}]   ;;  %s1213_s0 = inlined_call_operand.vmem [shape: f32[128,512], index: 0, kind: input, shape index: {}]   ;;  %s1214_s2 = inlined_call_operand.vmem [shape: f32[1,128], index: 2, kind: input, shape index: {}]   ;;  %s1215_s3 = inlined_call_operand.vmem [shape: f32[128,128], index: 3, kind: output, shape index: {}]  }
   0x1   :  { %v145_v0 = vld [vmem:[%s1212_s1 + $0xf8] sm:$0xff]  ;;  %v144_v4 = vld [vmem:[%s1212_s1 + $0xf0] sm:$0xff]  ;;  %v143_v8 = vld [vmem:[%s1212_s1 + $0xe8] sm:$0xff] }
   0x2   :  { %v177_v1 = vld [vmem:[%s1212_s1 + $0x1f8] sm:$0xff]  ;;  %579 = vmatprep.subr.mxu0 %v145_v0  ;;  %v176_v5 = vld [vmem:[%s1212_s1 + $0x1f0] sm:$0xff]  ;;  %v175_v9 = vld [vmem:[%s1212_s1 + $0x1e8] sm:$0xff] }
   0x3   :  { %v129_v2 = vld [vmem:[%s1212_s1 + $0x78] sm:$0xff]  ;;  %659 = vmatprep.subr.mxu1 %v177_v1  ;;  %v128_v6 = vld [vmem:[%s1212_s1 + $0x70] sm:$0xff]  ;;  %v127_v10 = vld [vmem:[%s1212_s1 + $0x68] sm:$0xff] }
   0x4   :  { %v161_v3 = vld [vmem:[%s1212_s1 + $0x178] sm:$0xff]  ;;  %580 = vmatpush3.msra.mxu0 %v129_v2  ;;  %v160_v7 = vld [vmem:[%s1212_s1 + $0x170] sm:$0xff]  ;;  %v159_v11 = vld [vmem:[%s1212_s1 + $0x168] sm:$0xff] }
   0x5   :  { %660 = vmatpush3.msra.mxu1 %v161_v3  ;;  %581 = vmatprep.subr.mxu0 %v144_v4  ;;  %v142_v12 = vld [vmem:[%s1212_s1 + $0xe0] sm:$0xff]  ;;  %v141_v16 = vld [vmem:[%s1212_s1 + $0xd8] sm:$0xff]  ;;  %v140_v20 = vld [vmem:[%s1212_s1 + $0xd0] sm:$0xff] }
   0x6   :  { %661 = vmatprep.subr.mxu1 %v176_v5  ;;  %582 = vmatpush3.msra.mxu0 %v128_v6  ;;  %v174_v13 = vld [vmem:[%s1212_s1 + $0x1e0] sm:$0xff]  ;;  %v173_v17 = vld [vmem:[%s1212_s1 + $0x1d8] sm:$0xff]  ;;  %v172_v21 = vld [vmem:[%s1212_s1 + $0x1d0] sm:$0xff] }
   0x7   :  { %662 = vmatpush3.msra.mxu1 %v160_v7  ;;  %583 = vmatprep.subr.mxu0 %v143_v8  ;;  %v126_v14 = vld [vmem:[%s1212_s1 + $0x60] sm:$0xff]  ;;  %v125_v18 = vld [vmem:[%s1212_s1 + $0x58] sm:$0xff]  ;;  %v124_v22 = vld [vmem:[%s1212_s1 + $0x50] sm:$0xff] }
   0x8   :  { %663 = vmatprep.subr.mxu1 %v175_v9  ;;  %v158_v15 = vld [vmem:[%s1212_s1 + $0x160] sm:$0xff]  ;;  %584 = vmatpush3.msra.mxu0 %v127_v10  ;;  %v157_v19 = vld [vmem:[%s1212_s1 + $0x158] sm:$0xff]  ;;  %v156_v23 = vld [vmem:[%s1212_s1 + $0x150] sm:$0xff] }
   0x9   :  { %664 = vmatpush3.msra.mxu1 %v159_v11  ;;  %585 = vmatprep.subr.mxu0 %v142_v12  ;;  %v139_v24 = vld [vmem:[%s1212_s1 + $0xc8] sm:$0xff]  ;;  %v138_v28 = vld [vmem:[%s1212_s1 + $0xc0] sm:$0xff]  ;;  %v137_v32 = vld [vmem:[%s1212_s1 + $0xb8] sm:$0xff] }
   0xa   :  { %665 = vmatprep.subr.mxu1 %v174_v13  ;;  %586 = vmatpush3.msra.mxu0 %v126_v14  ;;  %v171_v25 = vld [vmem:[%s1212_s1 + $0x1c8] sm:$0xff]  ;;  %v170_v29 = vld [vmem:[%s1212_s1 + $0x1c0] sm:$0xff]  ;;  %v169_v33 = vld [vmem:[%s1212_s1 + $0x1b8] sm:$0xff] }
   0xb   :  { %666 = vmatpush3.msra.mxu1 %v158_v15  ;;  %587 = vmatprep.subr.mxu0 %v141_v16  ;;  %v123_v26 = vld [vmem:[%s1212_s1 + $0x48] sm:$0xff]  ;;  %v122_v30 = vld [vmem:[%s1212_s1 + $0x40] sm:$0xff]  ;;  %v121_v34 = vld [vmem:[%s1212_s1 + $0x38] sm:$0xff] }
   0xc   :  { %667 = vmatprep.subr.mxu1 %v173_v17  ;;  %588 = vmatpush3.msra.mxu0 %v125_v18  ;;  %v155_v27 = vld [vmem:[%s1212_s1 + $0x148] sm:$0xff]  ;;  %v154_v31 = vld [vmem:[%s1212_s1 + $0x140] sm:$0xff]  ;;  %v153_v35 = vld [vmem:[%s1212_s1 + $0x138] sm:$0xff] }
   0xd   :  { %668 = vmatpush3.msra.mxu1 %v157_v19  ;;  %589 = vmatprep.subr.mxu0 %v140_v20  ;;  %v136_v36 = vld [vmem:[%s1212_s1 + $0xb0] sm:$0xff]  ;;  %v135_v40 = vld [vmem:[%s1212_s1 + $0xa8] sm:$0xff]  ;;  %v134_v44 = vld [vmem:[%s1212_s1 + $0xa0] sm:$0xff] }
   0xe   :  { %669 = vmatprep.subr.mxu1 %v172_v21  ;;  %590 = vmatpush3.msra.mxu0 %v124_v22  ;;  %v168_v37 = vld [vmem:[%s1212_s1 + $0x1b0] sm:$0xff]  ;;  %v167_v41 = vld [vmem:[%s1212_s1 + $0x1a8] sm:$0xff]  ;;  %v166_v45 = vld [vmem:[%s1212_s1 + $0x1a0] sm:$0xff] }
   0xf   :  { %670 = vmatpush3.msra.mxu1 %v156_v23  ;;  %591 = vmatprep.subr.mxu0 %v139_v24  ;;  %v120_v38 = vld [vmem:[%s1212_s1 + $0x30] sm:$0xff]  ;;  %v119_v42 = vld [vmem:[%s1212_s1 + $0x28] sm:$0xff]  ;;  %v118_v46 = vld [vmem:[%s1212_s1 + $0x20] sm:$0xff] }
  0x10   :  { %671 = vmatprep.subr.mxu1 %v171_v25  ;;  %592 = vmatpush3.msra.mxu0 %v123_v26  ;;  %v152_v39 = vld [vmem:[%s1212_s1 + $0x130] sm:$0xff]  ;;  %v151_v43 = vld [vmem:[%s1212_s1 + $0x128] sm:$0xff]  ;;  %v150_v47 = vld [vmem:[%s1212_s1 + $0x120] sm:$0xff] }
  0x11   :  { %672 = vmatpush3.msra.mxu1 %v155_v27  ;;  %593 = vmatprep.subr.mxu0 %v138_v28  ;;  %v133_v48 = vld [vmem:[%s1212_s1 + $0x98] sm:$0xff]  ;;  %v132_v52 = vld [vmem:[%s1212_s1 + $0x90] sm:$0xff]  ;;  %v131_v56 = vld [vmem:[%s1212_s1 + $0x88] sm:$0xff] }
  0x12   :  { %673 = vmatprep.subr.mxu1 %v170_v29  ;;  %594 = vmatpush3.msra.mxu0 %v122_v30  ;;  %v165_v49 = vld [vmem:[%s1212_s1 + $0x198] sm:$0xff]  ;;  %v164_v53 = vld [vmem:[%s1212_s1 + $0x190] sm:$0xff]  ;;  %v163_v57 = vld [vmem:[%s1212_s1 + $0x188] sm:$0xff] }
  0x13   :  { %674 = vmatpush3.msra.mxu1 %v154_v31  ;;  %595 = vmatprep.subr.mxu0 %v137_v32  ;;  %v117_v50 = vld [vmem:[%s1212_s1 + $0x18] sm:$0xff]  ;;  %v116_v54 = vld [vmem:[%s1212_s1 + $0x10] sm:$0xff]  ;;  %v115_v58 = vld [vmem:[%s1212_s1 + $0x8] sm:$0xff] }
  0x14   :  { %675 = vmatprep.subr.mxu1 %v169_v33  ;;  %596 = vmatpush3.msra.mxu0 %v121_v34  ;;  %v149_v51 = vld [vmem:[%s1212_s1 + $0x118] sm:$0xff]  ;;  %v148_v55 = vld [vmem:[%s1212_s1 + $0x110] sm:$0xff]  ;;  %v147_v59 = vld [vmem:[%s1212_s1 + $0x108] sm:$0xff] }
  0x15   :  { %676 = vmatpush3.msra.mxu1 %v153_v35  ;;  %597 = vmatprep.subr.mxu0 %v136_v36  ;;  %v130_v60 = vld [vmem:[%s1212_s1 + $0x80] sm:$0xff]  ;;  %v51_v63 = vld [vmem:[%s1213_s0 + $0x8] sm:$0xff]  ;;  %v53_v1 = vld [vmem:[%s1213_s0 + $0x18] sm:$0xff] }
  0x16   :  { %677 = vmatprep.subr.mxu1 %v168_v37  ;;  %598 = vmatpush3.msra.mxu0 %v120_v38  ;;  %v162_v61 = vld [vmem:[%s1212_s1 + $0x180] sm:$0xff]  ;;  %v52_v3 = vld [vmem:[%s1213_s0 + $0x10] sm:$0xff]  ;;  %v55_v4 = vld [vmem:[%s1213_s0 + $0x28] sm:$0xff] }
  0x17   :  { %678 = vmatpush3.msra.mxu1 %v152_v39  ;;  %599 = vmatprep.subr.mxu0 %v135_v40  ;;  %v114_v62 = vld [vmem:[%s1212_s1] sm:$0xff]  ;;  %v57_v5 = vld [vmem:[%s1213_s0 + $0x38] sm:$0xff]  ;;  %v56_v7 = vld [vmem:[%s1213_s0 + $0x30] sm:$0xff] }
  0x18   :  { %679 = vmatprep.subr.mxu1 %v167_v41  ;;  %600 = vmatpush3.msra.mxu0 %v119_v42  ;;  %v146_v0 = vld [vmem:[%s1212_s1 + $0x100] sm:$0xff]  ;;  %v59_v8 = vld [vmem:[%s1213_s0 + $0x48] sm:$0xff]  ;;  %v61_v9 = vld [vmem:[%s1213_s0 + $0x58] sm:$0xff] }
  0x19   :  { %680 = vmatpush3.msra.mxu1 %v151_v43  ;;  %601 = vmatprep.subr.mxu0 %v134_v44  ;;  %v50_v2 = vld [vmem:[%s1213_s0] sm:$0xff]  ;;  %v60_v11 = vld [vmem:[%s1213_s0 + $0x50] sm:$0xff]  ;;  %v63_v12 = vld [vmem:[%s1213_s0 + $0x68] sm:$0xff] }
  0x1a   :  { %681 = vmatprep.subr.mxu1 %v166_v45  ;;  %602 = vmatpush3.msra.mxu0 %v118_v46  ;;  %v54_v6 = vld [vmem:[%s1213_s0 + $0x20] sm:$0xff]  ;;  %v65_v13 = vld [vmem:[%s1213_s0 + $0x78] sm:$0xff]  ;;  %v64_v15 = vld [vmem:[%s1213_s0 + $0x70] sm:$0xff] }
  0x1b   :  { %682 = vmatpush3.msra.mxu1 %v150_v47  ;;  %603 = vmatprep.subr.mxu0 %v133_v48  ;;  %v58_v10 = vld [vmem:[%s1213_s0 + $0x40] sm:$0xff]  ;;  %v67_v16 = vld [vmem:[%s1213_s0 + $0x88] sm:$0xff]  ;;  %v69_v17 = vld [vmem:[%s1213_s0 + $0x98] sm:$0xff] }
  0x1c   :  { %683 = vmatprep.subr.mxu1 %v165_v49  ;;  %604 = vmatpush3.msra.mxu0 %v117_v50  ;;  %v62_v14 = vld [vmem:[%s1213_s0 + $0x60] sm:$0xff]  ;;  %v68_v19 = vld [vmem:[%s1213_s0 + $0x90] sm:$0xff]  ;;  %v71_v20 = vld [vmem:[%s1213_s0 + $0xa8] sm:$0xff] }
  0x1d   :  { %684 = vmatpush3.msra.mxu1 %v149_v51  ;;  %605 = vmatprep.subr.mxu0 %v132_v52  ;;  %v66_v18 = vld [vmem:[%s1213_s0 + $0x80] sm:$0xff]  ;;  %v73_v21 = vld [vmem:[%s1213_s0 + $0xb8] sm:$0xff]  ;;  %v72_v23 = vld [vmem:[%s1213_s0 + $0xb0] sm:$0xff] }
  0x1e   :  { %685 = vmatprep.subr.mxu1 %v164_v53  ;;  %606 = vmatpush3.msra.mxu0 %v116_v54  ;;  %v70_v22 = vld [vmem:[%s1213_s0 + $0xa0] sm:$0xff]  ;;  %v75_v24 = vld [vmem:[%s1213_s0 + $0xc8] sm:$0xff]  ;;  %v77_v25 = vld [vmem:[%s1213_s0 + $0xd8] sm:$0xff] }
  0x1f   :  { %686 = vmatpush3.msra.mxu1 %v148_v55  ;;  %607 = vmatprep.subr.mxu0 %v131_v56  ;;  %v74_v26 = vld [vmem:[%s1213_s0 + $0xc0] sm:$0xff]  ;;  %v76_v27 = vld [vmem:[%s1213_s0 + $0xd0] sm:$0xff]  ;;  %v79_v28 = vld [vmem:[%s1213_s0 + $0xe8] sm:$0xff] }
  0x20   :  { %687 = vmatprep.subr.mxu1 %v163_v57  ;;  %608 = vmatpush3.msra.mxu0 %v115_v58  ;;  %v81_v29 = vld [vmem:[%s1213_s0 + $0xf8] sm:$0xff]  ;;  %v78_v30 = vld [vmem:[%s1213_s0 + $0xe0] sm:$0xff]  ;;  %v80_v31 = vld [vmem:[%s1213_s0 + $0xf0] sm:$0xff] }
  0x21   :  { %688 = vmatpush3.msra.mxu1 %v147_v59  ;;  %609 = vmatprep.subr.mxu0 %v130_v60  ;;  %v83_v32 = vld [vmem:[%s1213_s0 + $0x108] sm:$0xff]  ;;  %v85_v33 = vld [vmem:[%s1213_s0 + $0x118] sm:$0xff]  ;;  %v82_v34 = vld [vmem:[%s1213_s0 + $0x100] sm:$0xff] }
  0x22   :  { %689 = vmatprep.subr.mxu1 %v162_v61  ;;  %610 = vmatpush3.msra.mxu0 %v114_v62  ;;  %v84_v35 = vld [vmem:[%s1213_s0 + $0x110] sm:$0xff]  ;;  %v87_v36 = vld [vmem:[%s1213_s0 + $0x128] sm:$0xff]  ;;  %v89_v37 = vld [vmem:[%s1213_s0 + $0x138] sm:$0xff] }
  0x23   :  { %242 = vmatprep.mubr.f32.mxu0 %v51_v63  ;;  %690 = vmatpush3.msra.mxu1 %v146_v0  ;;  %v86_v38 = vld [vmem:[%s1213_s0 + $0x120] sm:$0xff]  ;;  %v88_v39 = vld [vmem:[%s1213_s0 + $0x130] sm:$0xff]  ;;  %v91_v40 = vld [vmem:[%s1213_s0 + $0x148] sm:$0xff] }
  0x24   :  { %387 = vmatprep.mubr.f32.mxu1 %v53_v1  ;;  %243 = vmatmul.mubr.f32.vlgmr.msra.gmra.mxu0 %v50_v2  ;;  %v93_v41 = vld [vmem:[%s1213_s0 + $0x158] sm:$0xff]  ;;  %v90_v42 = vld [vmem:[%s1213_s0 + $0x140] sm:$0xff]  ;;  %v92_v43 = vld [vmem:[%s1213_s0 + $0x150] sm:$0xff] }
  0x25   :  { %388 = vmatmul.mubr.f32.vlgmr.msra.gmra.mxu1 %v52_v3  ;;  %247 = vmatprep.mubr.f32.mxu0 %v55_v4  ;;  %v95_v44 = vld [vmem:[%s1213_s0 + $0x168] sm:$0xff]  ;;  %v97_v45 = vld [vmem:[%s1213_s0 + $0x178] sm:$0xff]  ;;  %v94_v46 = vld [vmem:[%s1213_s0 + $0x160] sm:$0xff] }
  0x26   :  { %392 = vmatprep.mubr.f32.mxu1 %v57_v5  ;;  %v96_v47 = vld [vmem:[%s1213_s0 + $0x170] sm:$0xff]  ;;  %v99_v48 = vld [vmem:[%s1213_s0 + $0x188] sm:$0xff]  ;;  %v101_v49 = vld [vmem:[%s1213_s0 + $0x198] sm:$0xff] }
  0x27   :  { %v98_v50 = vld [vmem:[%s1213_s0 + $0x180] sm:$0xff]  ;;  %v100_v51 = vld [vmem:[%s1213_s0 + $0x190] sm:$0xff]  ;;  %v103_v52 = vld [vmem:[%s1213_s0 + $0x1a8] sm:$0xff] }
  0x28   :  { %248 = vmatmul.mubr.f32.gmra.mxu0 %v54_v6  ;;  %v105_v53 = vld [vmem:[%s1213_s0 + $0x1b8] sm:$0xff]  ;;  %v102_v54 = vld [vmem:[%s1213_s0 + $0x1a0] sm:$0xff]  ;;  %v104_v55 = vld [vmem:[%s1213_s0 + $0x1b0] sm:$0xff] }
  0x29   :  { %393 = vmatmul.mubr.f32.gmra.mxu1 %v56_v7  ;;  %252 = vmatprep.mubr.f32.mxu0 %v59_v8  ;;  %v107_v56 = vld [vmem:[%s1213_s0 + $0x1c8] sm:$0xff]  ;;  %v109_v57 = vld [vmem:[%s1213_s0 + $0x1d8] sm:$0xff]  ;;  %v106_v58 = vld [vmem:[%s1213_s0 + $0x1c0] sm:$0xff] }
  0x2a   :  { %397 = vmatprep.mubr.f32.mxu1 %v61_v9  ;;  %v108_v59 = vld [vmem:[%s1213_s0 + $0x1d0] sm:$0xff]  ;;  %v111_v60 = vld [vmem:[%s1213_s0 + $0x1e8] sm:$0xff]  ;;  %v113_v61 = vld [vmem:[%s1213_s0 + $0x1f8] sm:$0xff] }
  0x2b   :  { %v110_v62 = vld [vmem:[%s1213_s0 + $0x1e0] sm:$0xff]  ;;  %v112_v63 = vld [vmem:[%s1213_s0 + $0x1f0] sm:$0xff] }
  0x2c   :  { %253 = vmatmul.mubr.f32.gmra.mxu0 %v58_v10  ;;  %v1146_v6 = vld [vmem:[%s1214_s2] ss:$0 sm:$0xff] }
  0x2d   :  { %398 = vmatmul.mubr.f32.gmra.mxu1 %v60_v11  ;;  %257 = vmatprep.mubr.f32.mxu0 %v63_v12 }
  0x2e   :  { %402 = vmatprep.mubr.f32.mxu1 %v65_v13 }
  0x30   :  { %258 = vmatmul.mubr.f32.gmra.mxu0 %v62_v14 }
  0x31   :  { %403 = vmatmul.mubr.f32.gmra.mxu1 %v64_v15  ;;  %262 = vmatprep.mubr.f32.mxu0 %v67_v16 }
  0x32   :  { %407 = vmatprep.mubr.f32.mxu1 %v69_v17 }
  0x34   :  { %263 = vmatmul.mubr.f32.gmra.mxu0 %v66_v18 }
  0x35   :  { %408 = vmatmul.mubr.f32.gmra.mxu1 %v68_v19  ;;  %267 = vmatprep.mubr.f32.mxu0 %v71_v20 }
  0x36   :  { %412 = vmatprep.mubr.f32.mxu1 %v73_v21 }
  0x38   :  { %268 = vmatmul.mubr.f32.gmra.mxu0 %v70_v22 }
  0x39   :  { %413 = vmatmul.mubr.f32.gmra.mxu1 %v72_v23  ;;  %272 = vmatprep.mubr.f32.mxu0 %v75_v24 }
  0x3a   :  { %417 = vmatprep.mubr.f32.mxu1 %v77_v25 }
  0x3c   :  { %273 = vmatmul.mubr.f32.gmra.mxu0 %v74_v26 }
  0x3d   :  { %418 = vmatmul.mubr.f32.gmra.mxu1 %v76_v27  ;;  %277 = vmatprep.mubr.f32.mxu0 %v79_v28 }
  0x3e   :  { %422 = vmatprep.mubr.f32.mxu1 %v81_v29 }
  0x40   :  { %278 = vmatmul.mubr.f32.gmra.mxu0 %v78_v30 }
  0x41   :  { %423 = vmatmul.mubr.f32.gmra.mxu1 %v80_v31  ;;  %282 = vmatprep.mubr.f32.mxu0 %v83_v32 }
  0x42   :  { %427 = vmatprep.mubr.f32.mxu1 %v85_v33 }
  0x44   :  { %283 = vmatmul.mubr.f32.gmra.mxu0 %v82_v34 }
  0x45   :  { %428 = vmatmul.mubr.f32.gmra.mxu1 %v84_v35  ;;  %287 = vmatprep.mubr.f32.mxu0 %v87_v36 }
  0x46   :  { %432 = vmatprep.mubr.f32.mxu1 %v89_v37 }
  0x48   :  { %288 = vmatmul.mubr.f32.gmra.mxu0 %v86_v38 }
  0x49   :  { %433 = vmatmul.mubr.f32.gmra.mxu1 %v88_v39  ;;  %292 = vmatprep.mubr.f32.mxu0 %v91_v40 }
  0x4a   :  { %437 = vmatprep.mubr.f32.mxu1 %v93_v41 }
  0x4c   :  { %293 = vmatmul.mubr.f32.gmra.mxu0 %v90_v42 }
  0x4d   :  { %438 = vmatmul.mubr.f32.gmra.mxu1 %v92_v43  ;;  %297 = vmatprep.mubr.f32.mxu0 %v95_v44 }
  0x4e   :  { %442 = vmatprep.mubr.f32.mxu1 %v97_v45 }
  0x50   :  { %298 = vmatmul.mubr.f32.gmra.mxu0 %v94_v46 }
  0x51   :  { %443 = vmatmul.mubr.f32.gmra.mxu1 %v96_v47  ;;  %302 = vmatprep.mubr.f32.mxu0 %v99_v48 }
  0x52   :  { %447 = vmatprep.mubr.f32.mxu1 %v101_v49 }
  0x54   :  { %303 = vmatmul.mubr.f32.gmra.mxu0 %v98_v50 }
  0x55   :  { %448 = vmatmul.mubr.f32.gmra.mxu1 %v100_v51  ;;  %307 = vmatprep.mubr.f32.mxu0 %v103_v52 }
  0x56   :  { %452 = vmatprep.mubr.f32.mxu1 %v105_v53 }
  0x58   :  { %308 = vmatmul.mubr.f32.gmra.mxu0 %v102_v54 }
  0x59   :  { %453 = vmatmul.mubr.f32.gmra.mxu1 %v104_v55  ;;  %312 = vmatprep.mubr.f32.mxu0 %v107_v56 }
  0x5a   :  { %457 = vmatprep.mubr.f32.mxu1 %v109_v57 }
  0x5c   :  { %313 = vmatmul.mubr.f32.gmra.mxu0 %v106_v58 }
  0x5d   :  { %458 = vmatmul.mubr.f32.gmra.mxu1 %v108_v59  ;;  %317 = vmatprep.mubr.f32.mxu0 %v111_v60 }
  0x5e   :  { %462 = vmatprep.mubr.f32.mxu1 %v113_v61 }
  0x60   :  { %318 = vmatmul.mubr.f32.gmra.mxu0 %v110_v62 }
  0x61   :  { %463 = vmatmul.mubr.f32.gmra.mxu1 %v112_v63 }
  0xe4   :  { %v611_v0 = vpop.f32.mrf.mxu0 }
  0xe5   :  { %v691_v1 = vpop.f32.mrf.mxu1 }
  0xe6   :  { %v612_v2 = vpop.f32.mrf.mxu0 }
  0xe7   :  { %v692_v3 = vpop.f32.mrf.mxu1  ;;  %v613_v4 = vadd.f32 %v612_v2, %v611_v0 }
  0xe8   :  { %v693_v5 = vadd.f32 %v692_v3, %v691_v1  ;;  %v614_v7 = vpop.f32.mrf.mxu0 }
  0xe9   :  { %v694_v8 = vpop.f32.mrf.mxu1 }
  0xea   :  { %v390_v9 = vadd.f32 %v693_v5, %v613_v4  ;;  %v615_v10 = vpop.f32.mrf.mxu0 }
  0xeb   :  { %v695_v11 = vpop.f32.mrf.mxu1  ;;  %v616_v13 = vadd.f32 %v615_v10, %v614_v7 }
  0xec   :  { %v526_v12 = vadd.f32 %v1146_v6, %v390_v9  ;;  %v696_v14 = vadd.f32 %v695_v11, %v694_v8  ;;  %v617_v15 = vpop.f32.mrf.mxu0 }
  0xed   :  { %v697_v16 = vpop.f32.mrf.mxu1 }
  0xee   :  { %v542_v17 = vmax.f32 %v526_v12, 0.0  ;;  %v395_v18 = vadd.f32 %v696_v14, %v616_v13  ;;  %v618_v19 = vpop.f32.mrf.mxu0 }
  0xef   :  { %v698_v20 = vpop.f32.mrf.mxu1  ;;  %v619_v22 = vadd.f32 %v618_v19, %v617_v15 }
  0xf0   :  { %558 = vst [vmem:[%s1215_s3] sm:$0xff] %v542_v17  ;;  %v527_v21 = vadd.f32 %v1146_v6, %v395_v18  ;;  %v699_v23 = vadd.f32 %v698_v20, %v697_v16  ;;  %v620_v24 = vpop.f32.mrf.mxu0 }
  0xf1   :  { %v700_v25 = vpop.f32.mrf.mxu1 }
  0xf2   :  { %v543_v26 = vmax.f32 %v527_v21, 0.0  ;;  %v400_v27 = vadd.f32 %v699_v23, %v619_v22  ;;  %v621_v28 = vpop.f32.mrf.mxu0 }
  0xf3   :  { %v701_v29 = vpop.f32.mrf.mxu1  ;;  %v622_v31 = vadd.f32 %v621_v28, %v620_v24 }
  0xf4   :  { %559 = vst [vmem:[%s1215_s3 + $0x8] sm:$0xff] %v543_v26  ;;  %v528_v30 = vadd.f32 %v1146_v6, %v400_v27  ;;  %v702_v32 = vadd.f32 %v701_v29, %v700_v25  ;;  %v623_v33 = vpop.f32.mrf.mxu0 }
  0xf5   :  { %v703_v34 = vpop.f32.mrf.mxu1 }
  0xf6   :  { %v544_v35 = vmax.f32 %v528_v30, 0.0  ;;  %v405_v36 = vadd.f32 %v702_v32, %v622_v31  ;;  %v624_v37 = vpop.f32.mrf.mxu0 }
  0xf7   :  { %v704_v38 = vpop.f32.mrf.mxu1  ;;  %v625_v40 = vadd.f32 %v624_v37, %v623_v33 }
  0xf8   :  { %560 = vst [vmem:[%s1215_s3 + $0x10] sm:$0xff] %v544_v35  ;;  %v529_v39 = vadd.f32 %v1146_v6, %v405_v36  ;;  %v705_v41 = vadd.f32 %v704_v38, %v703_v34  ;;  %v626_v42 = vpop.f32.mrf.mxu0 }
  0xf9   :  { %v706_v43 = vpop.f32.mrf.mxu1 }
  0xfa   :  { %v545_v44 = vmax.f32 %v529_v39, 0.0  ;;  %v410_v45 = vadd.f32 %v705_v41, %v625_v40  ;;  %v627_v46 = vpop.f32.mrf.mxu0 }
  0xfb   :  { %v707_v47 = vpop.f32.mrf.mxu1  ;;  %v628_v49 = vadd.f32 %v627_v46, %v626_v42 }
  0xfc   :  { %561 = vst [vmem:[%s1215_s3 + $0x18] sm:$0xff] %v545_v44  ;;  %v530_v48 = vadd.f32 %v1146_v6, %v410_v45  ;;  %v708_v50 = vadd.f32 %v707_v47, %v706_v43  ;;  %v629_v51 = vpop.f32.mrf.mxu0 }
  0xfd   :  { %v709_v52 = vpop.f32.mrf.mxu1 }
  0xfe   :  { %v546_v53 = vmax.f32 %v530_v48, 0.0  ;;  %v415_v54 = vadd.f32 %v708_v50, %v628_v49  ;;  %v630_v55 = vpop.f32.mrf.mxu0 }
  0xff   :  { %v710_v56 = vpop.f32.mrf.mxu1  ;;  %v631_v58 = vadd.f32 %v630_v55, %v629_v51 }
 0x100   :  { %562 = vst [vmem:[%s1215_s3 + $0x20] sm:$0xff] %v546_v53  ;;  %v531_v57 = vadd.f32 %v1146_v6, %v415_v54  ;;  %v711_v59 = vadd.f32 %v710_v56, %v709_v52  ;;  %v632_v60 = vpop.f32.mrf.mxu0 }
 0x101   :  { %v712_v61 = vpop.f32.mrf.mxu1 }
 0x102   :  { %v547_v62 = vmax.f32 %v531_v57, 0.0  ;;  %v420_v63 = vadd.f32 %v711_v59, %v631_v58  ;;  %v633_v0 = vpop.f32.mrf.mxu0 }
 0x103   :  { %v713_v1 = vpop.f32.mrf.mxu1  ;;  %v634_v3 = vadd.f32 %v633_v0, %v632_v60 }
 0x104   :  { %563 = vst [vmem:[%s1215_s3 + $0x28] sm:$0xff] %v547_v62  ;;  %v532_v2 = vadd.f32 %v1146_v6, %v420_v63  ;;  %v714_v4 = vadd.f32 %v713_v1, %v712_v61  ;;  %v635_v5 = vpop.f32.mrf.mxu0 }
 0x105   :  { %v715_v7 = vpop.f32.mrf.mxu1 }
 0x106   :  { %v548_v8 = vmax.f32 %v532_v2, 0.0  ;;  %v425_v9 = vadd.f32 %v714_v4, %v634_v3  ;;  %v636_v10 = vpop.f32.mrf.mxu0 }
 0x107   :  { %v716_v11 = vpop.f32.mrf.mxu1  ;;  %v637_v13 = vadd.f32 %v636_v10, %v635_v5 }
 0x108   :  { %564 = vst [vmem:[%s1215_s3 + $0x30] sm:$0xff] %v548_v8  ;;  %v533_v12 = vadd.f32 %v1146_v6, %v425_v9  ;;  %v717_v14 = vadd.f32 %v716_v11, %v715_v7  ;;  %v638_v15 = vpop.f32.mrf.mxu0 }
 0x109   :  { %v718_v16 = vpop.f32.mrf.mxu1 }
 0x10a   :  { %v549_v17 = vmax.f32 %v533_v12, 0.0  ;;  %v430_v18 = vadd.f32 %v717_v14, %v637_v13  ;;  %v639_v19 = vpop.f32.mrf.mxu0 }
 0x10b   :  { %v719_v20 = vpop.f32.mrf.mxu1  ;;  %v640_v22 = vadd.f32 %v639_v19, %v638_v15 }
 0x10c   :  { %565 = vst [vmem:[%s1215_s3 + $0x38] sm:$0xff] %v549_v17  ;;  %v534_v21 = vadd.f32 %v1146_v6, %v430_v18  ;;  %v720_v23 = vadd.f32 %v719_v20, %v718_v16  ;;  %v641_v24 = vpop.f32.mrf.mxu0 }
 0x10d   :  { %v721_v25 = vpop.f32.mrf.mxu1 }
 0x10e   :  { %v550_v26 = vmax.f32 %v534_v21, 0.0  ;;  %v435_v27 = vadd.f32 %v720_v23, %v640_v22  ;;  %v642_v28 = vpop.f32.mrf.mxu0 }
 0x10f   :  { %v722_v29 = vpop.f32.mrf.mxu1  ;;  %v643_v31 = vadd.f32 %v642_v28, %v641_v24 }
 0x110   :  { %566 = vst [vmem:[%s1215_s3 + $0x40] sm:$0xff] %v550_v26  ;;  %v535_v30 = vadd.f32 %v1146_v6, %v435_v27  ;;  %v723_v32 = vadd.f32 %v722_v29, %v721_v25  ;;  %v644_v33 = vpop.f32.mrf.mxu0 }
 0x111   :  { %v724_v34 = vpop.f32.mrf.mxu1 }
 0x112   :  { %v551_v35 = vmax.f32 %v535_v30, 0.0  ;;  %v440_v36 = vadd.f32 %v723_v32, %v643_v31  ;;  %v645_v37 = vpop.f32.mrf.mxu0 }
 0x113   :  { %v725_v38 = vpop.f32.mrf.mxu1  ;;  %v646_v40 = vadd.f32 %v645_v37, %v644_v33 }
 0x114   :  { %567 = vst [vmem:[%s1215_s3 + $0x48] sm:$0xff] %v551_v35  ;;  %v536_v39 = vadd.f32 %v1146_v6, %v440_v36  ;;  %v726_v41 = vadd.f32 %v725_v38, %v724_v34  ;;  %v647_v42 = vpop.f32.mrf.mxu0 }
 0x115   :  { %v727_v43 = vpop.f32.mrf.mxu1 }
 0x116   :  { %v552_v44 = vmax.f32 %v536_v39, 0.0  ;;  %v445_v45 = vadd.f32 %v726_v41, %v646_v40  ;;  %v648_v46 = vpop.f32.mrf.mxu0 }
 0x117   :  { %v728_v47 = vpop.f32.mrf.mxu1  ;;  %v649_v49 = vadd.f32 %v648_v46, %v647_v42 }
 0x118   :  { %568 = vst [vmem:[%s1215_s3 + $0x50] sm:$0xff] %v552_v44  ;;  %v537_v48 = vadd.f32 %v1146_v6, %v445_v45  ;;  %v729_v50 = vadd.f32 %v728_v47, %v727_v43  ;;  %v650_v51 = vpop.f32.mrf.mxu0 }
 0x119   :  { %v730_v52 = vpop.f32.mrf.mxu1 }
 0x11a   :  { %v553_v53 = vmax.f32 %v537_v48, 0.0  ;;  %v450_v54 = vadd.f32 %v729_v50, %v649_v49  ;;  %v651_v55 = vpop.f32.mrf.mxu0 }
 0x11b   :  { %v731_v56 = vpop.f32.mrf.mxu1  ;;  %v652_v58 = vadd.f32 %v651_v55, %v650_v51 }
 0x11c   :  { %569 = vst [vmem:[%s1215_s3 + $0x58] sm:$0xff] %v553_v53  ;;  %v538_v57 = vadd.f32 %v1146_v6, %v450_v54  ;;  %v732_v59 = vadd.f32 %v731_v56, %v730_v52  ;;  %v653_v60 = vpop.f32.mrf.mxu0 }
 0x11d   :  { %v733_v61 = vpop.f32.mrf.mxu1 }
 0x11e   :  { %v554_v62 = vmax.f32 %v538_v57, 0.0  ;;  %v455_v63 = vadd.f32 %v732_v59, %v652_v58  ;;  %v654_v0 = vpop.f32.mrf.mxu0 }
 0x11f   :  { %v734_v1 = vpop.f32.mrf.mxu1  ;;  %v655_v3 = vadd.f32 %v654_v0, %v653_v60 }
 0x120   :  { %570 = vst [vmem:[%s1215_s3 + $0x60] sm:$0xff] %v554_v62  ;;  %v539_v2 = vadd.f32 %v1146_v6, %v455_v63  ;;  %v735_v4 = vadd.f32 %v734_v1, %v733_v61  ;;  %v656_v5 = vpop.f32.mrf.mxu0 }
 0x121   :  { %v736_v7 = vpop.f32.mrf.mxu1 }
 0x122   :  { %v555_v8 = vmax.f32 %v539_v2, 0.0  ;;  %v460_v9 = vadd.f32 %v735_v4, %v655_v3  ;;  %v657_v10 = vpop.f32.mrf.mxu0 }
 0x123   :  { %v737_v11 = vpop.f32.mrf.mxu1  ;;  %v658_v13 = vadd.f32 %v657_v10, %v656_v5 }
 0x124   :  { %571 = vst [vmem:[%s1215_s3 + $0x68] sm:$0xff] %v555_v8  ;;  %v540_v12 = vadd.f32 %v1146_v6, %v460_v9  ;;  %v738_v14 = vadd.f32 %v737_v11, %v736_v7 }
 0x126   :  { %v556_v15 = vmax.f32 %v540_v12, 0.0  ;;  %v465_v16 = vadd.f32 %v738_v14, %v658_v13 }
 0x128   :  { %572 = vst [vmem:[%s1215_s3 + $0x70] sm:$0xff] %v556_v15  ;;  %v541_v17 = vadd.f32 %v1146_v6, %v465_v16 }
 0x12a   :  { %v557_v18 = vmax.f32 %v541_v17, 0.0 }
 0x12c   :  { %573 = vst [vmem:[%s1215_s3 + $0x78] sm:$0xff] %v557_v18 }

// kernel: sub.1
= control target key start
LH: loop header
LB: loop body
LE: loop exit
PB: predicated region body
PF: predicated region fallthrough
CT: control target
= control target key end

     0   :  { %s20_s0 = inlined_call_operand.<no memory space> [shape: f32[], index: 0, kind: input, shape index: {}]   ;;  %s21_s1 = inlined_call_operand.vmem [shape: f32[192], index: 1, kind: output, shape index: {}]  }
   0x1   :  { %v2_v0 = vstv %s20_s0 }
   0x2   :  { %3 = vst [vmem:[%s21_s1] sm:$0x3] %v2_v0 }

// kernel: _lambda_.28
= control target key start
LH: loop header
LB: loop body
LE: loop exit
PB: predicated region body
PF: predicated region fallthrough
CT: control target
= control target key end

     0   :  { %s250_s6 = smov 0   ;;  %s267_s0 = inlined_call_operand.vmem [shape: f32[6,2,7,192], index: 0, kind: input, shape index: {}]   ;;  %s268_s1 = inlined_call_operand.vmem [shape: f32[4,7,192], index: 1, kind: output, shape index: {}]  }
   0x1 LB: > { %s210_s7 = sadd.s32 4294967295, %s238_s6   ;;  %p214_p0 = scmp.ge.s32.totalorder %s238_s6, 1  ;;  %s238_s6 = sphi %s250_s6, %s11_s6  }
   0x2   : > { %p89_p1 = scmp.lt.s32.totalorder %s238_s6, 3 }
   0x4   : > { %p90_p2 = pnand %p214_p0, %p89_p1 }
   0x5   : > { %s111_s8 = smul.u32 (!%p90_p2), 3, %s210_s7  ;;  %s217_s9 = sshll.u32 (!%p90_p2), %s210_s7, 1 }
   0x6   : > { %93 = sbr.rel (%p90_p2) target bundleno = 23 (0x17), region = 24  ;;  %p119_p3 = scmp.lt.s32.totalorder (!%p90_p2), %s217_s9, 3 }
   0x7   : > { %p112_p4 = scmp.lt.s32.totalorder (!%p90_p2), %s111_s8, 5 }
   0xb   : > { %s270_s9 = smov (!%p119_p3, %s217_s9), 3  ;;  %s272_s8 = smov (!%p112_p4, %s111_s8), 5  ;;  %vm148_vm0 = vcmask 522240  }
   0xc   : > { %s222_s10 = sshll.u32 %s272_s8, 5  ;;  %s223_s14 = sshll.u32 %s270_s9, 4 }
   0xd   : > { %s116_s13 = scalar_lea.vmem %s267_s0, %s222_s10  ;;  %s123_s17 = scalar_lea.vmem %s268_s1, %s223_s14 }
   0xe   : > { %v125_v0 = vld [vmem:[%s116_s13] sm:$0x7f]  ;;  %v127_v1 = vld [vmem:[%s116_s13 + $0x10] sm:$0x7f]  ;;  %v126_v5 = vld [vmem:[%s116_s13 + $0x8] sm:$0x7f] }
   0xf   : > { %v129_v2 = vld [vmem:[%s116_s13 + $0x20] sm:$0x7f]  ;;  %v131_v3 = vld [vmem:[%s116_s13 + $0x30] sm:$0x7f]  ;;  %v137_v4 = vmax.f32 %v125_v0, %v127_v1  ;;  %v128_v6 = vld [vmem:[%s116_s13 + $0x18] sm:$0x7f] }
  0x10   : > { %v139_v7 = vmax.f32 %v129_v2, %v131_v3  ;;  %v130_v8 = vld [vmem:[%s116_s13 + $0x28] sm:$0x7f]  ;;  %v132_v9 = vld [vmem:[%s116_s13 + $0x38] sm:$0x7f]  ;;  %v138_v10 = vmax.f32 %v126_v5, %v128_v6  ;;  %v133_v11 = vld [vmem:[%s116_s13 + $0x40] sm:$0x7f] }
  0x11   : > { %v140_v12 = vmax.f32 %v130_v8, %v132_v9  ;;  %v135_v13 = vld [vmem:[%s116_s13 + $0x50] sm:$0x7f]  ;;  %v134_v14 = vld [vmem:[%s116_s13 + $0x48] sm:$0x7f]  ;;  %v136_v15 = vld [vmem:[%s116_s13 + $0x58] sm:$0x7f] }
  0x12   : > { %v143_v16 = vmax.f32 %v137_v4, %v139_v7  ;;  %v141_v17 = vmax.f32 %v133_v11, %v135_v13  ;;  %v142_v18 = vmax.f32 %v134_v14, %v136_v15 }
  0x13   : > { %v144_v19 = vmax.f32 %v138_v10, %v140_v12 }
  0x14   : > { %147 = vst [vmem:[%s123_s17] sm:$0x7f] %v143_v16  ;;  %v145_v20 = vmax.f32 %v139_v7, %v141_v17  ;;  %v146_v21 = vmax.f32 %v140_v12, %v142_v18 }
  0x15   : > { %149 = vst.msk [vmem:[%s123_s17 + $0x8] sm:$0x7f] %vm148_vm0, %v144_v19 }
  0x16   : > { %150 = vst [vmem:[%s123_s17 + $0x10] sm:$0x7f] %v145_v20  ;;  %151 = vst.msk [vmem:[%s123_s17 + $0x18] sm:$0x7f] %vm148_vm0, %v146_v21 }
  0x17 PF: > { %s11_s6 = sadd.s32 1, %s238_s6  }
  0x18   : > { %p8_p5 = scmp.ge.s32.totalorder %s11_s6, 4  }
  0x1a   :  { %10 = sbr.rel (!%p8_p5) target bundleno = 1 (0x1), region = 54 }

// kernel: _lambda_.27
= control target key start
LH: loop header
LB: loop body
LE: loop exit
PB: predicated region body
PF: predicated region fallthrough
CT: control target
= control target key end

     0   :  { %s1195_s12 = smov 0   ;;  %s1197_s13 = smov 0   ;;  %s1565_s0 = inlined_call_operand.vmem [shape: f32[128,1792], index: 0, kind: input, shape index: {}]   ;;  %s1566_s1 = inlined_call_operand.vmem [shape: f32[1792,256], index: 1, kind: input, shape index: {}]   ;;  %s1567_s2 = inlined_call_operand.vmem [shape: f32[1,256], index: 2, kind: input, shape index: {}]   ;;  %s1568_s3 = inlined_call_operand.vmem [shape: f32[128,256], index: 3, kind: output, shape index: {}]  }
   0x1   :  { %s1199_s14 = smov 0   ;;  %s1201_s15 = smov 0  }
   0x2   :  { %s1203_s16 = smov 0  }
   0x3 LB: > { %s25_s17 = sadd.s32 1, %s1168_s15  ;;  %p48_p1 = scmp.ne.s32.totalorder %s1160_s13, %s1156_s12  ;;  %s1172_s16 = sphi %s1203_s16, %s13_s16   ;;  %s1168_s15 = sphi %s1201_s15, %s1572_s15   ;;  %s1164_s14 = sphi %s1199_s14, %s1571_s14   ;;  %s1160_s13 = sphi %s1197_s13, %s1570_s13   ;;  %s1156_s12 = sphi %s1195_s12, %s1569_s12  }
   0x4   : > { %p26_p0 = scmp.ge.s32.totalorder %s25_s17, 7  ;;  %p49_p2 = scmp.eq.s32.totalorder %s1172_s16, 0 }
   0x5   : > { %s41_s19 = sadd.s32 1, %s1160_s13  ;;  %p1012_p5 = scmp.ge.s32.totalorder %s1172_s16, 7 }
   0x6   : > { %s1574_s17 = smov (%p26_p0, %s25_s17), 0  ;;  %p50_p3 = por %p49_p2, %p48_p1 }
   0x7   : > { %s37_s18 = ssub.s32 %s1168_s15, %s1574_s17  ;;  %164 = sbr.rel (%p1012_p5) target bundleno = 32 (0x20), region = 20 }
   0x8   : > { %p39_p4 = scmp.eq.s32.totalorder %s37_s18, 0 }
   0xa   : > { %s1230_s20 = scalar_select %p39_p4, %s1160_s13, %s41_s19  }
   0xc   : > { %167 = sbr.rel (!%p50_p3) target bundleno = 32 (0x20), region = 24  ;;  %s169_s21 = sand.u32 (%p50_p3), 1, %s1160_s13  }
   0xd   : > { %s1027_s22 = sshll.u32 (%p50_p3), %s1168_s15, 4  ;;  %s1013_s23 = sshll.u32 (%p50_p3), %s169_s21, 8 }
   0xe   : > { %s1238_s26 = scalar_lea.vmem (%p50_p3), %s1565_s0, %s1027_s22  ;;  %s1243_s27 = scalar_lea.vmem (%p50_p3), [#allocation3], %s1013_s23 }
   0xf   : > { %v190_v0 = vld [vmem:[%s1238_s26] sm:$0xff] (%p50_p3)  ;;  %v192_v1 = vld [vmem:[%s1238_s26 + $0x8] sm:$0xff] (%p50_p3)  ;;  %v194_v2 = vld [vmem:[%s1238_s26 + $0x70] sm:$0xff] (%p50_p3) }
  0x10   : > { %191 = vst [vmem:[%s1243_s27] sm:$0xff] (%p50_p3), %v190_v0  ;;  %193 = vst [vmem:[%s1243_s27 + $0x8] sm:$0xff] (%p50_p3), %v192_v1  ;;  %v196_v3 = vld [vmem:[%s1238_s26 + $0x78] sm:$0xff] (%p50_p3)  ;;  %v198_v4 = vld [vmem:[%s1238_s26 + $0xe0] sm:$0xff] (%p50_p3) }
  0x11   : > { %195 = vst [vmem:[%s1243_s27 + $0x10] sm:$0xff] %v194_v2  ;;  %v200_v5 = vld [vmem:[%s1238_s26 + $0xe8] sm:$0xff]  ;;  %197 = vst [vmem:[%s1243_s27 + $0x18] sm:$0xff] %v196_v3  ;;  %v202_v6 = vld [vmem:[%s1238_s26 + $0x150] sm:$0xff] }
  0x12   : > { %199 = vst [vmem:[%s1243_s27 + $0x20] sm:$0xff] %v198_v4  ;;  %201 = vst [vmem:[%s1243_s27 + $0x28] sm:$0xff] %v200_v5  ;;  %v204_v7 = vld [vmem:[%s1238_s26 + $0x158] sm:$0xff]  ;;  %v206_v8 = vld [vmem:[%s1238_s26 + $0x1c0] sm:$0xff] }
  0x13   : > { %203 = vst [vmem:[%s1243_s27 + $0x30] sm:$0xff] %v202_v6  ;;  %205 = vst [vmem:[%s1243_s27 + $0x38] sm:$0xff] %v204_v7  ;;  %v208_v9 = vld [vmem:[%s1238_s26 + $0x1c8] sm:$0xff]  ;;  %v210_v10 = vld [vmem:[%s1238_s26 + $0x230] sm:$0xff] }
  0x14   : > { %207 = vst [vmem:[%s1243_s27 + $0x40] sm:$0xff] %v206_v8  ;;  %v212_v11 = vld [vmem:[%s1238_s26 + $0x238] sm:$0xff]  ;;  %209 = vst [vmem:[%s1243_s27 + $0x48] sm:$0xff] %v208_v9  ;;  %v214_v12 = vld [vmem:[%s1238_s26 + $0x2a0] sm:$0xff] }
  0x15   : > { %211 = vst [vmem:[%s1243_s27 + $0x50] sm:$0xff] %v210_v10  ;;  %213 = vst [vmem:[%s1243_s27 + $0x58] sm:$0xff] %v212_v11  ;;  %v216_v13 = vld [vmem:[%s1238_s26 + $0x2a8] sm:$0xff]  ;;  %v218_v14 = vld [vmem:[%s1238_s26 + $0x310] sm:$0xff] }
  0x16   : > { %215 = vst [vmem:[%s1243_s27 + $0x60] sm:$0xff] %v214_v12  ;;  %217 = vst [vmem:[%s1243_s27 + $0x68] sm:$0xff] %v216_v13  ;;  %v220_v15 = vld [vmem:[%s1238_s26 + $0x318] sm:$0xff]  ;;  %v222_v16 = vld [vmem:[%s1238_s26 + $0x380] sm:$0xff] }
  0x17   : > { %219 = vst [vmem:[%s1243_s27 + $0x70] sm:$0xff] %v218_v14  ;;  %v224_v17 = vld [vmem:[%s1238_s26 + $0x388] sm:$0xff]  ;;  %221 = vst [vmem:[%s1243_s27 + $0x78] sm:$0xff] %v220_v15  ;;  %v226_v18 = vld [vmem:[%s1238_s26 + $0x3f0] sm:$0xff] }
  0x18   : > { %223 = vst [vmem:[%s1243_s27 + $0x80] sm:$0xff] %v222_v16  ;;  %225 = vst [vmem:[%s1243_s27 + $0x88] sm:$0xff] %v224_v17  ;;  %v228_v19 = vld [vmem:[%s1238_s26 + $0x3f8] sm:$0xff]  ;;  %v230_v20 = vld [vmem:[%s1238_s26 + $0x460] sm:$0xff] }
  0x19   : > { %227 = vst [vmem:[%s1243_s27 + $0x90] sm:$0xff] %v226_v18  ;;  %229 = vst [vmem:[%s1243_s27 + $0x98] sm:$0xff] %v228_v19  ;;  %v232_v21 = vld [vmem:[%s1238_s26 + $0x468] sm:$0xff]  ;;  %v234_v22 = vld [vmem:[%s1238_s26 + $0x4d0] sm:$0xff] }
  0x1a   : > { %231 = vst [vmem:[%s1243_s27 + $0xa0] sm:$0xff] %v230_v20  ;;  %v236_v23 = vld [vmem:[%s1238_s26 + $0x4d8] sm:$0xff]  ;;  %233 = vst [vmem:[%s1243_s27 + $0xa8] sm:$0xff] %v232_v21  ;;  %v238_v24 = vld [vmem:[%s1238_s26 + $0x540] sm:$0xff] }
  0x1b   : > { %235 = vst [vmem:[%s1243_s27 + $0xb0] sm:$0xff] %v234_v22  ;;  %237 = vst [vmem:[%s1243_s27 + $0xb8] sm:$0xff] %v236_v23  ;;  %v240_v25 = vld [vmem:[%s1238_s26 + $0x548] sm:$0xff]  ;;  %v242_v26 = vld [vmem:[%s1238_s26 + $0x5b0] sm:$0xff] }
  0x1c   : > { %239 = vst [vmem:[%s1243_s27 + $0xc0] sm:$0xff] %v238_v24  ;;  %241 = vst [vmem:[%s1243_s27 + $0xc8] sm:$0xff] %v240_v25  ;;  %v244_v27 = vld [vmem:[%s1238_s26 + $0x5b8] sm:$0xff]  ;;  %v246_v28 = vld [vmem:[%s1238_s26 + $0x620] sm:$0xff] }
  0x1d   : > { %243 = vst [vmem:[%s1243_s27 + $0xd0] sm:$0xff] %v242_v26  ;;  %v248_v29 = vld [vmem:[%s1238_s26 + $0x628] sm:$0xff]  ;;  %245 = vst [vmem:[%s1243_s27 + $0xd8] sm:$0xff] %v244_v27  ;;  %v250_v30 = vld [vmem:[%s1238_s26 + $0x690] sm:$0xff] }
  0x1e   : > { %247 = vst [vmem:[%s1243_s27 + $0xe0] sm:$0xff] %v246_v28  ;;  %249 = vst [vmem:[%s1243_s27 + $0xe8] sm:$0xff] %v248_v29  ;;  %v252_v31 = vld [vmem:[%s1238_s26 + $0x698] sm:$0xff] }
  0x1f   : > { %251 = vst [vmem:[%s1243_s27 + $0xf0] sm:$0xff] %v250_v30  ;;  %253 = vst [vmem:[%s1243_s27 + $0xf8] sm:$0xff] %v252_v31 }
  0x20 PF: > { %p1016_p6 = scmp.ge.s32.totalorder %s1172_s16, 1  ;;  %p273_p7 = scmp.lt.s32.totalorder %s1172_s16, 8 }
  0x22   : > { %p274_p8 = pnand %p1016_p6, %p273_p7 }
  0x23   : > { %s280_s28 = sand.u32 (!%p274_p8), 1, %s1156_s12   ;;  %s1018_s29 = sshll.u32 (!%p274_p8), %s1164_s14, 5 }
  0x24   : > { %277 = sbr.rel (%p274_p8) target bundleno = 384 (0x180), region = 51  ;;  %s1017_s30 = sshll.u32 (!%p274_p8), %s280_s28, 8 }
  0x25   : > { %p326_p9 = scmp.lt.s32.totalorder (!%p274_p8), %s1018_s29, 223  ;;  %s1315_s8 = scalar_lea.vmem (!%p274_p8), [#allocation3], %s1017_s30 }
  0x26   : > { %p1021_p10 = scmp.ne.s32.totalorder (!%p274_p8), %s1164_s14, 0 }
  0x29   : > { %s1576_s29 = smov (!%p326_p9, %s1018_s29), 223  ;;  %356 = sbr.rel (%p1021_p10) target bundleno = 63 (0x3f), region = 59 }
  0x2a   : > { %s1028_s4 = sshll.u32 %s1576_s29, 4 }
  0x2b   : > { %s1313_s7 = scalar_lea.vmem %s1566_s1, %s1028_s4 }
  0x2e   : > { %v1174_v32 = vmov 0.0  }
  0x2f   : > { %357 = vst [vmem:[#allocation2 + $0xb0] sm:$0xff] %v1174_v32  ;;  %358 = vst [vmem:[#allocation2] sm:$0xff] %v1174_v32 }
  0x30   : > { %359 = vst [vmem:[#allocation2 + $0xd8] sm:$0xff] %v1174_v32  ;;  %360 = vst [vmem:[#allocation2 + $0x18] sm:$0xff] %v1174_v32 }
  0x31   : > { %361 = vst [vmem:[#allocation2 + $0x50] sm:$0xff] %v1174_v32  ;;  %362 = vst [vmem:[#allocation2 + $0x68] sm:$0xff] %v1174_v32 }
  0x32   : > { %363 = vst [vmem:[#allocation2 + $0x30] sm:$0xff] %v1174_v32  ;;  %364 = vst [vmem:[#allocation2 + $0x48] sm:$0xff] %v1174_v32 }
  0x33   : > { %365 = vst [vmem:[#allocation2 + $0x80] sm:$0xff] %v1174_v32  ;;  %366 = vst [vmem:[#allocation2 + $0x88] sm:$0xff] %v1174_v32 }
  0x34   : > { %367 = vst [vmem:[#allocation2 + $0xe8] sm:$0xff] %v1174_v32  ;;  %368 = vst [vmem:[#allocation2 + $0xb8] sm:$0xff] %v1174_v32 }
  0x35   : > { %369 = vst [vmem:[#allocation2 + $0x60] sm:$0xff] %v1174_v32  ;;  %370 = vst [vmem:[#allocation2 + $0xf0] sm:$0xff] %v1174_v32 }
  0x36   : > { %371 = vst [vmem:[#allocation2 + $0x8] sm:$0xff] %v1174_v32  ;;  %372 = vst [vmem:[#allocation2 + $0x78] sm:$0xff] %v1174_v32 }
  0x37   : > { %373 = vst [vmem:[#allocation2 + $0x38] sm:$0xff] %v1174_v32  ;;  %374 = vst [vmem:[#allocation2 + $0x58] sm:$0xff] %v1174_v32 }
  0x38   : > { %375 = vst [vmem:[#allocation2 + $0x40] sm:$0xff] %v1174_v32  ;;  %376 = vst [vmem:[#allocation2 + $0xc8] sm:$0xff] %v1174_v32 }
  0x39   : > { %377 = vst [vmem:[#allocation2 + $0xe0] sm:$0xff] %v1174_v32  ;;  %378 = vst [vmem:[#allocation2 + $0x90] sm:$0xff] %v1174_v32 }
  0x3a   : > { %379 = vst [vmem:[#allocation2 + $0x70] sm:$0xff] %v1174_v32  ;;  %380 = vst [vmem:[#allocation2 + $0xc0] sm:$0xff] %v1174_v32 }
  0x3b   : > { %381 = vst [vmem:[#allocation2 + $0xa8] sm:$0xff] %v1174_v32  ;;  %382 = vst [vmem:[#allocation2 + $0xd0] sm:$0xff] %v1174_v32 }
  0x3c   : > { %383 = vst [vmem:[#allocation2 + $0x10] sm:$0xff] %v1174_v32  ;;  %384 = vst [vmem:[#allocation2 + $0x28] sm:$0xff] %v1174_v32 }
  0x3d   : > { %385 = vst [vmem:[#allocation2 + $0xa0] sm:$0xff] %v1174_v32  ;;  %386 = vst [vmem:[#allocation2 + $0xf8] sm:$0xff] %v1174_v32 }
  0x3e   : > { %387 = vst [vmem:[#allocation2 + $0x20] sm:$0xff] %v1174_v32  ;;  %388 = vst [vmem:[#allocation2 + $0x98] sm:$0xff] %v1174_v32 }
  0x3f PF: > { %v484_v33 = vld [vmem:[%s1313_s7 + $0xf8] sm:$0xff]  ;;  %v483_v34 = vld [vmem:[%s1313_s7 + $0xf0] sm:$0xff]  ;;  %v482_v35 = vld [vmem:[%s1313_s7 + $0xe8] sm:$0xff]  ;;  %p1022_p11 = scmp.ne.s32.totalorder %s1164_s14, 6 }
  0x40   : > { %517 = vmatprep.subr.mxu0 %v484_v33  ;;  %1029 = vmatprep.subr.mxu1 %v484_v33  ;;  %v481_v36 = vld [vmem:[%s1313_s7 + $0xe0] sm:$0xff]  ;;  %v480_v37 = vld [vmem:[%s1313_s7 + $0xd8] sm:$0xff]  ;;  %v479_v38 = vld [vmem:[%s1313_s7 + $0xd0] sm:$0xff] }
  0x41   : > { %518 = vmatpush1.msra.mxu0 %v483_v34  ;;  %1061 = vmatpush1.msra.mxu1 %v483_v34  ;;  %v478_v39 = vld [vmem:[%s1313_s7 + $0xc8] sm:$0xff]  ;;  %v477_v40 = vld [vmem:[%s1313_s7 + $0xc0] sm:$0xff]  ;;  %v476_v41 = vld [vmem:[%s1313_s7 + $0xb8] sm:$0xff] }
  0x42   : > { %519 = vmatprep.subr.mxu0 %v482_v35  ;;  %1030 = vmatprep.subr.mxu1 %v482_v35  ;;  %v475_v42 = vld [vmem:[%s1313_s7 + $0xb0] sm:$0xff]  ;;  %v474_v43 = vld [vmem:[%s1313_s7 + $0xa8] sm:$0xff]  ;;  %v473_v44 = vld [vmem:[%s1313_s7 + $0xa0] sm:$0xff] }
  0x43   : > { %520 = vmatpush1.msra.mxu0 %v481_v36  ;;  %1062 = vmatpush1.msra.mxu1 %v481_v36  ;;  %v472_v45 = vld [vmem:[%s1313_s7 + $0x98] sm:$0xff]  ;;  %v471_v46 = vld [vmem:[%s1313_s7 + $0x90] sm:$0xff]  ;;  %v470_v47 = vld [vmem:[%s1313_s7 + $0x88] sm:$0xff] }
  0x44   : > { %521 = vmatprep.subr.mxu0 %v480_v37  ;;  %1031 = vmatprep.subr.mxu1 %v480_v37  ;;  %v469_v48 = vld [vmem:[%s1313_s7 + $0x80] sm:$0xff]  ;;  %v468_v49 = vld [vmem:[%s1313_s7 + $0x78] sm:$0xff]  ;;  %v467_v50 = vld [vmem:[%s1313_s7 + $0x70] sm:$0xff] }
  0x45   : > { %522 = vmatpush1.msra.mxu0 %v479_v38  ;;  %1063 = vmatpush1.msra.mxu1 %v479_v38  ;;  %v466_v51 = vld [vmem:[%s1313_s7 + $0x68] sm:$0xff]  ;;  %v465_v52 = vld [vmem:[%s1313_s7 + $0x60] sm:$0xff]  ;;  %v464_v53 = vld [vmem:[%s1313_s7 + $0x58] sm:$0xff] }
  0x46   : > { %523 = vmatprep.subr.mxu0 %v478_v39  ;;  %1032 = vmatprep.subr.mxu1 %v478_v39  ;;  %v463_v54 = vld [vmem:[%s1313_s7 + $0x50] sm:$0xff]  ;;  %v462_v55 = vld [vmem:[%s1313_s7 + $0x48] sm:$0xff]  ;;  %v461_v56 = vld [vmem:[%s1313_s7 + $0x40] sm:$0xff] }
  0x47   : > { %524 = vmatpush1.msra.mxu0 %v477_v40  ;;  %1064 = vmatpush1.msra.mxu1 %v477_v40  ;;  %v460_v57 = vld [vmem:[%s1313_s7 + $0x38] sm:$0xff]  ;;  %v459_v58 = vld [vmem:[%s1313_s7 + $0x30] sm:$0xff]  ;;  %v458_v59 = vld [vmem:[%s1313_s7 + $0x28] sm:$0xff] }
  0x48   : > { %525 = vmatprep.subr.mxu0 %v476_v41  ;;  %1033 = vmatprep.subr.mxu1 %v476_v41  ;;  %v457_v60 = vld [vmem:[%s1313_s7 + $0x20] sm:$0xff]  ;;  %v456_v61 = vld [vmem:[%s1313_s7 + $0x18] sm:$0xff]  ;;  %v455_v62 = vld [vmem:[%s1313_s7 + $0x10] sm:$0xff] }
  0x49   : > { %526 = vmatpush1.msra.mxu0 %v475_v42  ;;  %1065 = vmatpush1.msra.mxu1 %v475_v42  ;;  %v454_v63 = vld [vmem:[%s1313_s7 + $0x8] sm:$0xff]  ;;  %v453_v0 = vld [vmem:[%s1313_s7] sm:$0xff]  ;;  %v516_v1 = vld [vmem:[%s1313_s7 + $0x1f8] sm:$0xff] }
  0x4a   : > { %527 = vmatprep.subr.mxu0 %v474_v43  ;;  %1034 = vmatprep.subr.mxu1 %v474_v43  ;;  %v515_v2 = vld [vmem:[%s1313_s7 + $0x1f0] sm:$0xff]  ;;  %v514_v3 = vld [vmem:[%s1313_s7 + $0x1e8] sm:$0xff]  ;;  %v513_v4 = vld [vmem:[%s1313_s7 + $0x1e0] sm:$0xff] }
  0x4b   : > { %528 = vmatpush1.msra.mxu0 %v473_v44  ;;  %1066 = vmatpush1.msra.mxu1 %v473_v44  ;;  %v512_v5 = vld [vmem:[%s1313_s7 + $0x1d8] sm:$0xff]  ;;  %v511_v6 = vld [vmem:[%s1313_s7 + $0x1d0] sm:$0xff]  ;;  %v510_v7 = vld [vmem:[%s1313_s7 + $0x1c8] sm:$0xff] }
  0x4c   : > { %529 = vmatprep.subr.mxu0 %v472_v45  ;;  %1035 = vmatprep.subr.mxu1 %v472_v45  ;;  %v509_v8 = vld [vmem:[%s1313_s7 + $0x1c0] sm:$0xff]  ;;  %v508_v9 = vld [vmem:[%s1313_s7 + $0x1b8] sm:$0xff]  ;;  %v507_v10 = vld [vmem:[%s1313_s7 + $0x1b0] sm:$0xff] }
  0x4d   : > { %530 = vmatpush1.msra.mxu0 %v471_v46  ;;  %1067 = vmatpush1.msra.mxu1 %v471_v46  ;;  %v506_v11 = vld [vmem:[%s1313_s7 + $0x1a8] sm:$0xff]  ;;  %v505_v12 = vld [vmem:[%s1313_s7 + $0x1a0] sm:$0xff]  ;;  %v504_v13 = vld [vmem:[%s1313_s7 + $0x198] sm:$0xff] }
  0x4e   : > { %531 = vmatprep.subr.mxu0 %v470_v47  ;;  %1036 = vmatprep.subr.mxu1 %v470_v47  ;;  %v503_v14 = vld [vmem:[%s1313_s7 + $0x190] sm:$0xff]  ;;  %v502_v15 = vld [vmem:[%s1313_s7 + $0x188] sm:$0xff]  ;;  %v501_v16 = vld [vmem:[%s1313_s7 + $0x180] sm:$0xff] }
  0x4f   : > { %532 = vmatpush1.msra.mxu0 %v469_v48  ;;  %1068 = vmatpush1.msra.mxu1 %v469_v48  ;;  %v500_v17 = vld [vmem:[%s1313_s7 + $0x178] sm:$0xff]  ;;  %v499_v18 = vld [vmem:[%s1313_s7 + $0x170] sm:$0xff]  ;;  %v498_v19 = vld [vmem:[%s1313_s7 + $0x168] sm:$0xff] }
  0x50   : > { %533 = vmatprep.subr.mxu0 %v468_v49  ;;  %1037 = vmatprep.subr.mxu1 %v468_v49  ;;  %v497_v20 = vld [vmem:[%s1313_s7 + $0x160] sm:$0xff]  ;;  %v496_v21 = vld [vmem:[%s1313_s7 + $0x158] sm:$0xff]  ;;  %v495_v22 = vld [vmem:[%s1313_s7 + $0x150] sm:$0xff] }
  0x51   : > { %534 = vmatpush1.msra.mxu0 %v467_v50  ;;  %1069 = vmatpush1.msra.mxu1 %v467_v50  ;;  %v494_v23 = vld [vmem:[%s1313_s7 + $0x148] sm:$0xff]  ;;  %v493_v24 = vld [vmem:[%s1313_s7 + $0x140] sm:$0xff]  ;;  %v492_v25 = vld [vmem:[%s1313_s7 + $0x138] sm:$0xff] }
  0x52   : > { %535 = vmatprep.subr.mxu0 %v466_v51  ;;  %1038 = vmatprep.subr.mxu1 %v466_v51  ;;  %v491_v26 = vld [vmem:[%s1313_s7 + $0x130] sm:$0xff]  ;;  %v490_v27 = vld [vmem:[%s1313_s7 + $0x128] sm:$0xff]  ;;  %v489_v28 = vld [vmem:[%s1313_s7 + $0x120] sm:$0xff] }
  0x53   : > { %536 = vmatpush1.msra.mxu0 %v465_v52  ;;  %1070 = vmatpush1.msra.mxu1 %v465_v52  ;;  %v488_v29 = vld [vmem:[%s1313_s7 + $0x118] sm:$0xff]  ;;  %v487_v30 = vld [vmem:[%s1313_s7 + $0x110] sm:$0xff]  ;;  %v486_v31 = vld [vmem:[%s1313_s7 + $0x108] sm:$0xff] }
  0x54   : > { %537 = vmatprep.subr.mxu0 %v464_v53  ;;  %1039 = vmatprep.subr.mxu1 %v464_v53  ;;  %v485_v32 = vld [vmem:[%s1313_s7 + $0x100] sm:$0xff]  ;;  %v422_v33 = vld [vmem:[%s1315_s8 + $0x8] sm:$0xff]  ;;  %v424_v37 = vld [vmem:[%s1315_s8 + $0x18] sm:$0xff] }
  0x55   : > { %538 = vmatpush1.msra.mxu0 %v463_v54  ;;  %1071 = vmatpush1.msra.mxu1 %v463_v54  ;;  %v438_v34 = vld [vmem:[%s1315_s8 + $0x88] sm:$0xff]  ;;  %v421_v35 = vld [vmem:[%s1315_s8] sm:$0xff]  ;;  %v440_v38 = vld [vmem:[%s1315_s8 + $0x98] sm:$0xff] }
  0x56   : > { %539 = vmatprep.subr.mxu0 %v462_v55  ;;  %1040 = vmatprep.subr.mxu1 %v462_v55  ;;  %v437_v36 = vld [vmem:[%s1315_s8 + $0x80] sm:$0xff]  ;;  %v423_v39 = vld [vmem:[%s1315_s8 + $0x10] sm:$0xff]  ;;  %v426_v41 = vld [vmem:[%s1315_s8 + $0x28] sm:$0xff] }
  0x57   : > { %540 = vmatpush1.msra.mxu0 %v461_v56  ;;  %1072 = vmatpush1.msra.mxu1 %v461_v56  ;;  %v439_v40 = vld [vmem:[%s1315_s8 + $0x90] sm:$0xff]  ;;  %v442_v42 = vld [vmem:[%s1315_s8 + $0xa8] sm:$0xff]  ;;  %v425_v43 = vld [vmem:[%s1315_s8 + $0x20] sm:$0xff] }
  0x58   : > { %541 = vmatprep.subr.mxu0 %v460_v57  ;;  %1041 = vmatprep.subr.mxu1 %v460_v57  ;;  %v441_v44 = vld [vmem:[%s1315_s8 + $0xa0] sm:$0xff]  ;;  %v428_v45 = vld [vmem:[%s1315_s8 + $0x38] sm:$0xff]  ;;  %v427_v47 = vld [vmem:[%s1315_s8 + $0x30] sm:$0xff] }
  0x59   : > { %542 = vmatpush1.msra.mxu0 %v459_v58  ;;  %1073 = vmatpush1.msra.mxu1 %v459_v58  ;;  %v444_v46 = vld [vmem:[%s1315_s8 + $0xb8] sm:$0xff]  ;;  %v443_v48 = vld [vmem:[%s1315_s8 + $0xb0] sm:$0xff]  ;;  %v430_v49 = vld [vmem:[%s1315_s8 + $0x48] sm:$0xff] }
  0x5a   : > { %543 = vmatprep.subr.mxu0 %v458_v59  ;;  %1042 = vmatprep.subr.mxu1 %v458_v59  ;;  %v446_v50 = vld [vmem:[%s1315_s8 + $0xc8] sm:$0xff]  ;;  %v429_v51 = vld [vmem:[%s1315_s8 + $0x40] sm:$0xff]  ;;  %v432_v53 = vld [vmem:[%s1315_s8 + $0x58] sm:$0xff] }
  0x5b   : > { %544 = vmatpush1.msra.mxu0 %v457_v60  ;;  %1074 = vmatpush1.msra.mxu1 %v457_v60  ;;  %v445_v52 = vld [vmem:[%s1315_s8 + $0xc0] sm:$0xff]  ;;  %v448_v54 = vld [vmem:[%s1315_s8 + $0xd8] sm:$0xff]  ;;  %v431_v55 = vld [vmem:[%s1315_s8 + $0x50] sm:$0xff] }
  0x5c   : > { %545 = vmatprep.subr.mxu0 %v456_v61  ;;  %1043 = vmatprep.subr.mxu1 %v456_v61  ;;  %v447_v56 = vld [vmem:[%s1315_s8 + $0xd0] sm:$0xff]  ;;  %v434_v57 = vld [vmem:[%s1315_s8 + $0x68] sm:$0xff]  ;;  %v433_v59 = vld [vmem:[%s1315_s8 + $0x60] sm:$0xff] }
  0x5d   : > { %546 = vmatpush1.msra.mxu0 %v455_v62  ;;  %1075 = vmatpush1.msra.mxu1 %v455_v62  ;;  %v450_v58 = vld [vmem:[%s1315_s8 + $0xe8] sm:$0xff]  ;;  %v449_v60 = vld [vmem:[%s1315_s8 + $0xe0] sm:$0xff]  ;;  %v436_v61 = vld [vmem:[%s1315_s8 + $0x78] sm:$0xff] }
  0x5e   : > { %547 = vmatprep.subr.mxu0 %v454_v63  ;;  %1044 = vmatprep.subr.mxu1 %v454_v63  ;;  %v452_v62 = vld [vmem:[%s1315_s8 + $0xf8] sm:$0xff]  ;;  %v435_v63 = vld [vmem:[%s1315_s8 + $0x70] sm:$0xff] }
  0x5f   : > { %548 = vmatpush1.msra.mxu0 %v453_v0  ;;  %1076 = vmatpush1.msra.mxu1 %v453_v0  ;;  %v451_v0 = vld [vmem:[%s1315_s8 + $0xf0] sm:$0xff] }
  0x60   : > { %549 = vmatprep.subr.mxu0 %v516_v1  ;;  %1045 = vmatprep.subr.mxu1 %v516_v1  ;;  %v389_v1 = vld [vmem:[#allocation2 + $0xb0] sm:$0xff] }
  0x61   : > { %550 = vmatpush2.msra.mxu0 %v515_v2  ;;  %1077 = vmatpush2.msra.mxu1 %v515_v2  ;;  %v405_v2 = vld [vmem:[#allocation2 + $0x38] sm:$0xff] }
  0x62   : > { %551 = vmatprep.subr.mxu0 %v514_v3  ;;  %1046 = vmatprep.subr.mxu1 %v514_v3 }
  0x63   : > { %552 = vmatpush2.msra.mxu0 %v513_v4  ;;  %1078 = vmatpush2.msra.mxu1 %v513_v4 }
  0x64   : > { %553 = vmatprep.subr.mxu0 %v512_v5  ;;  %1047 = vmatprep.subr.mxu1 %v512_v5  ;;  %v390_v5 = vld [vmem:[#allocation2] sm:$0xff] }
  0x65   : > { %554 = vmatpush2.msra.mxu0 %v511_v6  ;;  %1079 = vmatpush2.msra.mxu1 %v511_v6  ;;  %v406_v6 = vld [vmem:[#allocation2 + $0x58] sm:$0xff] }
  0x66   : > { %555 = vmatprep.subr.mxu0 %v510_v7  ;;  %1048 = vmatprep.subr.mxu1 %v510_v7 }
  0x67   : > { %556 = vmatpush2.msra.mxu0 %v509_v8  ;;  %1080 = vmatpush2.msra.mxu1 %v509_v8 }
  0x68   : > { %557 = vmatprep.subr.mxu0 %v508_v9  ;;  %1049 = vmatprep.subr.mxu1 %v508_v9 }
  0x69   : > { %558 = vmatpush2.msra.mxu0 %v507_v10  ;;  %1081 = vmatpush2.msra.mxu1 %v507_v10 }
  0x6a   : > { %559 = vmatprep.subr.mxu0 %v506_v11  ;;  %1050 = vmatprep.subr.mxu1 %v506_v11  ;;  %v391_v11 = vld [vmem:[#allocation2 + $0xd8] sm:$0xff] }
  0x6b   : > { %560 = vmatpush2.msra.mxu0 %v505_v12  ;;  %1082 = vmatpush2.msra.mxu1 %v505_v12  ;;  %v407_v12 = vld [vmem:[#allocation2 + $0x40] sm:$0xff] }
  0x6c   : > { %561 = vmatprep.subr.mxu0 %v504_v13  ;;  %1051 = vmatprep.subr.mxu1 %v504_v13 }
  0x6d   : > { %562 = vmatpush2.msra.mxu0 %v503_v14  ;;  %1083 = vmatpush2.msra.mxu1 %v503_v14 }
  0x6e   : > { %563 = vmatprep.subr.mxu0 %v502_v15  ;;  %1052 = vmatprep.subr.mxu1 %v502_v15 }
  0x6f   : > { %564 = vmatpush2.msra.mxu0 %v501_v16  ;;  %1084 = vmatpush2.msra.mxu1 %v501_v16 }
  0x70   : > { %565 = vmatprep.subr.mxu0 %v500_v17  ;;  %1053 = vmatprep.subr.mxu1 %v500_v17  ;;  %v392_v17 = vld [vmem:[#allocation2 + $0x18] sm:$0xff] }
  0x71   : > { %566 = vmatpush2.msra.mxu0 %v499_v18  ;;  %1085 = vmatpush2.msra.mxu1 %v499_v18  ;;  %v408_v18 = vld [vmem:[#allocation2 + $0xc8] sm:$0xff] }
  0x72   : > { %567 = vmatprep.subr.mxu0 %v498_v19  ;;  %1054 = vmatprep.subr.mxu1 %v498_v19 }
  0x73   : > { %568 = vmatpush2.msra.mxu0 %v497_v20  ;;  %1086 = vmatpush2.msra.mxu1 %v497_v20 }
  0x74   : > { %569 = vmatprep.subr.mxu0 %v496_v21  ;;  %1055 = vmatprep.subr.mxu1 %v496_v21 }
  0x75   : > { %570 = vmatpush2.msra.mxu0 %v495_v22  ;;  %1087 = vmatpush2.msra.mxu1 %v495_v22 }
  0x76   : > { %571 = vmatprep.subr.mxu0 %v494_v23  ;;  %1056 = vmatprep.subr.mxu1 %v494_v23  ;;  %v393_v23 = vld [vmem:[#allocation2 + $0x50] sm:$0xff] }
  0x77   : > { %572 = vmatpush2.msra.mxu0 %v493_v24  ;;  %1088 = vmatpush2.msra.mxu1 %v493_v24  ;;  %v409_v24 = vld [vmem:[#allocation2 + $0xe0] sm:$0xff] }
  0x78   : > { %573 = vmatprep.subr.mxu0 %v492_v25  ;;  %1057 = vmatprep.subr.mxu1 %v492_v25 }
  0x79   : > { %574 = vmatpush2.msra.mxu0 %v491_v26  ;;  %1089 = vmatpush2.msra.mxu1 %v491_v26 }
  0x7a   : > { %575 = vmatprep.subr.mxu0 %v490_v27  ;;  %1058 = vmatprep.subr.mxu1 %v490_v27 }
  0x7b   : > { %576 = vmatpush2.msra.mxu0 %v489_v28  ;;  %1090 = vmatpush2.msra.mxu1 %v489_v28 }
  0x7c   : > { %577 = vmatprep.subr.mxu0 %v488_v29  ;;  %1059 = vmatprep.subr.mxu1 %v488_v29  ;;  %v394_v29 = vld [vmem:[#allocation2 + $0x68] sm:$0xff] }
  0x7d   : > { %578 = vmatpush2.msra.mxu0 %v487_v30  ;;  %1091 = vmatpush2.msra.mxu1 %v487_v30  ;;  %v410_v30 = vld [vmem:[#allocation2 + $0x90] sm:$0xff] }
  0x7e   : > { %579 = vmatprep.subr.mxu0 %v486_v31  ;;  %1060 = vmatprep.subr.mxu1 %v486_v31 }
  0x7f   : > { %580 = vmatpush2.msra.mxu0 %v485_v32  ;;  %1092 = vmatpush2.msra.mxu1 %v485_v32 }
  0x80   : > { %581 = vmatprep.mubr.f32.mxu0 %v422_v33  ;;  %629 = vmatprep.mubr.f32.mxu1 %v438_v34 }
  0x81   : > { %582 = vmatmul.mubr.f32.vlgmr.msra.gmra.mxu0 %v421_v35  ;;  %630 = vmatmul.mubr.f32.vlgmr.msra.gmra.mxu1 %v437_v36  ;;  %v395_v35 = vld [vmem:[#allocation2 + $0x30] sm:$0xff] }
  0x82   : > { %587 = vmatprep.mubr.f32.mxu0 %v424_v37  ;;  %635 = vmatprep.mubr.f32.mxu1 %v440_v38  ;;  %v411_v36 = vld [vmem:[#allocation2 + $0x70] sm:$0xff] }
  0x85   : > { %588 = vmatmul.mubr.f32.gmra.mxu0 %v423_v39  ;;  %636 = vmatmul.mubr.f32.gmra.mxu1 %v439_v40 }
  0x86   : > { %593 = vmatprep.mubr.f32.mxu0 %v426_v41  ;;  %641 = vmatprep.mubr.f32.mxu1 %v442_v42  ;;  %v396_v41 = vld [vmem:[#allocation2 + $0x48] sm:$0xff]  ;;  %v412_v42 = vld [vmem:[#allocation2 + $0xc0] sm:$0xff] }
  0x89   : > { %594 = vmatmul.mubr.f32.gmra.mxu0 %v425_v43  ;;  %642 = vmatmul.mubr.f32.gmra.mxu1 %v441_v44 }
  0x8a   : > { %599 = vmatprep.mubr.f32.mxu0 %v428_v45  ;;  %647 = vmatprep.mubr.f32.mxu1 %v444_v46 }
  0x8d   : > { %600 = vmatmul.mubr.f32.gmra.mxu0 %v427_v47  ;;  %648 = vmatmul.mubr.f32.gmra.mxu1 %v443_v48  ;;  %v397_v47 = vld [vmem:[#allocation2 + $0x80] sm:$0xff]  ;;  %v413_v48 = vld [vmem:[#allocation2 + $0xa8] sm:$0xff] }
  0x8e   : > { %605 = vmatprep.mubr.f32.mxu0 %v430_v49  ;;  %653 = vmatprep.mubr.f32.mxu1 %v446_v50 }
  0x91   : > { %606 = vmatmul.mubr.f32.gmra.mxu0 %v429_v51  ;;  %654 = vmatmul.mubr.f32.gmra.mxu1 %v445_v52 }
  0x92   : > { %611 = vmatprep.mubr.f32.mxu0 %v432_v53  ;;  %659 = vmatprep.mubr.f32.mxu1 %v448_v54  ;;  %v398_v53 = vld [vmem:[#allocation2 + $0x88] sm:$0xff]  ;;  %v414_v54 = vld [vmem:[#allocation2 + $0xd0] sm:$0xff] }
  0x95   : > { %612 = vmatmul.mubr.f32.gmra.mxu0 %v431_v55  ;;  %660 = vmatmul.mubr.f32.gmra.mxu1 %v447_v56 }
  0x96   : > { %617 = vmatprep.mubr.f32.mxu0 %v434_v57  ;;  %665 = vmatprep.mubr.f32.mxu1 %v450_v58 }
  0x99   : > { %618 = vmatmul.mubr.f32.gmra.mxu0 %v433_v59  ;;  %666 = vmatmul.mubr.f32.gmra.mxu1 %v449_v60  ;;  %v399_v59 = vld [vmem:[#allocation2 + $0xe8] sm:$0xff]  ;;  %v415_v60 = vld [vmem:[#allocation2 + $0x10] sm:$0xff] }
  0x9a   : > { %623 = vmatprep.mubr.f32.mxu0 %v436_v61  ;;  %671 = vmatprep.mubr.f32.mxu1 %v452_v62 }
  0x9d   : > { %624 = vmatmul.mubr.f32.gmra.mxu0 %v435_v63  ;;  %672 = vmatmul.mubr.f32.gmra.mxu1 %v451_v0 }
 0x141   : > { %v583_v3 = vpop.f32.mrf.mxu0  ;;  %v631_v4 = vpop.f32.mrf.mxu1 }
 0x142   : > { %v678_v7 = vadd.f32 %v583_v3, %v389_v1  ;;  %v694_v8 = vadd.f32 %v631_v4, %v405_v2  ;;  %v400_v1 = vld [vmem:[#allocation2 + $0xb8] sm:$0xff]  ;;  %v416_v2 = vld [vmem:[#allocation2 + $0x28] sm:$0xff] }
 0x143   : > { %v585_v9 = vpop.f32.mrf.mxu0  ;;  %v633_v10 = vpop.f32.mrf.mxu1 }
 0x144   : > { %710 = vst [vmem:[#allocation2 + $0xb0] sm:$0xff] %v678_v7  ;;  %726 = vst [vmem:[#allocation2 + $0x38] sm:$0xff] %v694_v8  ;;  %v679_v13 = vadd.f32 %v585_v9, %v390_v5  ;;  %v695_v14 = vadd.f32 %v633_v10, %v406_v6  ;;  %v401_v7 = vld [vmem:[#allocation2 + $0x60] sm:$0xff] }
 0x145   : > { %v589_v15 = vpop.f32.mrf.mxu0  ;;  %v637_v16 = vpop.f32.mrf.mxu1  ;;  %v417_v8 = vld [vmem:[#allocation2 + $0xa0] sm:$0xff] }
 0x146   : > { %711 = vst [vmem:[#allocation2] sm:$0xff] %v679_v13  ;;  %727 = vst [vmem:[#allocation2 + $0x58] sm:$0xff] %v695_v14  ;;  %v680_v19 = vadd.f32 %v589_v15, %v391_v11  ;;  %v696_v20 = vadd.f32 %v637_v16, %v407_v12  ;;  %v402_v13 = vld [vmem:[#allocation2 + $0xf0] sm:$0xff]  ;;  %v418_v14 = vld [vmem:[#allocation2 + $0xf8] sm:$0xff] }
 0x147   : > { %v591_v21 = vpop.f32.mrf.mxu0  ;;  %v639_v22 = vpop.f32.mrf.mxu1 }
 0x148   : > { %712 = vst [vmem:[#allocation2 + $0xd8] sm:$0xff] %v680_v19  ;;  %728 = vst [vmem:[#allocation2 + $0x40] sm:$0xff] %v696_v20  ;;  %v681_v25 = vadd.f32 %v591_v21, %v392_v17  ;;  %v697_v26 = vadd.f32 %v639_v22, %v408_v18  ;;  %v403_v19 = vld [vmem:[#allocation2 + $0x8] sm:$0xff]  ;;  %v419_v20 = vld [vmem:[#allocation2 + $0x20] sm:$0xff] }
 0x149   : > { %v595_v27 = vpop.f32.mrf.mxu0  ;;  %v643_v28 = vpop.f32.mrf.mxu1 }
 0x14a   : > { %713 = vst [vmem:[#allocation2 + $0x18] sm:$0xff] %v681_v25  ;;  %729 = vst [vmem:[#allocation2 + $0xc8] sm:$0xff] %v697_v26  ;;  %v682_v31 = vadd.f32 %v595_v27, %v393_v23  ;;  %v698_v32 = vadd.f32 %v643_v28, %v409_v24  ;;  %v404_v25 = vld [vmem:[#allocation2 + $0x78] sm:$0xff] }
 0x14b   : > { %v597_v33 = vpop.f32.mrf.mxu0  ;;  %v645_v34 = vpop.f32.mrf.mxu1  ;;  %v420_v26 = vld [vmem:[#allocation2 + $0x98] sm:$0xff] }
 0x14c   : > { %714 = vst [vmem:[#allocation2 + $0x50] sm:$0xff] %v682_v31  ;;  %730 = vst [vmem:[#allocation2 + $0xe0] sm:$0xff] %v698_v32  ;;  %v683_v37 = vadd.f32 %v597_v33, %v394_v29  ;;  %v699_v38 = vadd.f32 %v645_v34, %v410_v30 }
 0x14d   : > { %v601_v39 = vpop.f32.mrf.mxu0  ;;  %v649_v40 = vpop.f32.mrf.mxu1 }
 0x14e   : > { %715 = vst [vmem:[#allocation2 + $0x68] sm:$0xff] %v683_v37  ;;  %731 = vst [vmem:[#allocation2 + $0x90] sm:$0xff] %v699_v38  ;;  %v684_v43 = vadd.f32 %v601_v39, %v395_v35  ;;  %v700_v44 = vadd.f32 %v649_v40, %v411_v36 }
 0x14f   : > { %v603_v45 = vpop.f32.mrf.mxu0  ;;  %v651_v46 = vpop.f32.mrf.mxu1 }
 0x150   : > { %716 = vst [vmem:[#allocation2 + $0x30] sm:$0xff] %v684_v43  ;;  %732 = vst [vmem:[#allocation2 + $0x70] sm:$0xff] %v700_v44  ;;  %v685_v49 = vadd.f32 %v603_v45, %v396_v41  ;;  %v701_v50 = vadd.f32 %v651_v46, %v412_v42 }
 0x151   : > { %v607_v51 = vpop.f32.mrf.mxu0  ;;  %v655_v52 = vpop.f32.mrf.mxu1 }
 0x152   : > { %717 = vst [vmem:[#allocation2 + $0x48] sm:$0xff] %v685_v49  ;;  %733 = vst [vmem:[#allocation2 + $0xc0] sm:$0xff] %v701_v50  ;;  %v686_v55 = vadd.f32 %v607_v51, %v397_v47  ;;  %v702_v56 = vadd.f32 %v655_v52, %v413_v48 }
 0x153   : > { %v609_v57 = vpop.f32.mrf.mxu0  ;;  %v657_v58 = vpop.f32.mrf.mxu1 }
 0x154   : > { %718 = vst [vmem:[#allocation2 + $0x80] sm:$0xff] %v686_v55  ;;  %734 = vst [vmem:[#allocation2 + $0xa8] sm:$0xff] %v702_v56  ;;  %v687_v61 = vadd.f32 %v609_v57, %v398_v53  ;;  %v703_v62 = vadd.f32 %v657_v58, %v414_v54 }
 0x155   : > { %v613_v63 = vpop.f32.mrf.mxu0  ;;  %v661_v0 = vpop.f32.mrf.mxu1 }
 0x156   : > { %719 = vst [vmem:[#allocation2 + $0x88] sm:$0xff] %v687_v61  ;;  %735 = vst [vmem:[#allocation2 + $0xd0] sm:$0xff] %v703_v62  ;;  %v688_v3 = vadd.f32 %v613_v63, %v399_v59  ;;  %v704_v4 = vadd.f32 %v661_v0, %v415_v60 }
 0x157   : > { %v615_v5 = vpop.f32.mrf.mxu0  ;;  %v663_v6 = vpop.f32.mrf.mxu1 }
 0x158   : > { %720 = vst [vmem:[#allocation2 + $0xe8] sm:$0xff] %v688_v3  ;;  %736 = vst [vmem:[#allocation2 + $0x10] sm:$0xff] %v704_v4  ;;  %v689_v9 = vadd.f32 %v615_v5, %v400_v1  ;;  %v705_v10 = vadd.f32 %v663_v6, %v416_v2 }
 0x159   : > { %v619_v11 = vpop.f32.mrf.mxu0  ;;  %v667_v12 = vpop.f32.mrf.mxu1 }
 0x15a   : > { %721 = vst [vmem:[#allocation2 + $0xb8] sm:$0xff] %v689_v9  ;;  %737 = vst [vmem:[#allocation2 + $0x28] sm:$0xff] %v705_v10  ;;  %v690_v15 = vadd.f32 %v619_v11, %v401_v7  ;;  %v706_v16 = vadd.f32 %v667_v12, %v417_v8 }
 0x15b   : > { %v621_v17 = vpop.f32.mrf.mxu0  ;;  %v669_v18 = vpop.f32.mrf.mxu1 }
 0x15c   : > { %722 = vst [vmem:[#allocation2 + $0x60] sm:$0xff] %v690_v15  ;;  %738 = vst [vmem:[#allocation2 + $0xa0] sm:$0xff] %v706_v16  ;;  %v691_v21 = vadd.f32 %v621_v17, %v402_v13  ;;  %v707_v22 = vadd.f32 %v669_v18, %v418_v14 }
 0x15d   : > { %v625_v23 = vpop.f32.mrf.mxu0  ;;  %v673_v24 = vpop.f32.mrf.mxu1 }
 0x15e   : > { %723 = vst [vmem:[#allocation2 + $0xf0] sm:$0xff] %v691_v21  ;;  %739 = vst [vmem:[#allocation2 + $0xf8] sm:$0xff] %v707_v22  ;;  %v692_v27 = vadd.f32 %v625_v23, %v403_v19  ;;  %v708_v28 = vadd.f32 %v673_v24, %v419_v20  ;;  %745 = sbr.rel (%p1022_p11) target bundleno = 384 (0x180), region = 63 }
 0x15f   : > { %v627_v29 = vpop.f32.mrf.mxu0  ;;  %v675_v30 = vpop.f32.mrf.mxu1 }
 0x160   : > { %724 = vst [vmem:[#allocation2 + $0x8] sm:$0xff] %v692_v27  ;;  %740 = vst [vmem:[#allocation2 + $0x20] sm:$0xff] %v708_v28  ;;  %v693_v31 = vadd.f32 %v627_v29, %v404_v25  ;;  %v709_v32 = vadd.f32 %v675_v30, %v420_v26 }
 0x162   : > { %725 = vst [vmem:[#allocation2 + $0x78] sm:$0xff] %v693_v31  ;;  %741 = vst [vmem:[#allocation2 + $0x98] sm:$0xff] %v709_v32 }
 0x163   : > { %v780_v33 = vlaneseq  ;;  %v778_v35 = vld [vmem:[%s1567_s2] sm:$0x3]  ;;  %v746_v36 = vld [vmem:[#allocation2 + $0xb0] sm:$0xff]  ;;  %v748_v40 = vld [vmem:[#allocation2 + $0xd8] sm:$0xff] }
 0x164   : > { %v747_v38 = vld [vmem:[#allocation2] sm:$0xff]  ;;  %v749_v41 = vld [vmem:[#allocation2 + $0x18] sm:$0xff]  ;;  %v750_v42 = vld [vmem:[#allocation2 + $0x50] sm:$0xff] }
 0x165   : > { %v781_v34 = vshrl.u32 %v780_v33, 7  ;;  %v751_v45 = vld [vmem:[#allocation2 + $0x68] sm:$0xff]  ;;  %v752_v46 = vld [vmem:[#allocation2 + $0x30] sm:$0xff]  ;;  %v754_v52 = vld [vmem:[#allocation2 + $0x80] sm:$0xff] }
 0x166   : > { %v753_v47 = vld [vmem:[#allocation2 + $0x48] sm:$0xff]  ;;  %v757_v59 = vld [vmem:[#allocation2 + $0xb8] sm:$0xff]  ;;  %v758_v60 = vld [vmem:[#allocation2 + $0x60] sm:$0xff] }
 0x167   : > { %v782_v37 = vsub.s32 0, %v781_v34  ;;  %v786_v39 = vsub.s32 1, %v781_v34  ;;  %v755_v53 = vld [vmem:[#allocation2 + $0x88] sm:$0xff]  ;;  %v759_v61 = vld [vmem:[#allocation2 + $0xf0] sm:$0xff]  ;;  %v762_v12 = vld [vmem:[#allocation2 + $0x38] sm:$0xff] }
 0x168   : > { %v756_v54 = vld [vmem:[#allocation2 + $0xe8] sm:$0xff]  ;;  %v763_v13 = vld [vmem:[#allocation2 + $0x58] sm:$0xff]  ;;  %v764_v14 = vld [vmem:[#allocation2 + $0x40] sm:$0xff] }
 0x169   : > { %v1418_v43 = vrot.slane %v778_v35, %v782_v37  ;;  %v1420_v44 = vrot.slane %v778_v35, %v786_v39  ;;  %v760_v2 = vld [vmem:[#allocation2 + $0x8] sm:$0xff]  ;;  %v761_v3 = vld [vmem:[#allocation2 + $0x78] sm:$0xff]  ;;  %v766_v20 = vld [vmem:[#allocation2 + $0xe0] sm:$0xff] }
 0x16a   : > { %v765_v19 = vld [vmem:[#allocation2 + $0xc8] sm:$0xff]  ;;  %v767_v21 = vld [vmem:[#allocation2 + $0x90] sm:$0xff]  ;;  %v769_v27 = vld [vmem:[#allocation2 + $0xc0] sm:$0xff] }
 0x16b   : > { %v790_v48 = vadd.f32 %v1418_v43, %v746_v36  ;;  %v791_v49 = vadd.f32 %v1420_v44, %v747_v38  ;;  %v792_v50 = vadd.f32 %v1418_v43, %v748_v40  ;;  %v793_v51 = vadd.f32 %v1420_v44, %v749_v41  ;;  %v768_v26 = vld [vmem:[#allocation2 + $0x70] sm:$0xff]  ;;  %v770_v36 = vld [vmem:[#allocation2 + $0xa8] sm:$0xff] }
 0x16c   : > { %v794_v55 = vadd.f32 %v1418_v43, %v750_v42  ;;  %v795_v56 = vadd.f32 %v1420_v44, %v751_v45  ;;  %v796_v57 = vadd.f32 %v1418_v43, %v752_v46  ;;  %v797_v58 = vadd.f32 %v1420_v44, %v753_v47  ;;  %v771_v37 = vld [vmem:[#allocation2 + $0xd0] sm:$0xff]  ;;  %v773_v45 = vld [vmem:[#allocation2 + $0x28] sm:$0xff]  ;;  %v774_v46 = vld [vmem:[#allocation2 + $0xa0] sm:$0xff] }
 0x16d   : > { %v822_v62 = vmax.f32 %v790_v48, 0.0  ;;  %v823_v63 = vmax.f32 %v791_v49, 0.0  ;;  %v824_v0 = vmax.f32 %v792_v50, 0.0  ;;  %v825_v1 = vmax.f32 %v793_v51, 0.0  ;;  %v772_v38 = vld [vmem:[#allocation2 + $0x10] sm:$0xff]  ;;  %v775_v47 = vld [vmem:[#allocation2 + $0xf8] sm:$0xff] }
 0x16e   : > { %v826_v4 = vmax.f32 %v794_v55, 0.0  ;;  %v827_v5 = vmax.f32 %v795_v56, 0.0  ;;  %v828_v6 = vmax.f32 %v796_v57, 0.0  ;;  %v829_v7 = vmax.f32 %v797_v58, 0.0 }
 0x16f   : > { %854 = vst [vmem:[%s1568_s3] sm:$0xff] %v822_v62  ;;  %855 = vst [vmem:[%s1568_s3 + $0x8] sm:$0xff] %v823_v63  ;;  %v798_v8 = vadd.f32 %v1418_v43, %v754_v52  ;;  %v799_v9 = vadd.f32 %v1420_v44, %v755_v53  ;;  %v800_v10 = vadd.f32 %v1418_v43, %v756_v54  ;;  %v776_v52 = vld [vmem:[#allocation2 + $0x20] sm:$0xff]  ;;  %v777_v53 = vld [vmem:[#allocation2 + $0x98] sm:$0xff] }
 0x170   : > { %856 = vst [vmem:[%s1568_s3 + $0x10] sm:$0xff] %v824_v0  ;;  %857 = vst [vmem:[%s1568_s3 + $0x18] sm:$0xff] %v825_v1  ;;  %v801_v11 = vadd.f32 %v1420_v44, %v757_v59  ;;  %v802_v15 = vadd.f32 %v1418_v43, %v758_v60  ;;  %v803_v16 = vadd.f32 %v1420_v44, %v759_v61 }
 0x171   : > { %858 = vst [vmem:[%s1568_s3 + $0x20] sm:$0xff] %v826_v4  ;;  %859 = vst [vmem:[%s1568_s3 + $0x28] sm:$0xff] %v827_v5  ;;  %v804_v17 = vadd.f32 %v1418_v43, %v760_v2  ;;  %v805_v18 = vadd.f32 %v1420_v44, %v761_v3  ;;  %v830_v22 = vmax.f32 %v798_v8, 0.0  ;;  %v831_v23 = vmax.f32 %v799_v9, 0.0 }
 0x172   : > { %860 = vst [vmem:[%s1568_s3 + $0x30] sm:$0xff] %v828_v6  ;;  %861 = vst [vmem:[%s1568_s3 + $0x38] sm:$0xff] %v829_v7  ;;  %v832_v24 = vmax.f32 %v800_v10, 0.0  ;;  %v833_v25 = vmax.f32 %v801_v11, 0.0  ;;  %v834_v28 = vmax.f32 %v802_v15, 0.0  ;;  %v835_v29 = vmax.f32 %v803_v16, 0.0 }
 0x173   : > { %v836_v30 = vmax.f32 %v804_v17, 0.0  ;;  %v837_v31 = vmax.f32 %v805_v18, 0.0  ;;  %862 = vst [vmem:[%s1568_s3 + $0x40] sm:$0xff] %v830_v22  ;;  %863 = vst [vmem:[%s1568_s3 + $0x48] sm:$0xff] %v831_v23  ;;  %v806_v32 = vadd.f32 %v1418_v43, %v762_v12  ;;  %v807_v33 = vadd.f32 %v1420_v44, %v763_v13 }
 0x174   : > { %864 = vst [vmem:[%s1568_s3 + $0x50] sm:$0xff] %v832_v24  ;;  %865 = vst [vmem:[%s1568_s3 + $0x58] sm:$0xff] %v833_v25  ;;  %v808_v34 = vadd.f32 %v1418_v43, %v764_v14  ;;  %v809_v35 = vadd.f32 %v1420_v44, %v765_v19  ;;  %v810_v39 = vadd.f32 %v1418_v43, %v766_v20 }
 0x175   : > { %866 = vst [vmem:[%s1568_s3 + $0x60] sm:$0xff] %v834_v28  ;;  %867 = vst [vmem:[%s1568_s3 + $0x68] sm:$0xff] %v835_v29  ;;  %v811_v40 = vadd.f32 %v1420_v44, %v767_v21  ;;  %v812_v41 = vadd.f32 %v1418_v43, %v768_v26  ;;  %v813_v42 = vadd.f32 %v1420_v44, %v769_v27  ;;  %v838_v48 = vmax.f32 %v806_v32, 0.0 }
 0x176   : > { %868 = vst [vmem:[%s1568_s3 + $0x70] sm:$0xff] %v836_v30  ;;  %869 = vst [vmem:[%s1568_s3 + $0x78] sm:$0xff] %v837_v31  ;;  %v839_v49 = vmax.f32 %v807_v33, 0.0  ;;  %v840_v50 = vmax.f32 %v808_v34, 0.0  ;;  %v841_v51 = vmax.f32 %v809_v35, 0.0  ;;  %v842_v54 = vmax.f32 %v810_v39, 0.0 }
 0x177   : > { %v843_v55 = vmax.f32 %v811_v40, 0.0  ;;  %v844_v56 = vmax.f32 %v812_v41, 0.0  ;;  %v845_v57 = vmax.f32 %v813_v42, 0.0  ;;  %870 = vst [vmem:[%s1568_s3 + $0x80] sm:$0xff] %v838_v48  ;;  %v814_v58 = vadd.f32 %v1418_v43, %v770_v36 }
 0x178   : > { %871 = vst [vmem:[%s1568_s3 + $0x88] sm:$0xff] %v839_v49  ;;  %872 = vst [vmem:[%s1568_s3 + $0x90] sm:$0xff] %v840_v50  ;;  %v815_v59 = vadd.f32 %v1420_v44, %v771_v37  ;;  %v816_v60 = vadd.f32 %v1418_v43, %v772_v38  ;;  %v817_v61 = vadd.f32 %v1420_v44, %v773_v45 }
 0x179   : > { %873 = vst [vmem:[%s1568_s3 + $0x98] sm:$0xff] %v841_v51  ;;  %874 = vst [vmem:[%s1568_s3 + $0xa0] sm:$0xff] %v842_v54  ;;  %v818_v62 = vadd.f32 %v1418_v43, %v774_v46  ;;  %v819_v63 = vadd.f32 %v1420_v44, %v775_v47  ;;  %v820_v0 = vadd.f32 %v1418_v43, %v776_v52  ;;  %v846_v2 = vmax.f32 %v814_v58, 0.0 }
 0x17a   : > { %875 = vst [vmem:[%s1568_s3 + $0xa8] sm:$0xff] %v843_v55  ;;  %876 = vst [vmem:[%s1568_s3 + $0xb0] sm:$0xff] %v844_v56  ;;  %v821_v1 = vadd.f32 %v1420_v44, %v777_v53  ;;  %v847_v3 = vmax.f32 %v815_v59, 0.0  ;;  %v848_v4 = vmax.f32 %v816_v60, 0.0  ;;  %v849_v5 = vmax.f32 %v817_v61, 0.0 }
 0x17b   : > { %877 = vst [vmem:[%s1568_s3 + $0xb8] sm:$0xff] %v845_v57  ;;  %v850_v6 = vmax.f32 %v818_v62, 0.0  ;;  %v851_v7 = vmax.f32 %v819_v63, 0.0  ;;  %v852_v8 = vmax.f32 %v820_v0, 0.0  ;;  %878 = vst [vmem:[%s1568_s3 + $0xc0] sm:$0xff] %v846_v2 }
 0x17c   : > { %v853_v9 = vmax.f32 %v821_v1, 0.0  ;;  %879 = vst [vmem:[%s1568_s3 + $0xc8] sm:$0xff] %v847_v3  ;;  %880 = vst [vmem:[%s1568_s3 + $0xd0] sm:$0xff] %v848_v4 }
 0x17d   : > { %881 = vst [vmem:[%s1568_s3 + $0xd8] sm:$0xff] %v849_v5  ;;  %882 = vst [vmem:[%s1568_s3 + $0xe0] sm:$0xff] %v850_v6 }
 0x17e   : > { %883 = vst [vmem:[%s1568_s3 + $0xe8] sm:$0xff] %v851_v7  ;;  %884 = vst [vmem:[%s1568_s3 + $0xf0] sm:$0xff] %v852_v8 }
 0x17f   : > { %885 = vst [vmem:[%s1568_s3 + $0xf8] sm:$0xff] %v853_v9 }
 0x180 PF: > { %s13_s16 = sadd.s32 1, %s1172_s16   ;;  %s1569_s12 = smov %s1160_s13 }
 0x181   : > { %p10_p12 = scmp.ge.s32.totalorder %s13_s16, 9   ;;  %s1570_s13 = smov %s1230_s20 }
 0x182   : > { %s1571_s14 = smov %s1168_s15  ;;  %s1572_s15 = smov %s1574_s17 }
 0x183   :  { %12 = sbr.rel (!%p10_p12) target bundleno = 3 (0x3), region = 104 }

// kernel: _lambda_.29
= control target key start
LH: loop header
LB: loop body
LE: loop exit
PB: predicated region body
PF: predicated region fallthrough
CT: control target
= control target key end

     0   :  { %s239_s6 = smov 0   ;;  %s256_s0 = inlined_call_operand.vmem [shape: f32[6,2,2,192], index: 0, kind: input, shape index: {}]   ;;  %s257_s1 = inlined_call_operand.vmem [shape: f32[4,2,192], index: 1, kind: output, shape index: {}]  }
   0x1 LB: > { %s199_s7 = sadd.s32 4294967295, %s227_s6   ;;  %p203_p0 = scmp.ge.s32.totalorder %s227_s6, 1  ;;  %s227_s6 = sphi %s239_s6, %s11_s6  }
   0x2   : > { %p89_p1 = scmp.lt.s32.totalorder %s227_s6, 3 }
   0x4   : > { %p90_p2 = pnand %p203_p0, %p89_p1 }
   0x5   : > { %s111_s8 = smul.u32 (!%p90_p2), 3, %s199_s7  ;;  %s206_s9 = sshll.u32 (!%p90_p2), %s199_s7, 1 }
   0x6   : > { %93 = sbr.rel (%p90_p2) target bundleno = 21 (0x15), region = 24  ;;  %p119_p3 = scmp.lt.s32.totalorder (!%p90_p2), %s206_s9, 3 }
   0x7   : > { %p112_p4 = scmp.lt.s32.totalorder (!%p90_p2), %s111_s8, 5 }
   0xb   : > { %s259_s9 = smov (!%p119_p3, %s206_s9), 3  ;;  %s261_s8 = smov (!%p112_p4, %s111_s8), 5  ;;  %vm136_vm0 = vcmask 1041408   ;;  %vm137_vm1 = vcmask 519170  }
   0xc   : > { %s211_s10 = sshll.u32 %s261_s8, 3  ;;  %s212_s14 = sshll.u32 %s259_s9, 2  ;;  %vm138_vm2 = vmor %vm137_vm1, %vm136_vm0 }
   0xd   : > { %s116_s13 = scalar_lea.vmem %s256_s0, %s211_s10  ;;  %s123_s17 = scalar_lea.vmem %s257_s1, %s212_s14 }
   0xe   : > { %v125_v0 = vld [vmem:[%s116_s13] sm:$0xf]  ;;  %v126_v1 = vld [vmem:[%s116_s13 + $0x4] sm:$0xf]  ;;  %v127_v2 = vld [vmem:[%s116_s13 + $0x8] sm:$0xf] }
   0xf   : > { %v128_v3 = vld [vmem:[%s116_s13 + $0xc] sm:$0xf]  ;;  %v131_v4 = vmax.f32 %v125_v0, %v126_v1  ;;  %v129_v5 = vld [vmem:[%s116_s13 + $0x10] sm:$0xf]  ;;  %v130_v6 = vld [vmem:[%s116_s13 + $0x14] sm:$0xf] }
  0x10   : > { %v132_v7 = vmax.f32 %v127_v2, %v128_v3  ;;  %v133_v8 = vmax.f32 %v129_v5, %v130_v6 }
  0x12   : > { %v134_v9 = vmax.f32 %v131_v4, %v132_v7  ;;  %v135_v10 = vmax.f32 %v132_v7, %v133_v8 }
  0x14   : > { %139 = vst.msk [vmem:[%s123_s17] sm:$0xf] %vm138_vm2, %v134_v9  ;;  %140 = vst.msk [vmem:[%s123_s17 + $0x4] sm:$0xf] %vm138_vm2, %v135_v10 }
  0x15 PF: > { %s11_s6 = sadd.s32 1, %s227_s6  }
  0x16   : > { %p8_p5 = scmp.ge.s32.totalorder %s11_s6, 4  }
  0x18   :  { %10 = sbr.rel (!%p8_p5) target bundleno = 1 (0x1), region = 54 }

</bundles_post_ra>
